<compile_context>
chip_gen: v5e
topology: v5e:2x2
jax: 0.10.0
libtpu: 0.0.40
codegen_flags: <defaults>
</compile_context>

<pallas_src>
import jax
import jax.numpy as jnp
import numpy as np
from jax.experimental import pallas as pl
from jax.experimental.pallas import tpu as pltpu

# ---- GeneratorLoss default hyper-parameters -------------------------------
W_COL = 1.0      # w_col
W_TEX = 0.001    # w_tex
W_PER = 0.1      # w_per
POOL_K = 5       # FilterLow: AvgPool2d(kernel_size=5, stride=1, padding=0), recursions=1
CONV_K = 3       # surrogate perceptual conv kernel
FEAT_C = 8       # surrogate perceptual feature channels
EPS = 1e-8

# Deterministic surrogate "perceptual" conv weights, baked in as compile-time constants.
_PERC_W = (np.random.default_rng(0).standard_normal(
    (FEAT_C, 3, CONV_K, CONV_K)).astype(np.float32) * 0.1)


def _vmem_limit_bytes():
    """Generation-gated VMEM budget: ~100MiB on 128MiB parts, <=48MiB on 64MiB parts."""
    try:
        cap = int(pltpu.get_tpu_info().vmem_capacity_bytes)
    except Exception:
        cap = 64 * 1024 * 1024
    return int(min(max(cap - 16 * 1024 * 1024, 32 * 1024 * 1024), 100 * 1024 * 1024))


def _make_kernel(img_shape, tex_shape):
    B, C, H, W = img_shape
    _, Ct, Ht, Wt = tex_shape
    Ho, Wo = H - POOL_K + 1, W - POOL_K + 1       # avg-pool output (padding=False)
    Hf, Wf = H - CONV_K + 1, W - CONV_K + 1       # conv-feature output

    def kernel(tex_ref, x_ref, y_ref, out_ref, col_acc, per_acc, tex_acc):
        b = pl.program_id(1)                      # position inside this batch group

        # ---- init accumulators at the start of every batch group ----------
        @pl.when(b == 0)
        def _init():
            col_acc[...] = jnp.zeros_like(col_acc)
            per_acc[...] = jnp.zeros_like(per_acc)
            tex_acc[...] = jnp.zeros_like(tex_acc)

        # Squeezed batch dim: refs are already (Ct,Ht,Wt) / (C,H,W).
        tex = tex_ref[...].astype(jnp.float32)    # (Ct, Ht, Wt)
        x = x_ref[...].astype(jnp.float32)        # (C, H, W)
        y = y_ref[...].astype(jnp.float32)        # (C, H, W)

        # ---- texture / adversarial generator term: accumulate -log(label+eps) ----
        # (all channels; finalize divides by B*Ct*Ht*Wt)
        tex_acc[...] += -jnp.log(tex + EPS)

        # Pool and conv are linear: pool(x)-pool(y)=pool(x-y), conv(x)-conv(y)=conv(x-y)
        d = x - y                                 # (C, H, W)

        # ---- color loss: separable 5x5 box filter (10 shifted adds, not 25) ----
        sw = d[:, :, 0:Wo]                        # sum along W (lane axis)
        for dw in range(1, POOL_K):
            sw = sw + d[:, :, dw:dw + Wo]
        pd = sw[:, 0:Ho, :]                       # sum along H (sublane axis)
        for dh in range(1, POOL_K):
            pd = pd + sw[:, dh:dh + Ho, :]
        # defer the /25 and the final mean to the finalize step
        col_acc[...] += jnp.sum(jnp.abs(pd), axis=0)     # (Ho, Wo)

        # ---- surrogate perceptual loss: fixed 3x3 conv features, |.| summed ----
        # Read-only shifted taps of `d` are built once (27 of them); each output channel
        # is a single fused multiply-add chain over the taps (kept in registers per vreg
        # tile), and |feat| is folded into per_elem immediately -> at most two large live
        # temporaries and no feature-map read-modify-write store passes.
        taps = []
        for ci in range(C):
            for dh in range(CONV_K):
                for dw in range(CONV_K):
                    taps.append(d[ci, dh:dh + Hf, dw:dw + Wf])   # (Hf, Wf), read-only

        per_elem = None
        for co in range(FEAT_C):
            w_flat = _PERC_W[co].reshape(-1)      # 27 compile-time scalars
            feat = float(w_flat[0]) * taps[0]
            for t in range(1, len(taps)):
                feat = feat + float(w_flat[t]) * taps[t]
            a = jnp.abs(feat)
            per_elem = a if per_elem is None else per_elem + a
        per_acc[...] += per_elem                  # (Hf, Wf)

        # ---- finalize: 3 full reductions + weighted sum, once per batch group ----
        # Dividing by the GLOBAL counts (B, ...) makes the summed per-group partials
        # equal the global means.
        @pl.when(b == pl.num_programs(1) - 1)
        def _finalize():
            tex_loss = jnp.sum(tex_acc[...]) / float(B * Ct * Ht * Wt)
            col_loss = jnp.sum(col_acc[...]) / float(B * C * Ho * Wo * POOL_K * POOL_K)
            per_loss = jnp.sum(per_acc[...]) / float(B * FEAT_C * Hf * Wf)
            partial = W_COL * col_loss + W_TEX * tex_loss + W_PER * per_loss
            # lane-dense (8,128) store of the per-group partial; wrapper reads [g,0,0].
            out_ref[...] = jnp.full((8, 128), partial, jnp.float32)

    return kernel


def generator_loss_forward(tex_labels, out_images, target_images):
    """Fused GeneratorLoss forward. Returns a scalar float32 loss."""
    B, C, H, W = out_images.shape
    Bt, Ct, Ht, Wt = tex_labels.shape
    assert Bt == B and target_images.shape == out_images.shape
    assert C == _PERC_W.shape[1], "surrogate perceptual conv expects RGB (C=3) inputs"
    assert H >= POOL_K and W >= POOL_K and H >= CONV_K and W >= CONV_K

    Ho, Wo = H - POOL_K + 1, W - POOL_K + 1
    Hf, Wf = H - CONV_K + 1, W - CONV_K + 1

    # Split the batch into G groups; the group axis is "parallel" so a 2-TC chip (v7x)
    # runs the groups on separate cores. Each group produces its own partial loss.
    G = 2 if (B >= 2 and B % 2 == 0) else 1
    NB = B // G

    kernel = _make_kernel(out_images.shape, tex_labels.shape)

    partials = pl.pallas_call(
        kernel,
        out_shape=jax.ShapeDtypeStruct((G, 8, 128), jnp.float32),
        grid=(G, NB),
        in_specs=[
            # None (squeezed) batch dim; last two block dims equal full array dims.
            pl.BlockSpec((None, Ct, Ht, Wt), lambda g, b: (g * NB + b, 0, 0, 0)),
            pl.BlockSpec((None, C, H, W), lambda g, b: (g * NB + b, 0, 0, 0)),
            pl.BlockSpec((None, C, H, W), lambda g, b: (g * NB + b, 0, 0, 0)),
        ],
        # Per-group output block (written once, on the group's last step) so each core
        # writes back only its own block under the parallel group axis.
        out_specs=pl.BlockSpec((None, 8, 128), lambda g, b: (g, 0, 0)),
        scratch_shapes=[
            pltpu.VMEM((Ho, Wo), jnp.float32),       # color-loss partial sums
            pltpu.VMEM((Hf, Wf), jnp.float32),       # perceptual partial sums
            pltpu.VMEM((Ct, Ht, Wt), jnp.float32),   # texture partial sums
        ],
        compiler_params=pltpu.CompilerParams(
            # group axis is independent (parallel); batch-within-group carries the
            # accumulation (arbitrary).
            dimension_semantics=("parallel", "arbitrary"),
            vmem_limit_bytes=_vmem_limit_bytes(),
        ),
    )(tex_labels, out_images, target_images)

    # Sum the per-group partial losses (each already divided by the global counts).
    return jnp.sum(partials[:, 0, 0])


# ---------------- pure-JAX reference (for correctness check only) ----------
def _reference(tex_labels, x, y):
    tex = tex_labels.astype(jnp.float32)
    x = x.astype(jnp.float32)
    y = y.astype(jnp.float32)
    tex_loss = jnp.mean(-jnp.log(tex + EPS))

    B, C, H, W = x.shape
    Ho, Wo = H - POOL_K + 1, W - POOL_K + 1

    def pool(a):
        acc = jnp.zeros((B, C, Ho, Wo), jnp.float32)
        for dh in range(POOL_K):
            for dw in range(POOL_K):
                acc = acc + a[:, :, dh:dh + Ho, dw:dw + Wo]
        return acc / (POOL_K * POOL_K)

    col_loss = jnp.mean(jnp.abs(pool(x) - pool(y)))

    w = jnp.asarray(_PERC_W, jnp.float32)  # (FEAT_C, C, K, K)
    Hf, Wf = H - CONV_K + 1, W - CONV_K + 1

    def conv(a):
        acc = jnp.zeros((B, FEAT_C, Hf, Wf), jnp.float32)
        for dh in range(CONV_K):
            for dw in range(CONV_K):
                acc = acc + jnp.einsum('oc,bchw->bohw', w[:, :, dh, dw],
                                       a[:, :, dh:dh + Hf, dw:dw + Wf])
        return acc

    per_loss = jnp.mean(jnp.abs(conv(x) - conv(y)))
    return W_COL * col_loss + W_TEX * tex_loss + W_PER * per_loss


if __name__ == "__main__":
    key = jax.random.PRNGKey(0)
    k1, k2, k3 = jax.random.split(key, 3)

    B, C, H, W = 2, 3, 16, 16
    # discriminator (texture) outputs in (0,1), patch-shaped
    tex_labels = jax.random.uniform(k1, (B, 1, H, W), jnp.float32,
                                    minval=0.05, maxval=0.95)
    out_images = jax.random.uniform(k2, (B, C, H, W), jnp.float32)
    target_images = jax.random.uniform(k3, (B, C, H, W), jnp.float32)

    loss = generator_loss_forward(tex_labels, out_images, target_images)
    loss = jax.block_until_ready(loss)

    ref = jax.block_until_ready(_reference(tex_labels, out_images, target_images))
    np.testing.assert_allclose(np.asarray(loss), np.asarray(ref),
                               rtol=1e-4, atol=1e-5)

    print("KERNEL_OK")
</pallas_src>

<mosaic_0001>
module attributes {stable_mosaic.version = 11 : i64} {
  func.func @kernel(%arg0: i32, %arg1: i32, %arg2: memref<1x1x16x16xf32, #tpu.memory_space<vmem>>, %arg3: memref<1x3x16x16xf32, #tpu.memory_space<vmem>>, %arg4: memref<1x3x16x16xf32, #tpu.memory_space<vmem>>, %arg5: memref<1x8x128xf32, #tpu.memory_space<vmem>>, %arg6: memref<12x12xf32, #tpu.memory_space<vmem>>, %arg7: memref<14x14xf32, #tpu.memory_space<vmem>>, %arg8: memref<1x16x16xf32, #tpu.memory_space<vmem>>) attributes {dimension_semantics = [#tpu.dimension_semantics<parallel>, #tpu.dimension_semantics<arbitrary>], iteration_bounds = array<i64: 2, 1>, scalar_prefetch = 0 : i64, scratch_operands = 3 : i64, tpu.core_type = #tpu.core_type<tc>, window_params = [{transform_indices = @transform_0, window_bounds = array<i64: 1, 1, 16, 16>}, {transform_indices = @transform_1, window_bounds = array<i64: 1, 3, 16, 16>}, {transform_indices = @transform_2, window_bounds = array<i64: 1, 3, 16, 16>}, {transform_indices = @transform_3, window_bounds = array<i64: 1, 8, 128>}]} {
    %c0_i32 = arith.constant 0 : i32
    %0 = arith.cmpi eq, %arg1, %c0_i32 : i32
    %1 = arith.extui %0 : i1 to i32
    %c0_i32_0 = arith.constant 0 : i32
    %2 = arith.cmpi ne, %1, %c0_i32_0 : i32
    scf.if %2 {
      %cst_246 = arith.constant 0.000000e+00 : f32
      %756 = vector.broadcast %cst_246 : f32 to vector<12x12xf32>
      %c0_247 = arith.constant 0 : index
      %c0_248 = arith.constant 0 : index
      %757 = vector.load %arg6[%c0_247, %c0_248] : memref<12x12xf32, #tpu.memory_space<vmem>>, vector<12x12xf32>
      tpu.vector_store %arg6[%c0_247, %c0_248], %756 {strides = array<i32>} : memref<12x12xf32, #tpu.memory_space<vmem>>, vector<12x12xf32>,
      %cst_249 = arith.constant 0.000000e+00 : f32
      %758 = vector.broadcast %cst_249 : f32 to vector<14x14xf32>
      %c0_250 = arith.constant 0 : index
      %c0_251 = arith.constant 0 : index
      %759 = vector.load %arg7[%c0_250, %c0_251] : memref<14x14xf32, #tpu.memory_space<vmem>>, vector<14x14xf32>
      tpu.vector_store %arg7[%c0_250, %c0_251], %758 {strides = array<i32>} : memref<14x14xf32, #tpu.memory_space<vmem>>, vector<14x14xf32>,
      %cst_252 = arith.constant 0.000000e+00 : f32
      %760 = vector.broadcast %cst_252 : f32 to vector<1x16x16xf32>
      %c0_253 = arith.constant 0 : index
      %c0_254 = arith.constant 0 : index
      %c0_255 = arith.constant 0 : index
      %761 = vector.load %arg8[%c0_253, %c0_254, %c0_255] : memref<1x16x16xf32, #tpu.memory_space<vmem>>, vector<1x16x16xf32>
      tpu.vector_store %arg8[%c0_253, %c0_254, %c0_255], %760 {strides = array<i32>} : memref<1x16x16xf32, #tpu.memory_space<vmem>>, vector<1x16x16xf32>,
    } else {
    }
    %c0 = arith.constant 0 : index
    %c0_1 = arith.constant 0 : index
    %c0_2 = arith.constant 0 : index
    %c0_3 = arith.constant 0 : index
    %3 = vector.load %arg2[%c0, %c0_1, %c0_2, %c0_3] : memref<1x1x16x16xf32, #tpu.memory_space<vmem>>, vector<1x1x16x16xf32>
    %4 = vector.shape_cast %3 : vector<1x1x16x16xf32> to vector<1x16x16xf32>
    %c0_4 = arith.constant 0 : index
    %c0_5 = arith.constant 0 : index
    %c0_6 = arith.constant 0 : index
    %c0_7 = arith.constant 0 : index
    %5 = vector.load %arg3[%c0_4, %c0_5, %c0_6, %c0_7] : memref<1x3x16x16xf32, #tpu.memory_space<vmem>>, vector<1x3x16x16xf32>
    %6 = vector.shape_cast %5 : vector<1x3x16x16xf32> to vector<3x16x16xf32>
    %c0_8 = arith.constant 0 : index
    %c0_9 = arith.constant 0 : index
    %c0_10 = arith.constant 0 : index
    %c0_11 = arith.constant 0 : index
    %7 = vector.load %arg4[%c0_8, %c0_9, %c0_10, %c0_11] : memref<1x3x16x16xf32, #tpu.memory_space<vmem>>, vector<1x3x16x16xf32>
    %8 = vector.shape_cast %7 : vector<1x3x16x16xf32> to vector<3x16x16xf32>
    %c0_12 = arith.constant 0 : index
    %c0_13 = arith.constant 0 : index
    %c0_14 = arith.constant 0 : index
    %9 = vector.load %arg8[%c0_12, %c0_13, %c0_14] : memref<1x16x16xf32, #tpu.memory_space<vmem>>, vector<1x16x16xf32>
    %cst = arith.constant 9.99999993E-9 : f32
    %10 = vector.broadcast %cst : f32 to vector<1x16x16xf32>
    %11 = arith.addf %4, %10 : vector<1x16x16xf32>
    %12 = math.log %11 : vector<1x16x16xf32>
    %cst_15 = arith.constant 0.000000e+00 : f32
    %13 = vector.broadcast %cst_15 : f32 to vector<1x16x16xf32>
    %14 = arith.subf %13, %12 : vector<1x16x16xf32>
    %15 = arith.addf %9, %14 : vector<1x16x16xf32>
    %c0_16 = arith.constant 0 : index
    %c0_17 = arith.constant 0 : index
    %c0_18 = arith.constant 0 : index
    %16 = vector.load %arg8[%c0_16, %c0_17, %c0_18] : memref<1x16x16xf32, #tpu.memory_space<vmem>>, vector<1x16x16xf32>
    tpu.vector_store %arg8[%c0_16, %c0_17, %c0_18], %15 {strides = array<i32>} : memref<1x16x16xf32, #tpu.memory_space<vmem>>, vector<1x16x16xf32>,
    %17 = arith.subf %6, %8 : vector<3x16x16xf32>
    %18 = vector.extract_strided_slice %17 {offsets = [0, 0, 0], sizes = [3, 16, 12], strides = [1, 1, 1]} : vector<3x16x16xf32> to vector<3x16x12xf32>
    %19 = vector.extract_strided_slice %17 {offsets = [0, 0, 1], sizes = [3, 16, 12], strides = [1, 1, 1]} : vector<3x16x16xf32> to vector<3x16x12xf32>
    %20 = arith.addf %18, %19 : vector<3x16x12xf32>
    %21 = vector.extract_strided_slice %17 {offsets = [0, 0, 2], sizes = [3, 16, 12], strides = [1, 1, 1]} : vector<3x16x16xf32> to vector<3x16x12xf32>
    %22 = arith.addf %20, %21 : vector<3x16x12xf32>
    %23 = vector.extract_strided_slice %17 {offsets = [0, 0, 3], sizes = [3, 16, 12], strides = [1, 1, 1]} : vector<3x16x16xf32> to vector<3x16x12xf32>
    %24 = arith.addf %22, %23 : vector<3x16x12xf32>
    %25 = vector.extract_strided_slice %17 {offsets = [0, 0, 4], sizes = [3, 16, 12], strides = [1, 1, 1]} : vector<3x16x16xf32> to vector<3x16x12xf32>
    %26 = arith.addf %24, %25 : vector<3x16x12xf32>
    %27 = vector.extract_strided_slice %26 {offsets = [0, 0, 0], sizes = [3, 12, 12], strides = [1, 1, 1]} : vector<3x16x12xf32> to vector<3x12x12xf32>
    %28 = vector.extract_strided_slice %26 {offsets = [0, 1, 0], sizes = [3, 12, 12], strides = [1, 1, 1]} : vector<3x16x12xf32> to vector<3x12x12xf32>
    %29 = arith.addf %27, %28 : vector<3x12x12xf32>
    %30 = vector.extract_strided_slice %26 {offsets = [0, 2, 0], sizes = [3, 12, 12], strides = [1, 1, 1]} : vector<3x16x12xf32> to vector<3x12x12xf32>
    %31 = arith.addf %29, %30 : vector<3x12x12xf32>
    %32 = vector.extract_strided_slice %26 {offsets = [0, 3, 0], sizes = [3, 12, 12], strides = [1, 1, 1]} : vector<3x16x12xf32> to vector<3x12x12xf32>
    %33 = arith.addf %31, %32 : vector<3x12x12xf32>
    %34 = vector.extract_strided_slice %26 {offsets = [0, 4, 0], sizes = [3, 12, 12], strides = [1, 1, 1]} : vector<3x16x12xf32> to vector<3x12x12xf32>
    %35 = arith.addf %33, %34 : vector<3x12x12xf32>
    %c0_19 = arith.constant 0 : index
    %c0_20 = arith.constant 0 : index
    %36 = vector.load %arg6[%c0_19, %c0_20] : memref<12x12xf32, #tpu.memory_space<vmem>>, vector<12x12xf32>
    %37 = math.absf %35 : vector<3x12x12xf32>
    %cst_21 = arith.constant dense<0.000000e+00> : vector<12x12xf32>
    %38 = vector.multi_reduction <add>, %37, %cst_21 [0] : vector<3x12x12xf32> to vector<12x12xf32>
    %39 = arith.addf %36, %38 : vector<12x12xf32>
    %c0_22 = arith.constant 0 : index
    %c0_23 = arith.constant 0 : index
    %40 = vector.load %arg6[%c0_22, %c0_23] : memref<12x12xf32, #tpu.memory_space<vmem>>, vector<12x12xf32>
    tpu.vector_store %arg6[%c0_22, %c0_23], %39 {strides = array<i32>} : memref<12x12xf32, #tpu.memory_space<vmem>>, vector<12x12xf32>,
    %41 = vector.extract_strided_slice %17 {offsets = [0, 0, 0], sizes = [1, 14, 14], strides = [1, 1, 1]} : vector<3x16x16xf32> to vector<1x14x14xf32>
    %42 = vector.shape_cast %41 : vector<1x14x14xf32> to vector<14x14xf32>
    %43 = vector.extract_strided_slice %17 {offsets = [0, 0, 1], sizes = [1, 14, 14], strides = [1, 1, 1]} : vector<3x16x16xf32> to vector<1x14x14xf32>
    %44 = vector.shape_cast %43 : vector<1x14x14xf32> to vector<14x14xf32>
    %45 = vector.extract_strided_slice %17 {offsets = [0, 0, 2], sizes = [1, 14, 14], strides = [1, 1, 1]} : vector<3x16x16xf32> to vector<1x14x14xf32>
    %46 = vector.shape_cast %45 : vector<1x14x14xf32> to vector<14x14xf32>
    %47 = vector.extract_strided_slice %17 {offsets = [0, 1, 0], sizes = [1, 14, 14], strides = [1, 1, 1]} : vector<3x16x16xf32> to vector<1x14x14xf32>
    %48 = vector.shape_cast %47 : vector<1x14x14xf32> to vector<14x14xf32>
    %49 = vector.extract_strided_slice %17 {offsets = [0, 1, 1], sizes = [1, 14, 14], strides = [1, 1, 1]} : vector<3x16x16xf32> to vector<1x14x14xf32>
    %50 = vector.shape_cast %49 : vector<1x14x14xf32> to vector<14x14xf32>
    %51 = vector.extract_strided_slice %17 {offsets = [0, 1, 2], sizes = [1, 14, 14], strides = [1, 1, 1]} : vector<3x16x16xf32> to vector<1x14x14xf32>
    %52 = vector.shape_cast %51 : vector<1x14x14xf32> to vector<14x14xf32>
    %53 = vector.extract_strided_slice %17 {offsets = [0, 2, 0], sizes = [1, 14, 14], strides = [1, 1, 1]} : vector<3x16x16xf32> to vector<1x14x14xf32>
    %54 = vector.shape_cast %53 : vector<1x14x14xf32> to vector<14x14xf32>
    %55 = vector.extract_strided_slice %17 {offsets = [0, 2, 1], sizes = [1, 14, 14], strides = [1, 1, 1]} : vector<3x16x16xf32> to vector<1x14x14xf32>
    %56 = vector.shape_cast %55 : vector<1x14x14xf32> to vector<14x14xf32>
    %57 = vector.extract_strided_slice %17 {offsets = [0, 2, 2], sizes = [1, 14, 14], strides = [1, 1, 1]} : vector<3x16x16xf32> to vector<1x14x14xf32>
    %58 = vector.shape_cast %57 : vector<1x14x14xf32> to vector<14x14xf32>
    %59 = vector.extract_strided_slice %17 {offsets = [1, 0, 0], sizes = [1, 14, 14], strides = [1, 1, 1]} : vector<3x16x16xf32> to vector<1x14x14xf32>
    %60 = vector.shape_cast %59 : vector<1x14x14xf32> to vector<14x14xf32>
    %61 = vector.extract_strided_slice %17 {offsets = [1, 0, 1], sizes = [1, 14, 14], strides = [1, 1, 1]} : vector<3x16x16xf32> to vector<1x14x14xf32>
    %62 = vector.shape_cast %61 : vector<1x14x14xf32> to vector<14x14xf32>
    %63 = vector.extract_strided_slice %17 {offsets = [1, 0, 2], sizes = [1, 14, 14], strides = [1, 1, 1]} : vector<3x16x16xf32> to vector<1x14x14xf32>
    %64 = vector.shape_cast %63 : vector<1x14x14xf32> to vector<14x14xf32>
    %65 = vector.extract_strided_slice %17 {offsets = [1, 1, 0], sizes = [1, 14, 14], strides = [1, 1, 1]} : vector<3x16x16xf32> to vector<1x14x14xf32>
    %66 = vector.shape_cast %65 : vector<1x14x14xf32> to vector<14x14xf32>
    %67 = vector.extract_strided_slice %17 {offsets = [1, 1, 1], sizes = [1, 14, 14], strides = [1, 1, 1]} : vector<3x16x16xf32> to vector<1x14x14xf32>
    %68 = vector.shape_cast %67 : vector<1x14x14xf32> to vector<14x14xf32>
    %69 = vector.extract_strided_slice %17 {offsets = [1, 1, 2], sizes = [1, 14, 14], strides = [1, 1, 1]} : vector<3x16x16xf32> to vector<1x14x14xf32>
    %70 = vector.shape_cast %69 : vector<1x14x14xf32> to vector<14x14xf32>
    %71 = vector.extract_strided_slice %17 {offsets = [1, 2, 0], sizes = [1, 14, 14], strides = [1, 1, 1]} : vector<3x16x16xf32> to vector<1x14x14xf32>
    %72 = vector.shape_cast %71 : vector<1x14x14xf32> to vector<14x14xf32>
    %73 = vector.extract_strided_slice %17 {offsets = [1, 2, 1], sizes = [1, 14, 14], strides = [1, 1, 1]} : vector<3x16x16xf32> to vector<1x14x14xf32>
    %74 = vector.shape_cast %73 : vector<1x14x14xf32> to vector<14x14xf32>
    %75 = vector.extract_strided_slice %17 {offsets = [1, 2, 2], sizes = [1, 14, 14], strides = [1, 1, 1]} : vector<3x16x16xf32> to vector<1x14x14xf32>
    %76 = vector.shape_cast %75 : vector<1x14x14xf32> to vector<14x14xf32>
    %77 = vector.extract_strided_slice %17 {offsets = [2, 0, 0], sizes = [1, 14, 14], strides = [1, 1, 1]} : vector<3x16x16xf32> to vector<1x14x14xf32>
    %78 = vector.shape_cast %77 : vector<1x14x14xf32> to vector<14x14xf32>
    %79 = vector.extract_strided_slice %17 {offsets = [2, 0, 1], sizes = [1, 14, 14], strides = [1, 1, 1]} : vector<3x16x16xf32> to vector<1x14x14xf32>
    %80 = vector.shape_cast %79 : vector<1x14x14xf32> to vector<14x14xf32>
    %81 = vector.extract_strided_slice %17 {offsets = [2, 0, 2], sizes = [1, 14, 14], strides = [1, 1, 1]} : vector<3x16x16xf32> to vector<1x14x14xf32>
    %82 = vector.shape_cast %81 : vector<1x14x14xf32> to vector<14x14xf32>
    %83 = vector.extract_strided_slice %17 {offsets = [2, 1, 0], sizes = [1, 14, 14], strides = [1, 1, 1]} : vector<3x16x16xf32> to vector<1x14x14xf32>
    %84 = vector.shape_cast %83 : vector<1x14x14xf32> to vector<14x14xf32>
    %85 = vector.extract_strided_slice %17 {offsets = [2, 1, 1], sizes = [1, 14, 14], strides = [1, 1, 1]} : vector<3x16x16xf32> to vector<1x14x14xf32>
    %86 = vector.shape_cast %85 : vector<1x14x14xf32> to vector<14x14xf32>
    %87 = vector.extract_strided_slice %17 {offsets = [2, 1, 2], sizes = [1, 14, 14], strides = [1, 1, 1]} : vector<3x16x16xf32> to vector<1x14x14xf32>
    %88 = vector.shape_cast %87 : vector<1x14x14xf32> to vector<14x14xf32>
    %89 = vector.extract_strided_slice %17 {offsets = [2, 2, 0], sizes = [1, 14, 14], strides = [1, 1, 1]} : vector<3x16x16xf32> to vector<1x14x14xf32>
    %90 = vector.shape_cast %89 : vector<1x14x14xf32> to vector<14x14xf32>
    %91 = vector.extract_strided_slice %17 {offsets = [2, 2, 1], sizes = [1, 14, 14], strides = [1, 1, 1]} : vector<3x16x16xf32> to vector<1x14x14xf32>
    %92 = vector.shape_cast %91 : vector<1x14x14xf32> to vector<14x14xf32>
    %93 = vector.extract_strided_slice %17 {offsets = [2, 2, 2], sizes = [1, 14, 14], strides = [1, 1, 1]} : vector<3x16x16xf32> to vector<1x14x14xf32>
    %94 = vector.shape_cast %93 : vector<1x14x14xf32> to vector<14x14xf32>
    %cst_24 = arith.constant 0.0125730215 : f32
    %95 = vector.broadcast %cst_24 : f32 to vector<14x14xf32>
    %96 = arith.mulf %95, %42 : vector<14x14xf32>
    %cst_25 = arith.constant -0.0132104857 : f32
    %97 = vector.broadcast %cst_25 : f32 to vector<14x14xf32>
    %98 = arith.mulf %97, %44 : vector<14x14xf32>
    %99 = arith.addf %96, %98 : vector<14x14xf32>
    %cst_26 = arith.constant 0.0640422627 : f32
    %100 = vector.broadcast %cst_26 : f32 to vector<14x14xf32>
    %101 = arith.mulf %100, %46 : vector<14x14xf32>
    %102 = arith.addf %99, %101 : vector<14x14xf32>
    %cst_27 = arith.constant 0.0104900114 : f32
    %103 = vector.broadcast %cst_27 : f32 to vector<14x14xf32>
    %104 = arith.mulf %103, %48 : vector<14x14xf32>
    %105 = arith.addf %102, %104 : vector<14x14xf32>
    %cst_28 = arith.constant -0.0535669401 : f32
    %106 = vector.broadcast %cst_28 : f32 to vector<14x14xf32>
    %107 = arith.mulf %106, %50 : vector<14x14xf32>
    %108 = arith.addf %105, %107 : vector<14x14xf32>
    %cst_29 = arith.constant 0.0361595079 : f32
    %109 = vector.broadcast %cst_29 : f32 to vector<14x14xf32>
    %110 = arith.mulf %109, %52 : vector<14x14xf32>
    %111 = arith.addf %108, %110 : vector<14x14xf32>
    %cst_30 = arith.constant 1.304000e-01 : f32
    %112 = vector.broadcast %cst_30 : f32 to vector<14x14xf32>
    %113 = arith.mulf %112, %54 : vector<14x14xf32>
    %114 = arith.addf %111, %113 : vector<14x14xf32>
    %cst_31 = arith.constant 9.470810e-02 : f32
    %115 = vector.broadcast %cst_31 : f32 to vector<14x14xf32>
    %116 = arith.mulf %115, %56 : vector<14x14xf32>
    %117 = arith.addf %114, %116 : vector<14x14xf32>
    %cst_32 = arith.constant -0.0703735277 : f32
    %118 = vector.broadcast %cst_32 : f32 to vector<14x14xf32>
    %119 = arith.mulf %118, %58 : vector<14x14xf32>
    %120 = arith.addf %117, %119 : vector<14x14xf32>
    %cst_33 = arith.constant -0.126542151 : f32
    %121 = vector.broadcast %cst_33 : f32 to vector<14x14xf32>
    %122 = arith.mulf %121, %60 : vector<14x14xf32>
    %123 = arith.addf %120, %122 : vector<14x14xf32>
    %cst_34 = arith.constant -0.0623274446 : f32
    %124 = vector.broadcast %cst_34 : f32 to vector<14x14xf32>
    %125 = arith.mulf %124, %62 : vector<14x14xf32>
    %126 = arith.addf %123, %125 : vector<14x14xf32>
    %cst_35 = arith.constant 0.00413259817 : f32
    %127 = vector.broadcast %cst_35 : f32 to vector<14x14xf32>
    %128 = arith.mulf %127, %64 : vector<14x14xf32>
    %129 = arith.addf %126, %128 : vector<14x14xf32>
    %cst_36 = arith.constant -0.232503086 : f32
    %130 = vector.broadcast %cst_36 : f32 to vector<14x14xf32>
    %131 = arith.mulf %130, %66 : vector<14x14xf32>
    %132 = arith.addf %129, %131 : vector<14x14xf32>
    %cst_37 = arith.constant -0.0218791664 : f32
    %133 = vector.broadcast %cst_37 : f32 to vector<14x14xf32>
    %134 = arith.mulf %133, %68 : vector<14x14xf32>
    %135 = arith.addf %132, %134 : vector<14x14xf32>
    %cst_38 = arith.constant -0.124591105 : f32
    %136 = vector.broadcast %cst_38 : f32 to vector<14x14xf32>
    %137 = arith.mulf %136, %70 : vector<14x14xf32>
    %138 = arith.addf %135, %137 : vector<14x14xf32>
    %cst_39 = arith.constant -0.0732267424 : f32
    %139 = vector.broadcast %cst_39 : f32 to vector<14x14xf32>
    %140 = arith.mulf %139, %72 : vector<14x14xf32>
    %141 = arith.addf %138, %140 : vector<14x14xf32>
    %cst_40 = arith.constant -0.0544259027 : f32
    %142 = vector.broadcast %cst_40 : f32 to vector<14x14xf32>
    %143 = arith.mulf %142, %74 : vector<14x14xf32>
    %144 = arith.addf %141, %143 : vector<14x14xf32>
    %cst_41 = arith.constant -0.0316300169 : f32
    %145 = vector.broadcast %cst_41 : f32 to vector<14x14xf32>
    %146 = arith.mulf %145, %76 : vector<14x14xf32>
    %147 = arith.addf %144, %146 : vector<14x14xf32>
    %cst_42 = arith.constant 0.0411630534 : f32
    %148 = vector.broadcast %cst_42 : f32 to vector<14x14xf32>
    %149 = arith.mulf %148, %78 : vector<14x14xf32>
    %150 = arith.addf %147, %149 : vector<14x14xf32>
    %cst_43 = arith.constant 0.10425134 : f32
    %151 = vector.broadcast %cst_43 : f32 to vector<14x14xf32>
    %152 = arith.mulf %151, %80 : vector<14x14xf32>
    %153 = arith.addf %150, %152 : vector<14x14xf32>
    %cst_44 = arith.constant -0.012853466 : f32
    %154 = vector.broadcast %cst_44 : f32 to vector<14x14xf32>
    %155 = arith.mulf %154, %82 : vector<14x14xf32>
    %156 = arith.addf %153, %155 : vector<14x14xf32>
    %cst_45 = arith.constant 0.136646345 : f32
    %157 = vector.broadcast %cst_45 : f32 to vector<14x14xf32>
    %158 = arith.mulf %157, %84 : vector<14x14xf32>
    %159 = arith.addf %156, %158 : vector<14x14xf32>
    %cst_46 = arith.constant -0.066519469 : f32
    %160 = vector.broadcast %cst_46 : f32 to vector<14x14xf32>
    %161 = arith.mulf %160, %86 : vector<14x14xf32>
    %162 = arith.addf %159, %161 : vector<14x14xf32>
    %cst_47 = arith.constant 0.0351510085 : f32
    %163 = vector.broadcast %cst_47 : f32 to vector<14x14xf32>
    %164 = arith.mulf %163, %88 : vector<14x14xf32>
    %165 = arith.addf %162, %164 : vector<14x14xf32>
    %cst_48 = arith.constant 0.0903470143 : f32
    %166 = vector.broadcast %cst_48 : f32 to vector<14x14xf32>
    %167 = arith.mulf %166, %90 : vector<14x14xf32>
    %168 = arith.addf %165, %167 : vector<14x14xf32>
    %cst_49 = arith.constant 9.401230e-03 : f32
    %169 = vector.broadcast %cst_49 : f32 to vector<14x14xf32>
    %170 = arith.mulf %169, %92 : vector<14x14xf32>
    %171 = arith.addf %168, %170 : vector<14x14xf32>
    %cst_50 = arith.constant -0.0743499324 : f32
    %172 = vector.broadcast %cst_50 : f32 to vector<14x14xf32>
    %173 = arith.mulf %172, %94 : vector<14x14xf32>
    %174 = arith.addf %171, %173 : vector<14x14xf32>
    %175 = math.absf %174 : vector<14x14xf32>
    %cst_51 = arith.constant -0.0921725407 : f32
    %176 = vector.broadcast %cst_51 : f32 to vector<14x14xf32>
    %177 = arith.mulf %176, %42 : vector<14x14xf32>
    %cst_52 = arith.constant -0.0457725823 : f32
    %178 = vector.broadcast %cst_52 : f32 to vector<14x14xf32>
    %179 = arith.mulf %178, %44 : vector<14x14xf32>
    %180 = arith.addf %177, %179 : vector<14x14xf32>
    %cst_53 = arith.constant 0.022019513 : f32
    %181 = vector.broadcast %cst_53 : f32 to vector<14x14xf32>
    %182 = arith.mulf %181, %46 : vector<14x14xf32>
    %183 = arith.addf %180, %182 : vector<14x14xf32>
    %cst_54 = arith.constant -0.100961819 : f32
    %184 = vector.broadcast %cst_54 : f32 to vector<14x14xf32>
    %185 = arith.mulf %184, %48 : vector<14x14xf32>
    %186 = arith.addf %183, %185 : vector<14x14xf32>
    %cst_55 = arith.constant -0.0209175572 : f32
    %187 = vector.broadcast %cst_55 : f32 to vector<14x14xf32>
    %188 = arith.mulf %187, %50 : vector<14x14xf32>
    %189 = arith.addf %186, %188 : vector<14x14xf32>
    %cst_56 = arith.constant -0.0159225017 : f32
    %190 = vector.broadcast %cst_56 : f32 to vector<14x14xf32>
    %191 = arith.mulf %190, %52 : vector<14x14xf32>
    %192 = arith.addf %189, %191 : vector<14x14xf32>
    %cst_57 = arith.constant 0.054084558 : f32
    %193 = vector.broadcast %cst_57 : f32 to vector<14x14xf32>
    %194 = arith.mulf %193, %54 : vector<14x14xf32>
    %195 = arith.addf %192, %194 : vector<14x14xf32>
    %cst_58 = arith.constant 0.0214659125 : f32
    %196 = vector.broadcast %cst_58 : f32 to vector<14x14xf32>
    %197 = arith.mulf %196, %56 : vector<14x14xf32>
    %198 = arith.addf %195, %197 : vector<14x14xf32>
    %cst_59 = arith.constant 0.035537269 : f32
    %199 = vector.broadcast %cst_59 : f32 to vector<14x14xf32>
    %200 = arith.mulf %199, %58 : vector<14x14xf32>
    %201 = arith.addf %198, %200 : vector<14x14xf32>
    %cst_60 = arith.constant -0.0653828606 : f32
    %202 = vector.broadcast %cst_60 : f32 to vector<14x14xf32>
    %203 = arith.mulf %202, %60 : vector<14x14xf32>
    %204 = arith.addf %201, %203 : vector<14x14xf32>
    %cst_61 = arith.constant -0.0129613644 : f32
    %205 = vector.broadcast %cst_61 : f32 to vector<14x14xf32>
    %206 = arith.mulf %205, %62 : vector<14x14xf32>
    %207 = arith.addf %204, %206 : vector<14x14xf32>
    %cst_62 = arith.constant 0.0783975496 : f32
    %208 = vector.broadcast %cst_62 : f32 to vector<14x14xf32>
    %209 = arith.mulf %208, %64 : vector<14x14xf32>
    %210 = arith.addf %207, %209 : vector<14x14xf32>
    %cst_63 = arith.constant 0.149343118 : f32
    %211 = vector.broadcast %cst_63 : f32 to vector<14x14xf32>
    %212 = arith.mulf %211, %66 : vector<14x14xf32>
    %213 = arith.addf %210, %212 : vector<14x14xf32>
    %cst_64 = arith.constant -0.125906557 : f32
    %214 = vector.broadcast %cst_64 : f32 to vector<14x14xf32>
    %215 = arith.mulf %214, %68 : vector<14x14xf32>
    %216 = arith.addf %213, %215 : vector<14x14xf32>
    %cst_65 = arith.constant 0.151392385 : f32
    %217 = vector.broadcast %cst_65 : f32 to vector<14x14xf32>
    %218 = arith.mulf %217, %70 : vector<14x14xf32>
    %219 = arith.addf %216, %218 : vector<14x14xf32>
    %cst_66 = arith.constant 0.134587541 : f32
    %220 = vector.broadcast %cst_66 : f32 to vector<14x14xf32>
    %221 = arith.mulf %220, %72 : vector<14x14xf32>
    %222 = arith.addf %219, %221 : vector<14x14xf32>
    %cst_67 = arith.constant 0.0781311392 : f32
    %223 = vector.broadcast %cst_67 : f32 to vector<14x14xf32>
    %224 = arith.mulf %223, %74 : vector<14x14xf32>
    %225 = arith.addf %222, %224 : vector<14x14xf32>
    %cst_68 = arith.constant 0.026445562 : f32
    %226 = vector.broadcast %cst_68 : f32 to vector<14x14xf32>
    %227 = arith.mulf %226, %76 : vector<14x14xf32>
    %228 = arith.addf %225, %227 : vector<14x14xf32>
    %cst_69 = arith.constant -0.0313922837 : f32
    %229 = vector.broadcast %cst_69 : f32 to vector<14x14xf32>
    %230 = arith.mulf %229, %78 : vector<14x14xf32>
    %231 = arith.addf %228, %230 : vector<14x14xf32>
    %cst_70 = arith.constant 0.145802066 : f32
    %232 = vector.broadcast %cst_70 : f32 to vector<14x14xf32>
    %233 = arith.mulf %232, %80 : vector<14x14xf32>
    %234 = arith.addf %231, %233 : vector<14x14xf32>
    %cst_71 = arith.constant 0.196025833 : f32
    %235 = vector.broadcast %cst_71 : f32 to vector<14x14xf32>
    %236 = arith.mulf %235, %82 : vector<14x14xf32>
    %237 = arith.addf %234, %236 : vector<14x14xf32>
    %cst_72 = arith.constant 0.180163488 : f32
    %238 = vector.broadcast %cst_72 : f32 to vector<14x14xf32>
    %239 = arith.mulf %238, %84 : vector<14x14xf32>
    %240 = arith.addf %237, %239 : vector<14x14xf32>
    %cst_73 = arith.constant 0.131510377 : f32
    %241 = vector.broadcast %cst_73 : f32 to vector<14x14xf32>
    %242 = arith.mulf %241, %86 : vector<14x14xf32>
    %243 = arith.addf %240, %242 : vector<14x14xf32>
    %cst_74 = arith.constant 0.0357380435 : f32
    %244 = vector.broadcast %cst_74 : f32 to vector<14x14xf32>
    %245 = arith.mulf %244, %88 : vector<14x14xf32>
    %246 = arith.addf %243, %245 : vector<14x14xf32>
    %cst_75 = arith.constant -0.120831862 : f32
    %247 = vector.broadcast %cst_75 : f32 to vector<14x14xf32>
    %248 = arith.mulf %247, %90 : vector<14x14xf32>
    %249 = arith.addf %246, %248 : vector<14x14xf32>
    %cst_76 = arith.constant -4.45413316E-4 : f32
    %250 = vector.broadcast %cst_76 : f32 to vector<14x14xf32>
    %251 = arith.mulf %250, %92 : vector<14x14xf32>
    %252 = arith.addf %249, %251 : vector<14x14xf32>
    %cst_77 = arith.constant 6.564750e-02 : f32
    %253 = vector.broadcast %cst_77 : f32 to vector<14x14xf32>
    %254 = arith.mulf %253, %94 : vector<14x14xf32>
    %255 = arith.addf %252, %254 : vector<14x14xf32>
    %256 = math.absf %255 : vector<14x14xf32>
    %257 = arith.addf %175, %256 : vector<14x14xf32>
    %cst_78 = arith.constant -0.12883614 : f32
    %258 = vector.broadcast %cst_78 : f32 to vector<14x14xf32>
    %259 = arith.mulf %258, %42 : vector<14x14xf32>
    %cst_79 = arith.constant 0.0395122059 : f32
    %260 = vector.broadcast %cst_79 : f32 to vector<14x14xf32>
    %261 = arith.mulf %260, %44 : vector<14x14xf32>
    %262 = arith.addf %259, %261 : vector<14x14xf32>
    %cst_80 = arith.constant 0.0429863706 : f32
    %263 = vector.broadcast %cst_80 : f32 to vector<14x14xf32>
    %264 = arith.mulf %263, %46 : vector<14x14xf32>
    %265 = arith.addf %262, %264 : vector<14x14xf32>
    %cst_81 = arith.constant 0.0696042702 : f32
    %266 = vector.broadcast %cst_81 : f32 to vector<14x14xf32>
    %267 = arith.mulf %266, %48 : vector<14x14xf32>
    %268 = arith.addf %265, %267 : vector<14x14xf32>
    %cst_82 = arith.constant -0.118411794 : f32
    %269 = vector.broadcast %cst_82 : f32 to vector<14x14xf32>
    %270 = arith.mulf %269, %50 : vector<14x14xf32>
    %271 = arith.addf %268, %270 : vector<14x14xf32>
    %cst_83 = arith.constant -0.0661702603 : f32
    %272 = vector.broadcast %cst_83 : f32 to vector<14x14xf32>
    %273 = arith.mulf %272, %52 : vector<14x14xf32>
    %274 = arith.addf %271, %273 : vector<14x14xf32>
    %cst_84 = arith.constant -0.0436435267 : f32
    %275 = vector.broadcast %cst_84 : f32 to vector<14x14xf32>
    %276 = arith.mulf %275, %54 : vector<14x14xf32>
    %277 = arith.addf %274, %276 : vector<14x14xf32>
    %cst_85 = arith.constant -0.116980195 : f32
    %278 = vector.broadcast %cst_85 : f32 to vector<14x14xf32>
    %279 = arith.mulf %278, %56 : vector<14x14xf32>
    %280 = arith.addf %277, %279 : vector<14x14xf32>
    %cst_86 = arith.constant 0.173936784 : f32
    %281 = vector.broadcast %cst_86 : f32 to vector<14x14xf32>
    %282 = arith.mulf %281, %58 : vector<14x14xf32>
    %283 = arith.addf %280, %282 : vector<14x14xf32>
    %cst_87 = arith.constant -0.0495910756 : f32
    %284 = vector.broadcast %cst_87 : f32 to vector<14x14xf32>
    %285 = arith.mulf %284, %60 : vector<14x14xf32>
    %286 = arith.addf %283, %285 : vector<14x14xf32>
    %cst_88 = arith.constant 0.032896962 : f32
    %287 = vector.broadcast %cst_88 : f32 to vector<14x14xf32>
    %288 = arith.mulf %287, %62 : vector<14x14xf32>
    %289 = arith.addf %286, %288 : vector<14x14xf32>
    %cst_89 = arith.constant -0.0258572549 : f32
    %290 = vector.broadcast %cst_89 : f32 to vector<14x14xf32>
    %291 = arith.mulf %290, %64 : vector<14x14xf32>
    %292 = arith.addf %289, %291 : vector<14x14xf32>
    %cst_90 = arith.constant 0.158347294 : f32
    %293 = vector.broadcast %cst_90 : f32 to vector<14x14xf32>
    %294 = arith.mulf %293, %66 : vector<14x14xf32>
    %295 = arith.addf %292, %294 : vector<14x14xf32>
    %cst_91 = arith.constant 0.132036105 : f32
    %296 = vector.broadcast %cst_91 : f32 to vector<14x14xf32>
    %297 = arith.mulf %296, %68 : vector<14x14xf32>
    %298 = arith.addf %295, %297 : vector<14x14xf32>
    %cst_92 = arith.constant 0.0633352622 : f32
    %299 = vector.broadcast %cst_92 : f32 to vector<14x14xf32>
    %300 = arith.mulf %299, %70 : vector<14x14xf32>
    %301 = arith.addf %298, %300 : vector<14x14xf32>
    %cst_93 = arith.constant -0.220350981 : f32
    %302 = vector.broadcast %cst_93 : f32 to vector<14x14xf32>
    %303 = arith.mulf %302, %72 : vector<14x14xf32>
    %304 = arith.addf %301, %303 : vector<14x14xf32>
    %cst_94 = arith.constant 0.00520289736 : f32
    %305 = vector.broadcast %cst_94 : f32 to vector<14x14xf32>
    %306 = arith.mulf %305, %74 : vector<14x14xf32>
    %307 = arith.addf %304, %306 : vector<14x14xf32>
    %cst_95 = arith.constant 0.0683686212 : f32
    %308 = vector.broadcast %cst_95 : f32 to vector<14x14xf32>
    %309 = arith.mulf %308, %76 : vector<14x14xf32>
    %310 = arith.addf %307, %309 : vector<14x14xf32>
    %cst_96 = arith.constant 0.100396156 : f32
    %311 = vector.broadcast %cst_96 : f32 to vector<14x14xf32>
    %312 = arith.mulf %311, %78 : vector<14x14xf32>
    %313 = arith.addf %310, %312 : vector<14x14xf32>
    %cst_97 = arith.constant -0.0617907047 : f32
    %314 = vector.broadcast %cst_97 : f32 to vector<14x14xf32>
    %315 = arith.mulf %314, %80 : vector<14x14xf32>
    %316 = arith.addf %313, %315 : vector<14x14xf32>
    %cst_98 = arith.constant 0.182201132 : f32
    %317 = vector.broadcast %cst_98 : f32 to vector<14x14xf32>
    %318 = arith.mulf %317, %82 : vector<14x14xf32>
    %319 = arith.addf %316, %318 : vector<14x14xf32>
    %cst_99 = arith.constant -0.132043108 : f32
    %320 = vector.broadcast %cst_99 : f32 to vector<14x14xf32>
    %321 = arith.mulf %320, %84 : vector<14x14xf32>
    %322 = arith.addf %319, %321 : vector<14x14xf32>
    %cst_100 = arith.constant -6.615280e-02 : f32
    %323 = vector.broadcast %cst_100 : f32 to vector<14x14xf32>
    %324 = arith.mulf %323, %86 : vector<14x14xf32>
    %325 = arith.addf %322, %324 : vector<14x14xf32>
    %cst_101 = arith.constant 9.350500e-02 : f32
    %326 = vector.broadcast %cst_101 : f32 to vector<14x14xf32>
    %327 = arith.mulf %326, %88 : vector<14x14xf32>
    %328 = arith.addf %325, %327 : vector<14x14xf32>
    %cst_102 = arith.constant 0.0049054618 : f32
    %329 = vector.broadcast %cst_102 : f32 to vector<14x14xf32>
    %330 = arith.mulf %329, %90 : vector<14x14xf32>
    %331 = arith.addf %328, %330 : vector<14x14xf32>
    %cst_103 = arith.constant 0.200239256 : f32
    %332 = vector.broadcast %cst_103 : f32 to vector<14x14xf32>
    %333 = arith.mulf %332, %92 : vector<14x14xf32>
    %334 = arith.addf %331, %333 : vector<14x14xf32>
    %cst_104 = arith.constant 0.0188519191 : f32
    %335 = vector.broadcast %cst_104 : f32 to vector<14x14xf32>
    %336 = arith.mulf %335, %94 : vector<14x14xf32>
    %337 = arith.addf %334, %336 : vector<14x14xf32>
    %338 = math.absf %337 : vector<14x14xf32>
    %339 = arith.addf %257, %338 : vector<14x14xf32>
    %cst_105 = arith.constant -0.0633194074 : f32
    %340 = vector.broadcast %cst_105 : f32 to vector<14x14xf32>
    %341 = arith.mulf %340, %42 : vector<14x14xf32>
    %cst_106 = arith.constant -0.0377563499 : f32
    %342 = vector.broadcast %cst_106 : f32 to vector<14x14xf32>
    %343 = arith.mulf %342, %44 : vector<14x14xf32>
    %344 = arith.addf %341, %343 : vector<14x14xf32>
    %cst_107 = arith.constant -0.10911461 : f32
    %345 = vector.broadcast %cst_107 : f32 to vector<14x14xf32>
    %346 = arith.mulf %345, %46 : vector<14x14xf32>
    %347 = arith.addf %344, %346 : vector<14x14xf32>
    %cst_108 = arith.constant -0.127768025 : f32
    %348 = vector.broadcast %cst_108 : f32 to vector<14x14xf32>
    %349 = arith.mulf %348, %48 : vector<14x14xf32>
    %350 = arith.addf %347, %349 : vector<14x14xf32>
    %cst_109 = arith.constant 0.0630411506 : f32
    %351 = vector.broadcast %cst_109 : f32 to vector<14x14xf32>
    %352 = arith.mulf %351, %50 : vector<14x14xf32>
    %353 = arith.addf %350, %352 : vector<14x14xf32>
    %cst_110 = arith.constant 0.0581165813 : f32
    %354 = vector.broadcast %cst_110 : f32 to vector<14x14xf32>
    %355 = arith.mulf %354, %52 : vector<14x14xf32>
    %356 = arith.addf %353, %355 : vector<14x14xf32>
    %cst_111 = arith.constant 0.129455879 : f32
    %357 = vector.broadcast %cst_111 : f32 to vector<14x14xf32>
    %358 = arith.mulf %357, %54 : vector<14x14xf32>
    %359 = arith.addf %356, %358 : vector<14x14xf32>
    %cst_112 = arith.constant -0.0754605755 : f32
    %360 = vector.broadcast %cst_112 : f32 to vector<14x14xf32>
    %361 = arith.mulf %360, %56 : vector<14x14xf32>
    %362 = arith.addf %359, %361 : vector<14x14xf32>
    %cst_113 = arith.constant 0.168910742 : f32
    %363 = vector.broadcast %cst_113 : f32 to vector<14x14xf32>
    %364 = arith.mulf %363, %58 : vector<14x14xf32>
    %365 = arith.addf %362, %364 : vector<14x14xf32>
    %cst_114 = arith.constant -0.0287387706 : f32
    %366 = vector.broadcast %cst_114 : f32 to vector<14x14xf32>
    %367 = arith.mulf %366, %60 : vector<14x14xf32>
    %368 = arith.addf %365, %367 : vector<14x14xf32>
    %cst_115 = arith.constant 0.157440826 : f32
    %369 = vector.broadcast %cst_115 : f32 to vector<14x14xf32>
    %370 = arith.mulf %369, %62 : vector<14x14xf32>
    %371 = arith.addf %368, %370 : vector<14x14xf32>
    %cst_116 = arith.constant -0.0432785861 : f32
    %372 = vector.broadcast %cst_116 : f32 to vector<14x14xf32>
    %373 = arith.mulf %372, %64 : vector<14x14xf32>
    %374 = arith.addf %371, %373 : vector<14x14xf32>
    %cst_117 = arith.constant -0.0735483319 : f32
    %375 = vector.broadcast %cst_117 : f32 to vector<14x14xf32>
    %376 = arith.mulf %375, %66 : vector<14x14xf32>
    %377 = arith.addf %374, %376 : vector<14x14xf32>
    %cst_118 = arith.constant 0.024978539 : f32
    %378 = vector.broadcast %cst_118 : f32 to vector<14x14xf32>
    %379 = arith.mulf %378, %68 : vector<14x14xf32>
    %380 = arith.addf %377, %379 : vector<14x14xf32>
    %cst_119 = arith.constant 0.103145316 : f32
    %381 = vector.broadcast %cst_119 : f32 to vector<14x14xf32>
    %382 = arith.mulf %381, %70 : vector<14x14xf32>
    %383 = arith.addf %380, %382 : vector<14x14xf32>
    %cst_120 = arith.constant 0.016100958 : f32
    %384 = vector.broadcast %cst_120 : f32 to vector<14x14xf32>
    %385 = arith.mulf %384, %72 : vector<14x14xf32>
    %386 = arith.addf %383, %385 : vector<14x14xf32>
    %cst_121 = arith.constant -0.0585528873 : f32
    %387 = vector.broadcast %cst_121 : f32 to vector<14x14xf32>
    %388 = arith.mulf %387, %74 : vector<14x14xf32>
    %389 = arith.addf %386, %388 : vector<14x14xf32>
    %cst_122 = arith.constant -0.134121969 : f32
    %390 = vector.broadcast %cst_122 : f32 to vector<14x14xf32>
    %391 = arith.mulf %390, %76 : vector<14x14xf32>
    %392 = arith.addf %389, %391 : vector<14x14xf32>
    %cst_123 = arith.constant -0.140152022 : f32
    %393 = vector.broadcast %cst_123 : f32 to vector<14x14xf32>
    %394 = arith.mulf %393, %78 : vector<14x14xf32>
    %395 = arith.addf %392, %394 : vector<14x14xf32>
    %cst_124 = arith.constant 0.0502682887 : f32
    %396 = vector.broadcast %cst_124 : f32 to vector<14x14xf32>
    %397 = arith.mulf %396, %80 : vector<14x14xf32>
    %398 = arith.addf %395, %397 : vector<14x14xf32>
    %cst_125 = arith.constant 0.0989712998 : f32
    %399 = vector.broadcast %cst_125 : f32 to vector<14x14xf32>
    %400 = arith.mulf %399, %82 : vector<14x14xf32>
    %401 = arith.addf %398, %400 : vector<14x14xf32>
    %cst_126 = arith.constant -0.0164294597 : f32
    %402 = vector.broadcast %cst_126 : f32 to vector<14x14xf32>
    %403 = arith.mulf %402, %84 : vector<14x14xf32>
    %404 = arith.addf %401, %403 : vector<14x14xf32>
    %cst_127 = arith.constant -0.107436493 : f32
    %405 = vector.broadcast %cst_127 : f32 to vector<14x14xf32>
    %406 = arith.mulf %405, %86 : vector<14x14xf32>
    %407 = arith.addf %404, %406 : vector<14x14xf32>
    %cst_128 = arith.constant 0.0873042196 : f32
    %408 = vector.broadcast %cst_128 : f32 to vector<14x14xf32>
    %409 = arith.mulf %408, %88 : vector<14x14xf32>
    %410 = arith.addf %407, %409 : vector<14x14xf32>
    %cst_129 = arith.constant -0.128039405 : f32
    %411 = vector.broadcast %cst_129 : f32 to vector<14x14xf32>
    %412 = arith.mulf %411, %90 : vector<14x14xf32>
    %413 = arith.addf %410, %412 : vector<14x14xf32>
    %cst_130 = arith.constant -0.0713068098 : f32
    %414 = vector.broadcast %cst_130 : f32 to vector<14x14xf32>
    %415 = arith.mulf %414, %92 : vector<14x14xf32>
    %416 = arith.addf %413, %415 : vector<14x14xf32>
    %cst_131 = arith.constant 0.0621017888 : f32
    %417 = vector.broadcast %cst_131 : f32 to vector<14x14xf32>
    %418 = arith.mulf %417, %94 : vector<14x14xf32>
    %419 = arith.addf %416, %418 : vector<14x14xf32>
    %420 = math.absf %419 : vector<14x14xf32>
    %421 = arith.addf %339, %420 : vector<14x14xf32>
    %cst_132 = arith.constant -0.22501412 : f32
    %422 = vector.broadcast %cst_132 : f32 to vector<14x14xf32>
    %423 = arith.mulf %422, %42 : vector<14x14xf32>
    %cst_133 = arith.constant 0.0386369601 : f32
    %424 = vector.broadcast %cst_133 : f32 to vector<14x14xf32>
    %425 = arith.mulf %424, %44 : vector<14x14xf32>
    %426 = arith.addf %423, %425 : vector<14x14xf32>
    %cst_134 = arith.constant -0.0581640862 : f32
    %427 = vector.broadcast %cst_134 : f32 to vector<14x14xf32>
    %428 = arith.mulf %427, %46 : vector<14x14xf32>
    %429 = arith.addf %426, %428 : vector<14x14xf32>
    %cst_135 = arith.constant 0.0109279705 : f32
    %430 = vector.broadcast %cst_135 : f32 to vector<14x14xf32>
    %431 = arith.mulf %430, %48 : vector<14x14xf32>
    %432 = arith.addf %429, %431 : vector<14x14xf32>
    %cst_136 = arith.constant -0.00757015264 : f32
    %433 = vector.broadcast %cst_136 : f32 to vector<14x14xf32>
    %434 = arith.mulf %433, %50 : vector<14x14xf32>
    %435 = arith.addf %432, %434 : vector<14x14xf32>
    %cst_137 = arith.constant 0.0202114396 : f32
    %436 = vector.broadcast %cst_137 : f32 to vector<14x14xf32>
    %437 = arith.mulf %436, %52 : vector<14x14xf32>
    %438 = arith.addf %435, %437 : vector<14x14xf32>
    %cst_138 = arith.constant 6.941720e-02 : f32
    %439 = vector.broadcast %cst_138 : f32 to vector<14x14xf32>
    %440 = arith.mulf %439, %54 : vector<14x14xf32>
    %441 = arith.addf %438, %440 : vector<14x14xf32>
    %cst_139 = arith.constant -0.0758369789 : f32
    %442 = vector.broadcast %cst_139 : f32 to vector<14x14xf32>
    %443 = arith.mulf %442, %56 : vector<14x14xf32>
    %444 = arith.addf %441, %443 : vector<14x14xf32>
    %cst_140 = arith.constant 0.142098203 : f32
    %445 = vector.broadcast %cst_140 : f32 to vector<14x14xf32>
    %446 = arith.mulf %445, %58 : vector<14x14xf32>
    %447 = arith.addf %444, %446 : vector<14x14xf32>
    %cst_141 = arith.constant 0.0726093799 : f32
    %448 = vector.broadcast %cst_141 : f32 to vector<14x14xf32>
    %449 = arith.mulf %448, %60 : vector<14x14xf32>
    %450 = arith.addf %447, %449 : vector<14x14xf32>
    %cst_142 = arith.constant 0.0843732655 : f32
    %451 = vector.broadcast %cst_142 : f32 to vector<14x14xf32>
    %452 = arith.mulf %451, %62 : vector<14x14xf32>
    %453 = arith.addf %450, %452 : vector<14x14xf32>
    %cst_143 = arith.constant 0.116486393 : f32
    %454 = vector.broadcast %cst_143 : f32 to vector<14x14xf32>
    %455 = arith.mulf %454, %64 : vector<14x14xf32>
    %456 = arith.addf %453, %455 : vector<14x14xf32>
    %cst_144 = arith.constant 0.0787588283 : f32
    %457 = vector.broadcast %cst_144 : f32 to vector<14x14xf32>
    %458 = arith.mulf %457, %66 : vector<14x14xf32>
    %459 = arith.addf %456, %458 : vector<14x14xf32>
    %cst_145 = arith.constant 0.084407866 : f32
    %460 = vector.broadcast %cst_145 : f32 to vector<14x14xf32>
    %461 = arith.mulf %460, %68 : vector<14x14xf32>
    %462 = arith.addf %459, %461 : vector<14x14xf32>
    %cst_146 = arith.constant 0.0075593614 : f32
    %463 = vector.broadcast %cst_146 : f32 to vector<14x14xf32>
    %464 = arith.mulf %463, %70 : vector<14x14xf32>
    %465 = arith.addf %462, %464 : vector<14x14xf32>
    %cst_147 = arith.constant -0.142677397 : f32
    %466 = vector.broadcast %cst_147 : f32 to vector<14x14xf32>
    %467 = arith.mulf %466, %72 : vector<14x14xf32>
    %468 = arith.addf %465, %467 : vector<14x14xf32>
    %cst_148 = arith.constant -0.0135045098 : f32
    %469 = vector.broadcast %cst_148 : f32 to vector<14x14xf32>
    %470 = arith.mulf %469, %74 : vector<14x14xf32>
    %471 = arith.addf %468, %470 : vector<14x14xf32>
    %cst_149 = arith.constant -0.0769514665 : f32
    %472 = vector.broadcast %cst_149 : f32 to vector<14x14xf32>
    %473 = arith.mulf %472, %76 : vector<14x14xf32>
    %474 = arith.addf %471, %473 : vector<14x14xf32>
    %cst_150 = arith.constant -0.142274186 : f32
    %475 = vector.broadcast %cst_150 : f32 to vector<14x14xf32>
    %476 = arith.mulf %475, %78 : vector<14x14xf32>
    %477 = arith.addf %474, %476 : vector<14x14xf32>
    %cst_151 = arith.constant 0.0258452799 : f32
    %478 = vector.broadcast %cst_151 : f32 to vector<14x14xf32>
    %479 = arith.mulf %478, %80 : vector<14x14xf32>
    %480 = arith.addf %477, %479 : vector<14x14xf32>
    %cst_152 = arith.constant -0.0568549447 : f32
    %481 = vector.broadcast %cst_152 : f32 to vector<14x14xf32>
    %482 = arith.mulf %481, %82 : vector<14x14xf32>
    %483 = arith.addf %480, %482 : vector<14x14xf32>
    %cst_153 = arith.constant -0.10298045 : f32
    %484 = vector.broadcast %cst_153 : f32 to vector<14x14xf32>
    %485 = arith.mulf %484, %84 : vector<14x14xf32>
    %486 = arith.addf %483, %485 : vector<14x14xf32>
    %cst_154 = arith.constant -0.104300104 : f32
    %487 = vector.broadcast %cst_154 : f32 to vector<14x14xf32>
    %488 = arith.mulf %487, %86 : vector<14x14xf32>
    %489 = arith.addf %486, %488 : vector<14x14xf32>
    %cst_155 = arith.constant 0.0268417094 : f32
    %490 = vector.broadcast %cst_155 : f32 to vector<14x14xf32>
    %491 = arith.mulf %490, %88 : vector<14x14xf32>
    %492 = arith.addf %489, %491 : vector<14x14xf32>
    %cst_156 = arith.constant 0.0358671956 : f32
    %493 = vector.broadcast %cst_156 : f32 to vector<14x14xf32>
    %494 = arith.mulf %493, %90 : vector<14x14xf32>
    %495 = arith.addf %492, %494 : vector<14x14xf32>
    %cst_157 = arith.constant 0.132245749 : f32
    %496 = vector.broadcast %cst_157 : f32 to vector<14x14xf32>
    %497 = arith.mulf %496, %92 : vector<14x14xf32>
    %498 = arith.addf %495, %497 : vector<14x14xf32>
    %cst_158 = arith.constant -0.00139146694 : f32
    %499 = vector.broadcast %cst_158 : f32 to vector<14x14xf32>
    %500 = arith.mulf %499, %94 : vector<14x14xf32>
    %501 = arith.addf %498, %500 : vector<14x14xf32>
    %502 = math.absf %501 : vector<14x14xf32>
    %503 = arith.addf %421, %502 : vector<14x14xf32>
    %cst_159 = arith.constant 0.104183972 : f32
    %504 = vector.broadcast %cst_159 : f32 to vector<14x14xf32>
    %505 = arith.mulf %504, %42 : vector<14x14xf32>
    %cst_160 = arith.constant 0.140226483 : f32
    %506 = vector.broadcast %cst_160 : f32 to vector<14x14xf32>
    %507 = arith.mulf %506, %44 : vector<14x14xf32>
    %508 = arith.addf %505, %507 : vector<14x14xf32>
    %cst_161 = arith.constant 0.115016572 : f32
    %509 = vector.broadcast %cst_161 : f32 to vector<14x14xf32>
    %510 = arith.mulf %509, %46 : vector<14x14xf32>
    %511 = arith.addf %508, %510 : vector<14x14xf32>
    %cst_162 = arith.constant -0.236530408 : f32
    %512 = vector.broadcast %cst_162 : f32 to vector<14x14xf32>
    %513 = arith.mulf %512, %48 : vector<14x14xf32>
    %514 = arith.addf %511, %513 : vector<14x14xf32>
    %cst_163 = arith.constant 0.122868374 : f32
    %515 = vector.broadcast %cst_163 : f32 to vector<14x14xf32>
    %516 = arith.mulf %515, %50 : vector<14x14xf32>
    %517 = arith.addf %514, %516 : vector<14x14xf32>
    %cst_164 = arith.constant 3.396200e-02 : f32
    %518 = vector.broadcast %cst_164 : f32 to vector<14x14xf32>
    %519 = arith.mulf %518, %52 : vector<14x14xf32>
    %520 = arith.addf %517, %519 : vector<14x14xf32>
    %cst_165 = arith.constant 0.0423771366 : f32
    %521 = vector.broadcast %cst_165 : f32 to vector<14x14xf32>
    %522 = arith.mulf %521, %54 : vector<14x14xf32>
    %523 = arith.addf %520, %522 : vector<14x14xf32>
    %cst_166 = arith.constant 0.0371227413 : f32
    %524 = vector.broadcast %cst_166 : f32 to vector<14x14xf32>
    %525 = arith.mulf %524, %56 : vector<14x14xf32>
    %526 = arith.addf %523, %525 : vector<14x14xf32>
    %cst_167 = arith.constant 0.038275715 : f32
    %527 = vector.broadcast %cst_167 : f32 to vector<14x14xf32>
    %528 = arith.mulf %527, %58 : vector<14x14xf32>
    %529 = arith.addf %526, %528 : vector<14x14xf32>
    %cst_168 = arith.constant 0.0319414251 : f32
    %530 = vector.broadcast %cst_168 : f32 to vector<14x14xf32>
    %531 = arith.mulf %530, %60 : vector<14x14xf32>
    %532 = arith.addf %529, %531 : vector<14x14xf32>
    %cst_169 = arith.constant -0.0358913317 : f32
    %533 = vector.broadcast %cst_169 : f32 to vector<14x14xf32>
    %534 = arith.mulf %533, %62 : vector<14x14xf32>
    %535 = arith.addf %532, %534 : vector<14x14xf32>
    %cst_170 = arith.constant -0.190163538 : f32
    %536 = vector.broadcast %cst_170 : f32 to vector<14x14xf32>
    %537 = arith.mulf %536, %64 : vector<14x14xf32>
    %538 = arith.addf %535, %537 : vector<14x14xf32>
    %cst_171 = arith.constant -0.0108914729 : f32
    %539 = vector.broadcast %cst_171 : f32 to vector<14x14xf32>
    %540 = arith.mulf %539, %66 : vector<14x14xf32>
    %541 = arith.addf %538, %540 : vector<14x14xf32>
    %cst_172 = arith.constant -0.0803731903 : f32
    %542 = vector.broadcast %cst_172 : f32 to vector<14x14xf32>
    %543 = arith.mulf %542, %68 : vector<14x14xf32>
    %544 = arith.addf %541, %543 : vector<14x14xf32>
    %cst_173 = arith.constant 0.108016334 : f32
    %545 = vector.broadcast %cst_173 : f32 to vector<14x14xf32>
    %546 = arith.mulf %545, %70 : vector<14x14xf32>
    %547 = arith.addf %544, %546 : vector<14x14xf32>
    %cst_174 = arith.constant -0.0288766511 : f32
    %548 = vector.broadcast %cst_174 : f32 to vector<14x14xf32>
    %549 = arith.mulf %548, %72 : vector<14x14xf32>
    %550 = arith.addf %547, %549 : vector<14x14xf32>
    %cst_175 = arith.constant 0.00834753644 : f32
    %551 = vector.broadcast %cst_175 : f32 to vector<14x14xf32>
    %552 = arith.mulf %551, %74 : vector<14x14xf32>
    %553 = arith.addf %550, %552 : vector<14x14xf32>
    %cst_176 = arith.constant -8.496060e-02 : f32
    %554 = vector.broadcast %cst_176 : f32 to vector<14x14xf32>
    %555 = arith.mulf %554, %76 : vector<14x14xf32>
    %556 = arith.addf %553, %555 : vector<14x14xf32>
    %cst_177 = arith.constant -0.0510622449 : f32
    %557 = vector.broadcast %cst_177 : f32 to vector<14x14xf32>
    %558 = arith.mulf %557, %78 : vector<14x14xf32>
    %559 = arith.addf %556, %558 : vector<14x14xf32>
    %cst_178 = arith.constant -0.00115330622 : f32
    %560 = vector.broadcast %cst_178 : f32 to vector<14x14xf32>
    %561 = arith.mulf %560, %80 : vector<14x14xf32>
    %562 = arith.addf %559, %561 : vector<14x14xf32>
    %cst_179 = arith.constant -0.148537517 : f32
    %563 = vector.broadcast %cst_179 : f32 to vector<14x14xf32>
    %564 = arith.mulf %563, %82 : vector<14x14xf32>
    %565 = arith.addf %562, %564 : vector<14x14xf32>
    %cst_180 = arith.constant 0.0300685111 : f32
    %566 = vector.broadcast %cst_180 : f32 to vector<14x14xf32>
    %567 = arith.mulf %566, %84 : vector<14x14xf32>
    %568 = arith.addf %565, %567 : vector<14x14xf32>
    %cst_181 = arith.constant -0.0106072258 : f32
    %569 = vector.broadcast %cst_181 : f32 to vector<14x14xf32>
    %570 = arith.mulf %569, %86 : vector<14x14xf32>
    %571 = arith.addf %568, %570 : vector<14x14xf32>
    %cst_182 = arith.constant -0.118571989 : f32
    %572 = vector.broadcast %cst_182 : f32 to vector<14x14xf32>
    %573 = arith.mulf %572, %88 : vector<14x14xf32>
    %574 = arith.addf %571, %573 : vector<14x14xf32>
    %cst_183 = arith.constant -0.239823297 : f32
    %575 = vector.broadcast %cst_183 : f32 to vector<14x14xf32>
    %576 = arith.mulf %575, %90 : vector<14x14xf32>
    %577 = arith.addf %574, %576 : vector<14x14xf32>
    %cst_184 = arith.constant 0.0513052121 : f32
    %578 = vector.broadcast %cst_184 : f32 to vector<14x14xf32>
    %579 = arith.mulf %578, %92 : vector<14x14xf32>
    %580 = arith.addf %577, %579 : vector<14x14xf32>
    %cst_185 = arith.constant -0.0297584031 : f32
    %581 = vector.broadcast %cst_185 : f32 to vector<14x14xf32>
    %582 = arith.mulf %581, %94 : vector<14x14xf32>
    %583 = arith.addf %580, %582 : vector<14x14xf32>
    %584 = math.absf %583 : vector<14x14xf32>
    %585 = arith.addf %503, %584 : vector<14x14xf32>
    %cst_186 = arith.constant -0.053000845 : f32
    %586 = vector.broadcast %cst_186 : f32 to vector<14x14xf32>
    %587 = arith.mulf %586, %42 : vector<14x14xf32>
    %cst_187 = arith.constant -0.0236154627 : f32
    %588 = vector.broadcast %cst_187 : f32 to vector<14x14xf32>
    %589 = arith.mulf %588, %44 : vector<14x14xf32>
    %590 = arith.addf %587, %589 : vector<14x14xf32>
    %cst_188 = arith.constant 0.181647599 : f32
    %591 = vector.broadcast %cst_188 : f32 to vector<14x14xf32>
    %592 = arith.mulf %591, %46 : vector<14x14xf32>
    %593 = arith.addf %590, %592 : vector<14x14xf32>
    %cst_189 = arith.constant -0.00498009706 : f32
    %594 = vector.broadcast %cst_189 : f32 to vector<14x14xf32>
    %595 = arith.mulf %594, %48 : vector<14x14xf32>
    %596 = arith.addf %593, %595 : vector<14x14xf32>
    %cst_190 = arith.constant 0.00866192672 : f32
    %597 = vector.broadcast %cst_190 : f32 to vector<14x14xf32>
    %598 = arith.mulf %597, %50 : vector<14x14xf32>
    %599 = arith.addf %596, %598 : vector<14x14xf32>
    %cst_191 = arith.constant -0.148707286 : f32
    %600 = vector.broadcast %cst_191 : f32 to vector<14x14xf32>
    %601 = arith.mulf %600, %52 : vector<14x14xf32>
    %602 = arith.addf %599, %601 : vector<14x14xf32>
    %cst_192 = arith.constant 0.164733917 : f32
    %603 = vector.broadcast %cst_192 : f32 to vector<14x14xf32>
    %604 = arith.mulf %603, %54 : vector<14x14xf32>
    %605 = arith.addf %602, %604 : vector<14x14xf32>
    %cst_193 = arith.constant 0.0917487964 : f32
    %606 = vector.broadcast %cst_193 : f32 to vector<14x14xf32>
    %607 = arith.mulf %606, %56 : vector<14x14xf32>
    %608 = arith.addf %605, %607 : vector<14x14xf32>
    %cst_194 = arith.constant 0.106693484 : f32
    %609 = vector.broadcast %cst_194 : f32 to vector<14x14xf32>
    %610 = arith.mulf %609, %58 : vector<14x14xf32>
    %611 = arith.addf %608, %610 : vector<14x14xf32>
    %cst_195 = arith.constant 0.00476727309 : f32
    %612 = vector.broadcast %cst_195 : f32 to vector<14x14xf32>
    %613 = arith.mulf %612, %60 : vector<14x14xf32>
    %614 = arith.addf %611, %613 : vector<14x14xf32>
    %cst_196 = arith.constant 0.0916654765 : f32
    %615 = vector.broadcast %cst_196 : f32 to vector<14x14xf32>
    %616 = arith.mulf %615, %62 : vector<14x14xf32>
    %617 = arith.addf %614, %616 : vector<14x14xf32>
    %cst_197 = arith.constant 0.0370946825 : f32
    %618 = vector.broadcast %cst_197 : f32 to vector<14x14xf32>
    %619 = arith.mulf %618, %64 : vector<14x14xf32>
    %620 = arith.addf %617, %619 : vector<14x14xf32>
    %cst_198 = arith.constant 0.0613189116 : f32
    %621 = vector.broadcast %cst_198 : f32 to vector<14x14xf32>
    %622 = arith.mulf %621, %66 : vector<14x14xf32>
    %623 = arith.addf %620, %622 : vector<14x14xf32>
    %cst_199 = arith.constant -0.0152192963 : f32
    %624 = vector.broadcast %cst_199 : f32 to vector<14x14xf32>
    %625 = arith.mulf %624, %68 : vector<14x14xf32>
    %626 = arith.addf %623, %625 : vector<14x14xf32>
    %cst_200 = arith.constant -0.147388801 : f32
    %627 = vector.broadcast %cst_200 : f32 to vector<14x14xf32>
    %628 = arith.mulf %627, %70 : vector<14x14xf32>
    %629 = arith.addf %626, %628 : vector<14x14xf32>
    %cst_201 = arith.constant 0.10288544 : f32
    %630 = vector.broadcast %cst_201 : f32 to vector<14x14xf32>
    %631 = arith.mulf %630, %72 : vector<14x14xf32>
    %632 = arith.addf %629, %631 : vector<14x14xf32>
    %cst_202 = arith.constant -0.193495974 : f32
    %633 = vector.broadcast %cst_202 : f32 to vector<14x14xf32>
    %634 = arith.mulf %633, %74 : vector<14x14xf32>
    %635 = arith.addf %632, %634 : vector<14x14xf32>
    %cst_203 = arith.constant -0.0239936672 : f32
    %636 = vector.broadcast %cst_203 : f32 to vector<14x14xf32>
    %637 = arith.mulf %636, %76 : vector<14x14xf32>
    %638 = arith.addf %635, %637 : vector<14x14xf32>
    %cst_204 = arith.constant -0.0204522498 : f32
    %639 = vector.broadcast %cst_204 : f32 to vector<14x14xf32>
    %640 = arith.mulf %639, %78 : vector<14x14xf32>
    %641 = arith.addf %638, %640 : vector<14x14xf32>
    %cst_205 = arith.constant -0.104286015 : f32
    %642 = vector.broadcast %cst_205 : f32 to vector<14x14xf32>
    %643 = arith.mulf %642, %80 : vector<14x14xf32>
    %644 = arith.addf %641, %643 : vector<14x14xf32>
    %cst_206 = arith.constant 0.0613123141 : f32
    %645 = vector.broadcast %cst_206 : f32 to vector<14x14xf32>
    %646 = arith.mulf %645, %82 : vector<14x14xf32>
    %647 = arith.addf %644, %646 : vector<14x14xf32>
    %cst_207 = arith.constant -0.0200329702 : f32
    %648 = vector.broadcast %cst_207 : f32 to vector<14x14xf32>
    %649 = arith.mulf %648, %84 : vector<14x14xf32>
    %650 = arith.addf %647, %649 : vector<14x14xf32>
    %cst_208 = arith.constant -0.0436868332 : f32
    %651 = vector.broadcast %cst_208 : f32 to vector<14x14xf32>
    %652 = arith.mulf %651, %86 : vector<14x14xf32>
    %653 = arith.addf %650, %652 : vector<14x14xf32>
    %cst_209 = arith.constant 0.0519841723 : f32
    %654 = vector.broadcast %cst_209 : f32 to vector<14x14xf32>
    %655 = arith.mulf %654, %88 : vector<14x14xf32>
    %656 = arith.addf %653, %655 : vector<14x14xf32>
    %cst_210 = arith.constant -0.0476579033 : f32
    %657 = vector.broadcast %cst_210 : f32 to vector<14x14xf32>
    %658 = arith.mulf %657, %90 : vector<14x14xf32>
    %659 = arith.addf %656, %658 : vector<14x14xf32>
    %cst_211 = arith.constant 1.388980e-01 : f32
    %660 = vector.broadcast %cst_211 : f32 to vector<14x14xf32>
    %661 = arith.mulf %660, %92 : vector<14x14xf32>
    %662 = arith.addf %659, %661 : vector<14x14xf32>
    %cst_212 = arith.constant 0.0351455063 : f32
    %663 = vector.broadcast %cst_212 : f32 to vector<14x14xf32>
    %664 = arith.mulf %663, %94 : vector<14x14xf32>
    %665 = arith.addf %662, %664 : vector<14x14xf32>
    %666 = math.absf %665 : vector<14x14xf32>
    %667 = arith.addf %585, %666 : vector<14x14xf32>
    %cst_213 = arith.constant -0.0474332981 : f32
    %668 = vector.broadcast %cst_213 : f32 to vector<14x14xf32>
    %669 = arith.mulf %668, %42 : vector<14x14xf32>
    %cst_214 = arith.constant -0.194426507 : f32
    %670 = vector.broadcast %cst_214 : f32 to vector<14x14xf32>
    %671 = arith.mulf %670, %44 : vector<14x14xf32>
    %672 = arith.addf %669, %671 : vector<14x14xf32>
    %cst_215 = arith.constant -0.130775318 : f32
    %673 = vector.broadcast %cst_215 : f32 to vector<14x14xf32>
    %674 = arith.mulf %673, %46 : vector<14x14xf32>
    %675 = arith.addf %672, %674 : vector<14x14xf32>
    %cst_216 = arith.constant 0.108683072 : f32
    %676 = vector.broadcast %cst_216 : f32 to vector<14x14xf32>
    %677 = arith.mulf %676, %48 : vector<14x14xf32>
    %678 = arith.addf %675, %677 : vector<14x14xf32>
    %cst_217 = arith.constant -0.0050604064 : f32
    %679 = vector.broadcast %cst_217 : f32 to vector<14x14xf32>
    %680 = arith.mulf %679, %50 : vector<14x14xf32>
    %681 = arith.addf %678, %680 : vector<14x14xf32>
    %cst_218 = arith.constant -0.028312508 : f32
    %682 = vector.broadcast %cst_218 : f32 to vector<14x14xf32>
    %683 = arith.mulf %682, %52 : vector<14x14xf32>
    %684 = arith.addf %681, %683 : vector<14x14xf32>
    %cst_219 = arith.constant 0.164325163 : f32
    %685 = vector.broadcast %cst_219 : f32 to vector<14x14xf32>
    %686 = arith.mulf %685, %54 : vector<14x14xf32>
    %687 = arith.addf %684, %686 : vector<14x14xf32>
    %cst_220 = arith.constant -0.128264934 : f32
    %688 = vector.broadcast %cst_220 : f32 to vector<14x14xf32>
    %689 = arith.mulf %688, %56 : vector<14x14xf32>
    %690 = arith.addf %687, %689 : vector<14x14xf32>
    %cst_221 = arith.constant -0.0585657768 : f32
    %691 = vector.broadcast %cst_221 : f32 to vector<14x14xf32>
    %692 = arith.mulf %691, %58 : vector<14x14xf32>
    %693 = arith.addf %690, %692 : vector<14x14xf32>
    %cst_222 = arith.constant -0.0472587682 : f32
    %694 = vector.broadcast %cst_222 : f32 to vector<14x14xf32>
    %695 = arith.mulf %694, %60 : vector<14x14xf32>
    %696 = arith.addf %693, %695 : vector<14x14xf32>
    %cst_223 = arith.constant 0.0586337261 : f32
    %697 = vector.broadcast %cst_223 : f32 to vector<14x14xf32>
    %698 = arith.mulf %697, %62 : vector<14x14xf32>
    %699 = arith.addf %696, %698 : vector<14x14xf32>
    %cst_224 = arith.constant -0.0663535222 : f32
    %700 = vector.broadcast %cst_224 : f32 to vector<14x14xf32>
    %701 = arith.mulf %700, %64 : vector<14x14xf32>
    %702 = arith.addf %699, %701 : vector<14x14xf32>
    %cst_225 = arith.constant -0.0613417886 : f32
    %703 = vector.broadcast %cst_225 : f32 to vector<14x14xf32>
    %704 = arith.mulf %703, %66 : vector<14x14xf32>
    %705 = arith.addf %702, %704 : vector<14x14xf32>
    %cst_226 = arith.constant -0.160514936 : f32
    %706 = vector.broadcast %cst_226 : f32 to vector<14x14xf32>
    %707 = arith.mulf %706, %68 : vector<14x14xf32>
    %708 = arith.addf %705, %707 : vector<14x14xf32>
    %cst_227 = arith.constant 0.0729349405 : f32
    %709 = vector.broadcast %cst_227 : f32 to vector<14x14xf32>
    %710 = arith.mulf %709, %70 : vector<14x14xf32>
    %711 = arith.addf %708, %710 : vector<14x14xf32>
    %cst_228 = arith.constant 0.0806139335 : f32
    %712 = vector.broadcast %cst_228 : f32 to vector<14x14xf32>
    %713 = arith.mulf %712, %72 : vector<14x14xf32>
    %714 = arith.addf %711, %713 : vector<14x14xf32>
    %cst_229 = arith.constant -0.047637675 : f32
    %715 = vector.broadcast %cst_229 : f32 to vector<14x14xf32>
    %716 = arith.mulf %715, %74 : vector<14x14xf32>
    %717 = arith.addf %714, %716 : vector<14x14xf32>
    %cst_230 = arith.constant 0.0163339954 : f32
    %718 = vector.broadcast %cst_230 : f32 to vector<14x14xf32>
    %719 = arith.mulf %718, %76 : vector<14x14xf32>
    %720 = arith.addf %717, %719 : vector<14x14xf32>
    %cst_231 = arith.constant -0.129264623 : f32
    %721 = vector.broadcast %cst_231 : f32 to vector<14x14xf32>
    %722 = arith.mulf %721, %78 : vector<14x14xf32>
    %723 = arith.addf %720, %722 : vector<14x14xf32>
    %cst_232 = arith.constant -0.0471813157 : f32
    %724 = vector.broadcast %cst_232 : f32 to vector<14x14xf32>
    %725 = arith.mulf %724, %80 : vector<14x14xf32>
    %726 = arith.addf %723, %725 : vector<14x14xf32>
    %cst_233 = arith.constant 0.137795091 : f32
    %727 = vector.broadcast %cst_233 : f32 to vector<14x14xf32>
    %728 = arith.mulf %727, %82 : vector<14x14xf32>
    %729 = arith.addf %726, %728 : vector<14x14xf32>
    %cst_234 = arith.constant 0.0135730729 : f32
    %730 = vector.broadcast %cst_234 : f32 to vector<14x14xf32>
    %731 = arith.mulf %730, %84 : vector<14x14xf32>
    %732 = arith.addf %729, %731 : vector<14x14xf32>
    %cst_235 = arith.constant 0.23103635 : f32
    %733 = vector.broadcast %cst_235 : f32 to vector<14x14xf32>
    %734 = arith.mulf %733, %86 : vector<14x14xf32>
    %735 = arith.addf %732, %734 : vector<14x14xf32>
    %cst_236 = arith.constant -0.0787192806 : f32
    %736 = vector.broadcast %cst_236 : f32 to vector<14x14xf32>
    %737 = arith.mulf %736, %88 : vector<14x14xf32>
    %738 = arith.addf %735, %737 : vector<14x14xf32>
    %cst_237 = arith.constant 0.0580284409 : f32
    %739 = vector.broadcast %cst_237 : f32 to vector<14x14xf32>
    %740 = arith.mulf %739, %90 : vector<14x14xf32>
    %741 = arith.addf %738, %740 : vector<14x14xf32>
    %cst_238 = arith.constant -0.0195505824 : f32
    %742 = vector.broadcast %cst_238 : f32 to vector<14x14xf32>
    %743 = arith.mulf %742, %92 : vector<14x14xf32>
    %744 = arith.addf %741, %743 : vector<14x14xf32>
    %cst_239 = arith.constant 0.056581784 : f32
    %745 = vector.broadcast %cst_239 : f32 to vector<14x14xf32>
    %746 = arith.mulf %745, %94 : vector<14x14xf32>
    %747 = arith.addf %744, %746 : vector<14x14xf32>
    %748 = math.absf %747 : vector<14x14xf32>
    %749 = arith.addf %667, %748 : vector<14x14xf32>
    %c0_240 = arith.constant 0 : index
    %c0_241 = arith.constant 0 : index
    %750 = vector.load %arg7[%c0_240, %c0_241] : memref<14x14xf32, #tpu.memory_space<vmem>>, vector<14x14xf32>
    %751 = arith.addf %750, %749 : vector<14x14xf32>
    %c0_242 = arith.constant 0 : index
    %c0_243 = arith.constant 0 : index
    %752 = vector.load %arg7[%c0_242, %c0_243] : memref<14x14xf32, #tpu.memory_space<vmem>>, vector<14x14xf32>
    tpu.vector_store %arg7[%c0_242, %c0_243], %751 {strides = array<i32>} : memref<14x14xf32, #tpu.memory_space<vmem>>, vector<14x14xf32>,
    %c0_i32_244 = arith.constant 0 : i32
    %753 = arith.cmpi eq, %arg1, %c0_i32_244 : i32
    %754 = arith.extui %753 : i1 to i32
    %c0_i32_245 = arith.constant 0 : i32
    %755 = arith.cmpi ne, %754, %c0_i32_245 : i32
    scf.if %755 {
      %c0_246 = arith.constant 0 : index
      %c0_247 = arith.constant 0 : index
      %c0_248 = arith.constant 0 : index
      %756 = vector.load %arg8[%c0_246, %c0_247, %c0_248] : memref<1x16x16xf32, #tpu.memory_space<vmem>>, vector<1x16x16xf32>
      %757 = vector.shape_cast %756 : vector<1x16x16xf32> to vector<1x1x16x16xf32>
      %cst_249 = arith.constant dense<0.000000e+00> : vector<1xf32>
      %758 = vector.multi_reduction <add>, %757, %cst_249 [1, 2, 3] : vector<1x1x16x16xf32> to vector<1xf32>
      %759 = vector.shape_cast %758 : vector<1xf32> to vector<1x1x1x1xf32>
      %760 = vector.extract %759[0, 0, 0, 0] : f32 from vector<1x1x1x1xf32>
      %cst_250 = arith.constant 5.120000e+02 : f32
      %761 = arith.divf %760, %cst_250 : f32
      %c0_251 = arith.constant 0 : index
      %c0_252 = arith.constant 0 : index
      %762 = vector.load %arg6[%c0_251, %c0_252] : memref<12x12xf32, #tpu.memory_space<vmem>>, vector<12x12xf32>
      %763 = vector.shape_cast %762 : vector<12x12xf32> to vector<1x12x12xf32>
      %cst_253 = arith.constant dense<0.000000e+00> : vector<1xf32>
      %764 = vector.multi_reduction <add>, %763, %cst_253 [1, 2] : vector<1x12x12xf32> to vector<1xf32>
      %765 = vector.shape_cast %764 : vector<1xf32> to vector<1x1x1xf32>
      %766 = vector.extract %765[0, 0, 0] : f32 from vector<1x1x1xf32>
      %cst_254 = arith.constant 2.160000e+04 : f32
      %767 = arith.divf %766, %cst_254 : f32
      %c0_255 = arith.constant 0 : index
      %c0_256 = arith.constant 0 : index
      %768 = vector.load %arg7[%c0_255, %c0_256] : memref<14x14xf32, #tpu.memory_space<vmem>>, vector<14x14xf32>
      %769 = vector.shape_cast %768 : vector<14x14xf32> to vector<1x14x14xf32>
      %cst_257 = arith.constant dense<0.000000e+00> : vector<1xf32>
      %770 = vector.multi_reduction <add>, %769, %cst_257 [1, 2] : vector<1x14x14xf32> to vector<1xf32>
      %771 = vector.shape_cast %770 : vector<1xf32> to vector<1x1x1xf32>
      %772 = vector.extract %771[0, 0, 0] : f32 from vector<1x1x1xf32>
      %cst_258 = arith.constant 3.136000e+03 : f32
      %773 = arith.divf %772, %cst_258 : f32
      %cst_259 = arith.constant 1.000000e+00 : f32
      %774 = arith.mulf %cst_259, %767 : f32
      %cst_260 = arith.constant 1.000000e-03 : f32
      %775 = arith.mulf %cst_260, %761 : f32
      %776 = arith.addf %774, %775 : f32
      %cst_261 = arith.constant 1.000000e-01 : f32
      %777 = arith.mulf %cst_261, %773 : f32
      %778 = arith.addf %776, %777 : f32
      %779 = vector.broadcast %778 : f32 to vector<8x128xf32>
      %c0_262 = arith.constant 0 : index
      %c0_263 = arith.constant 0 : index
      %c0_264 = arith.constant 0 : index
      %780 = vector.load %arg5[%c0_262, %c0_263, %c0_264] : memref<1x8x128xf32, #tpu.memory_space<vmem>>, vector<1x8x128xf32>
      %781 = vector.shape_cast %780 : vector<1x8x128xf32> to vector<8x128xf32>
      %782 = vector.shape_cast %779 : vector<8x128xf32> to vector<1x8x128xf32>
      tpu.vector_store %arg5[%c0_262, %c0_263, %c0_264], %782 {strides = array<i32>} : memref<1x8x128xf32, #tpu.memory_space<vmem>>, vector<1x8x128xf32>,
    } else {
    }
    return
  }
  func.func @transform_0(%arg0: i32, %arg1: i32) -> (i32, i32, i32, i32) {
    %c1_i32 = arith.constant 1 : i32
    %0 = arith.muli %arg0, %c1_i32 : i32
    %1 = arith.addi %0, %arg1 : i32
    %c0_i32 = arith.constant 0 : i32
    %c0_i32_0 = arith.constant 0 : i32
    %c0_i32_1 = arith.constant 0 : i32
    %c0_i32_2 = arith.constant 0 : i32
    return %1, %c0_i32, %c0_i32_0, %c0_i32_1 : i32, i32, i32, i32
  }
  func.func @transform_1(%arg0: i32, %arg1: i32) -> (i32, i32, i32, i32) {
    %c1_i32 = arith.constant 1 : i32
    %0 = arith.muli %arg0, %c1_i32 : i32
    %1 = arith.addi %0, %arg1 : i32
    %c0_i32 = arith.constant 0 : i32
    %c0_i32_0 = arith.constant 0 : i32
    %c0_i32_1 = arith.constant 0 : i32
    %c0_i32_2 = arith.constant 0 : i32
    return %1, %c0_i32, %c0_i32_0, %c0_i32_1 : i32, i32, i32, i32
  }
  func.func @transform_2(%arg0: i32, %arg1: i32) -> (i32, i32, i32, i32) {
    %c1_i32 = arith.constant 1 : i32
    %0 = arith.muli %arg0, %c1_i32 : i32
    %1 = arith.addi %0, %arg1 : i32
    %c0_i32 = arith.constant 0 : i32
    %c0_i32_0 = arith.constant 0 : i32
    %c0_i32_1 = arith.constant 0 : i32
    %c0_i32_2 = arith.constant 0 : i32
    return %1, %c0_i32, %c0_i32_0, %c0_i32_1 : i32, i32, i32, i32
  }
  func.func @transform_3(%arg0: i32, %arg1: i32) -> (i32, i32, i32) {
    %c0_i32 = arith.constant 0 : i32
    %c0_i32_0 = arith.constant 0 : i32
    %c0_i32_1 = arith.constant 0 : i32
    return %arg0, %c0_i32, %c0_i32_0 : i32, i32, i32
  }
}

</mosaic_0001>

<bundles_post_ra>
// kernel: tpu_custom_call.1
= control target key start
LH: loop header
LB: loop body
LE: loop exit
PB: predicated region body
PF: predicated region fallthrough
CT: control target
= control target key end

     0   :  { %s5694_s0 = inlined_call_operand.hbm [shape: f32[2,1,16,16], index: 0, kind: input, shape index: {}]   ;;  %s5695_s1 = inlined_call_operand.hbm [shape: f32[2,3,16,16], index: 1, kind: input, shape index: {}]   ;;  %s5696_s2 = inlined_call_operand.hbm [shape: f32[2,3,16,16], index: 2, kind: input, shape index: {}]   ;;  %s5697_s3 = inlined_call_operand.hbm [shape: f32[2,8,128], index: 3, kind: output, shape index: {}]  }
   0x1   :  { %5708 = sst [smem:[#allocation135_spill]] %s5695_s1 }
   0x2   :  { %8 = vsyncpa [#allocation6], 0 }
   0x3   :  { %10 = vsyncpa [#allocation6 + $0x1], 0 }
   0x4   :  { %11 = vsyncpa [#allocation9], 0 }
   0x5   :  { %13 = vsyncpa [#allocation9 + $0x1], 0 }
   0x6   :  { %14 = vsyncpa [#allocation7], 0 }
   0x7   :  { %16 = vsyncpa [#allocation7 + $0x1], 0  ;;  %s3780_s12 = smov 0   ;;  %s3782_s13 = smov 0  }
   0x8   :  { %s3784_s14 = smov 0   ;;  %s3786_s15 = smov 0  }
   0x9   :  { %s3788_s16 = smov 0   ;;  %s3790_s17 = smov 0  }
   0xa LB: > { %5709 = sst [smem:[#allocation15_spill]] %s3728_s12  ;;  %s3811_s18 = sadd.s32 4294967295, %s3748_s17   ;;  %s3748_s17 = sphi %s3790_s17, %s22_s17   ;;  %s3744_s16 = sphi %s3788_s16, %s5957_s16   ;;  %s3740_s15 = sphi %s3786_s15, %s5956_s15   ;;  %s3736_s14 = sphi %s3784_s14, %s5955_s14   ;;  %s3732_s13 = sphi %s3782_s13, %s5959_s13   ;;  %s3728_s12 = sphi %s3780_s12, %s5958_s12  }
   0xb   : > { %5710 = sst [smem:[#allocation16_spill]] %s3736_s14  ;;  %s3447_s19 = sadd.s32 4294967294, %s3748_s17  }
   0xc   : > { %5711 = sst [smem:[#allocation17_spill]] %s3744_s16  ;;  %s34_s20 = sadd.s32 1, %s3744_s16 }
   0xd   : > { %5712 = sst [smem:[#allocation18_spill]] %s3748_s17  ;;  %s43_s21 = sadd.s32 1, %s3736_s14 }
   0xe   : > { %p36_p0 = scmp.ge.s32.totalorder %s34_s20, 2  ;;  %p50_p1 = scmp.ne.s32.totalorder %s3736_s14, %s3732_s13 }
   0xf   : > { %p51_p2 = scmp.eq.s32.totalorder %s3748_s17, 0  ;;  %p56_p3 = scmp.ne.s32.totalorder %s3732_s13, %s3728_s12 }
  0x10   : > { %s5961_s20 = smov (%p36_p0, %s34_s20), 0  ;;  %p57_p5 = scmp.eq.s32.totalorder %s3811_s18, 0 }
  0x11   : > { %5713 = sst [smem:[#allocation19_spill]] %s5961_s20  ;;  %p3823_p4 = por %p51_p2, %p50_p1 }
  0x12   : > { %s40_s23 = ssub.s32 %s3744_s16, %s5961_s20  ;;  %p136_p6 = scmp.eq.s32.totalorder %s3811_s18, 1 }
  0x13   : > { %p41_p7 = scmp.eq.s32.totalorder %s40_s23, 0  ;;  %p3831_p8 = por %p57_p5, %p56_p3 }
  0x14   : > { %p3835_p9 = por %p136_p6, %p50_p1  ;;  %p142_p10 = scmp.eq.s32.totalorder %s3447_s19, 1 }
  0x15   : > { %s3840_s26 = scalar_select %p41_p7, %s3736_s14, %s43_s21  }
  0x16   : > { %p3842_p11 = por %p142_p10, %p56_p3  ;;  %p3449_p12 = scmp.ge.s32.totalorder %s3748_s17, 2 }
  0x17   : > { %5717 = sst [smem:[#allocation20_spill]] %s3840_s26  ;;  %p3502_p13 = scmp.lt.s32.totalorder %s3748_s17, 2 }
  0x18   : > { %s5718_s27 = scalar_select %p3842_p11, 1, 0 }
  0x19   : > { %s3849_s28 = sand.u32 1, %s3736_s14   ;;  %p3853_p0 = pnand %p3502_p13, %p3823_p4 }
  0x1a   : > { %5719 = sst [smem:[#allocation21_spill]] %s5718_s27  ;;  %s185_s30 = sand.u32 1, %s3748_s17  }
  0x1b   : > { %s5698_s4 = smul.u32 48, %s3849_s28  ;;  %p3455_p1 = scmp.ge.s32.totalorder %s3748_s17, 1 }
  0x1c   : > { %s3464_s5 = smul.u32 48, %s3744_s16  ;;  %s5721_s1 = sld [smem:[#allocation135_spill]] }
  0x1d   : > { %s189_s9 = scalar_lea.vmem [#allocation8], %s5698_s4  ;;  %p229_p2 = scmp.lt.s32.totalorder %s3748_s17, 3 }
  0x1e   : > { %s198_s10 = sshll.u32 %s189_s9, 4  ;;  %s186_s19 = scalar_lea.sflag [#allocation9], %s185_s30  ;;  %s199_s10 = int_to_ptr.vmem [resolvable:$true] %s198_s10 }
  0x1f   : > { %s3750_s21 = smov 128   ;;  %s3751_s22 = smov 8  }
  0x20   : > { %p3869_p3 = pnand %p3455_p1, %p229_p2  ;;  %s3450_s6 = sshll.u32 %s3849_s28, 4 }
  0x21   : > { %s3462_s7 = sshll.u32 %s3744_s16, 4  ;;  %s166_s20 = scalar_lea.vmem [#allocation5], %s3450_s6 }
  0x22   : > { %s195_s8 = scalar_lea.hbm %s5721_s1, %s3464_s5  ;;  %s172_s4 = scalar_lea.hbm %s5694_s0, %s3462_s7 }
  0x23   : > { %s196_s11 = sshll.u32 %s195_s8, 4  ;;  %s173_s1 = sshll.u32 %s172_s4, 4  ;;  %s197_s11 = int_to_ptr.hbm [resolvable:$true] %s196_s11  ;;  %s174_s1 = int_to_ptr.hbm [resolvable:$true] %s173_s1 }
  0x24   : > { %3494 = dma.hbm_to_vmem [thread:$0]  (!%p3853_p0), %s197_s11, 768, %s199_s10, %s186_s19, %s3750_s21, %s3750_s21, %s3751_s22  }
  0x25   : > { %s175_s26 = sshll.u32 %s166_s20, 4  ;;  %s163_s30 = scalar_lea.sflag [#allocation6], %s3849_s28  ;;  %s176_s26 = int_to_ptr.vmem [resolvable:$true] %s175_s26 }
  0x26   : > { %3491 = dma.hbm_to_vmem [thread:$0]  (!%p3853_p0), %s174_s1, 256, %s176_s26, %s163_s30, %s3750_s21, %s3750_s21, %s3751_s22  }
  0x27   : > { %s218_s14 = scalar_lea.hbm %s5696_s2, %s3464_s5  ;;  %s5723_s27 = smul.u32 48, %s3849_s28 }
  0x28   : > { %s219_s17 = sshll.u32 %s218_s14, 4  ;;  %233 = sbr.rel (%p3869_p3) target bundleno = 1207 (0x4b7), region = 32  ;;  %s220_s17 = int_to_ptr.hbm [resolvable:$true] %s219_s17 }
  0x29   : > { %s212_s12 = scalar_lea.vmem [#allocation10], %s5723_s27 }
  0x2a   : > { %s221_s16 = sshll.u32 %s212_s12, 4  ;;  %s222_s16 = int_to_ptr.vmem [resolvable:$true] %s221_s16 }
  0x2b   : > { %3497 = dma.hbm_to_vmem [thread:$0]  (!%p3853_p0), %s220_s17, 768, %s222_s16, %s186_s19, %s3750_s21, %s3750_s21, %s3751_s22  }
  0x2d   : > { %s3891_s20 = sand.u32 1, %s3732_s13  }
  0x2e   : > { %s3456_s1 = sshll.u32 %s3891_s20, 4  ;;  %s236_s26 = scalar_lea.sflag [#allocation6], %s3891_s20 }
  0x2f   : > { %s3895_s4 = scalar_lea.vmem [#allocation5], %s3456_s1 }
  0x30   : > { %3715 = dma.done.wait (%p3831_p8), %s236_s26, 256  }
  0x31   : > { %3717 = vsyncadd (%p3831_p8), %s236_s26, 4294967040  ;;  %s245_s12 = sand.u32 1, %s3811_s18   ;;  %s3467_s14 = smul.u32 48, %s3891_s20 }
  0x32   : > { %s246_s16 = scalar_lea.sflag [#allocation9], %s245_s12 }
  0x33   : > { %s249_s17 = scalar_lea.vmem [#allocation8], %s3467_s14 }
  0x34   : > { %3719 = dma.done.wait (%p3831_p8), %s246_s16, 1536  }
  0x35   : > { %3721 = vsyncadd (%p3831_p8), %s246_s16, 4294965760  ;;  %v313_v0 = vld [vmem:[%s249_s17] sm:$0xff]  ;;  %v315_v1 = vld [vmem:[%s249_s17 + $0x10] sm:$0xff]  ;;  %s259_s27 = scalar_lea.vmem [#allocation10], %s3467_s14  ;;  %s3752_s18 = smov 127   ;;  %vm454_vm0 = vcmask 1046528  }
  0x36   : > { %v317_v2 = vld [vmem:[%s249_s17 + $0x20] sm:$0xff]  ;;  %v321_v4 = vld [vmem:[%s259_s27 + $0x10] sm:$0xff]  ;;  %v314_v9 = vld [vmem:[%s249_s17 + $0x8] sm:$0xff]  ;;  %s3753_s24 = smov 126   ;;  %s3754_s28 = smov 125   ;;  %vm476_vm1 = vcmask 1045504  }
  0x37   : > { %v319_v3 = vld [vmem:[%s259_s27] sm:$0xff]  ;;  %v3909_v7 = vsub.f32 %v315_v1, %v321_v4  ;;  %v316_v10 = vld [vmem:[%s249_s17 + $0x18] sm:$0xff]  ;;  %v320_v11 = vld [vmem:[%s259_s27 + $0x8] sm:$0xff]  ;;  %s3755_s29 = smov 124   ;;  %vm300_vm2 = vcmask 97280   ;;  %vm302_vm3 = vcmask 93184  }
  0x38   : > { %v323_v5 = vld [vmem:[%s259_s27 + $0x20] sm:$0xff]  ;;  %v3907_v6 = vsub.f32 %v313_v0, %v319_v3  ;;  %v322_v12 = vld [vmem:[%s259_s27 + $0x18] sm:$0xff]  ;;  %v318_v13 = vld [vmem:[%s249_s17 + $0x28] sm:$0xff]  ;;  %v3919_v15 = vsub.f32 %v314_v9, %v320_v11  ;;  %vm498_vm4 = vcmask 1044480   ;;  %vm520_vm5 = vcmask 1043456   ;;  %s3457_s21 = sshll.u32 %s3891_s20, 3 }
  0x39   : > { %v3911_v8 = vsub.f32 %v317_v2, %v323_v5  ;;  %356 = vrot.lane.b32.xlu1 %v3909_v7, %s3752_s18  ;;  %v324_v14 = vld [vmem:[%s259_s27 + $0x28] sm:$0xff]  ;;  %v3921_v16 = vsub.f32 %v316_v10, %v322_v12  ;;  %v678_v44 = vmul.f32 -0.062327445, %v3909_v7  ;;  %v690_v45 = vmul.f32 0.004132598, %v3909_v7  ;;  %s3459_s22 = sshll.u32 %s3740_s15, 3 }
  0x3a   : > { %352 = vrot.lane.b32.xlu0 %v3907_v6, %s3752_s18  ;;  %v3923_v17 = vsub.f32 %v318_v13, %v324_v14  ;;  %v569_v18 = vmul.f32 -0.013210486, %v3919_v15  ;;  %v568_v19 = vmul.f32 -0.013210486, %v3907_v6  ;;  %v580_v20 = vmul.f32 0.06404226, %v3907_v6  ;;  %s3317_s30 = scalar_lea.hbm %s5697_s3, %s3459_s22 }
  0x3b   : > { %360 = vrot.lane.b32.xlu2 %v3911_v8, %s3752_s18  ;;  %v603_v21 = vmul.f32 -0.05356694, %v3907_v6  ;;  %v604_v22 = vmul.f32 -0.05356694, %v3919_v15  ;;  %v581_v25 = vmul.f32 0.06404226, %v3919_v15 }
  0x3c   : > { %v619_v27 = vmul.f32 0.036159508, %v3919_v15  ;;  %v618_v28 = vmul.f32 0.036159508, %v3907_v6  ;;  %v644_v29 = vmul.f32 0.0947081, %v3907_v6 }
  0x3d   : > { %v607_v23 = vrot.slane %v603_v21, 1  ;;  %v608_v24 = vrot.slane %v604_v22, 1  ;;  %v645_v30 = vmul.f32 0.0947081, %v3919_v15  ;;  %v659_v36 = vmul.f32 -0.07037353, %v3907_v6 }
  0x3e   : > { %v623_v31 = vrot.slane %v619_v27, 1  ;;  %v622_v32 = vrot.slane %v618_v28, 1  ;;  %v648_v33 = vrot.slane %v644_v29, 2  ;;  %v660_v37 = vmul.f32 -0.07037353, %v3919_v15  ;;  %s292_s12 = scalar_lea.vmem [#allocation11], %s3457_s21 }
  0x3f   : > { %v609_v26 = vsel %vm454_vm0, %v607_v23, %v608_v24  ;;  %v649_v34 = vrot.slane %v645_v30, 2  ;;  %v663_v39 = vrot.slane %v659_v36, 2  ;;  %v679_v43 = vmul.f32 -0.062327445, %v3921_v16  ;;  %s3319_s14 = sshll.u32 %s292_s12, 4  ;;  %s3321_s16 = sshll.u32 %s3317_s30, 4  ;;  %s3320_s14 = int_to_ptr.vmem [resolvable:$true] %s3319_s14  ;;  %s3322_s16 = int_to_ptr.hbm [resolvable:$true] %s3321_s16 }
  0x40   : > { %v624_v35 = vsel %vm454_vm0, %v622_v32, %v623_v31  ;;  %v664_v40 = vrot.slane %v660_v37, 2  ;;  %v713_v46 = vmul.f32 -0.021879166, %v3909_v7  ;;  %v714_v47 = vmul.f32 -0.021879166, %v3921_v16 }
  0x41   : > { %358 = vrot.lane.b32.xlu1 %v3921_v16, %s3752_s18  ;;  %v650_v38 = vsel %vm476_vm1, %v648_v33, %v649_v34  ;;  %v691_v51 = vmul.f32 0.004132598, %v3921_v16  ;;  %v729_v53 = vmul.f32 -0.124591105, %v3921_v16  ;;  %v728_v54 = vmul.f32 -0.124591105, %v3909_v7 }
  0x42   : > { %354 = vrot.lane.b32.xlu0 %v3919_v15, %s3752_s18  ;;  %v665_v41 = vsel %vm476_vm1, %v663_v39, %v664_v40  ;;  %v717_v48 = vrot.slane %v713_v46, 1  ;;  %v718_v49 = vrot.slane %v714_v47, 1  ;;  %v754_v55 = vmul.f32 -0.054425903, %v3909_v7 }
  0x43   : > { %362 = vrot.lane.b32.xlu2 %v3923_v17, %s3752_s18  ;;  %v755_v56 = vmul.f32 -0.054425903, %v3921_v16  ;;  %v733_v57 = vrot.slane %v729_v53, 1  ;;  %v732_v58 = vrot.slane %v728_v54, 1  ;;  %v769_v63 = vmul.f32 -0.031630017, %v3909_v7 }
  0x44   : > { %v719_v52 = vsel %vm454_vm0, %v717_v48, %v718_v49  ;;  %v758_v59 = vrot.slane %v754_v55, 2  ;;  %v770_v0 = vmul.f32 -0.031630017, %v3921_v16  ;;  %v789_v14 = vmul.f32 0.10425134, %v3923_v17 }
  0x45   : > { %v759_v60 = vrot.slane %v755_v56, 2  ;;  %v734_v62 = vsel %vm454_vm0, %v732_v58, %v733_v57  ;;  %v773_v2 = vrot.slane %v769_v63, 2  ;;  %v824_v21 = vmul.f32 -0.06651947, %v3923_v17 }
  0x46   : > { %v774_v3 = vrot.slane %v770_v0, 2  ;;  %v801_v27 = vmul.f32 -0.012853466, %v3923_v17  ;;  %v839_v29 = vmul.f32 0.03515101, %v3923_v17  ;;  %vm308_vm6 = vcmask 130048  }
  0x47   : > { %v760_v1 = vsel %vm476_vm1, %v758_v59, %v759_v60  ;;  %v828_v23 = vrot.slane %v824_v21, 1  ;;  %v838_v30 = vmul.f32 0.03515101, %v3911_v8  ;;  %v865_v32 = vmul.f32 0.00940123, %v3923_v17 }
  0x48   : > { %v775_v10 = vsel %vm476_vm1, %v773_v2, %v774_v3  ;;  %v843_v33 = vrot.slane %v839_v29, 1  ;;  %v898_v58 = vmul.f32 -0.045772582, %v3907_v6  ;;  %v910_v2 = vmul.f32 0.022019513, %v3907_v6 }
  0x49   : > { %378 = vrot.lane.b32.xlu1 %v3919_v15, %s3753_s24  ;;  %vm304_vm7 = vcmask 113664   ;;  %vm306_vm8 = vcmask 111616  }
  0x4a   : > { %376 = vrot.lane.b32.xlu0 %v3907_v6, %s3753_s24 }
  0x4b   : > { %380 = vrot.lane.b32.xlu2 %v3909_v7, %s3753_s24 }
  0x51   : > { %384 = vrot.lane.b32.xlu1 %v3911_v8, %s3753_s24 }
  0x52   : > { %382 = vrot.lane.b32.xlu0 %v3921_v16, %s3753_s24 }
  0x53   : > { %386 = vrot.lane.b32.xlu2 %v3923_v17, %s3753_s24 }
  0x59   : > { %402 = vrot.lane.b32.xlu1 %v3919_v15, %s3754_s28 }
  0x5a   : > { %400 = vrot.lane.b32.xlu0 %v3907_v6, %s3754_s28 }
  0x5b   : > { %404 = vrot.lane.b32.xlu2 %v3909_v7, %s3754_s28 }
  0x61   : > { %408 = vrot.lane.b32.xlu1 %v3911_v8, %s3754_s28 }
  0x62   : > { %406 = vrot.lane.b32.xlu0 %v3921_v16, %s3754_s28 }
  0x63   : > { %410 = vrot.lane.b32.xlu2 %v3923_v17, %s3754_s28 }
  0x69   : > { %426 = vrot.lane.b32.xlu1 %v3919_v15, %s3755_s29 }
  0x6a   : > { %424 = vrot.lane.b32.xlu0 %v3907_v6, %s3755_s29 }
  0x6b   : > { %428 = vrot.lane.b32.xlu2 %v3909_v7, %s3755_s29 }
  0x71   : > { %432 = vrot.lane.b32.xlu1 %v3911_v8, %s3755_s29 }
  0x72   : > { %430 = vrot.lane.b32.xlu0 %v3921_v16, %s3755_s29 }
  0x73   : > { %434 = vrot.lane.b32.xlu2 %v3923_v17, %s3755_s29 }
  0x79   : > { %574 = vrot.lane.b32.xlu1 %v569_v18, %s3752_s18  ;;  %v788_v18 = vmul.f32 0.10425134, %v3911_v8 }
  0x7a   : > { %572 = vrot.lane.b32.xlu0 %v568_v19, %s3752_s18  ;;  %v800_v19 = vmul.f32 -0.012853466, %v3911_v8 }
  0x7b   : > { %584 = vrot.lane.b32.xlu2 %v580_v20, %s3753_s24  ;;  %v823_v20 = vmul.f32 -0.06651947, %v3911_v8 }
  0x7d   : > { %v827_v22 = vrot.slane %v823_v20, 1 }
  0x7f   : > { %v829_v28 = vsel %vm454_vm0, %v827_v22, %v828_v23 }
  0x81   : > { %610 = vrot.lane.b32.xlu1 %v609_v26, %s3752_s18 }
  0x82   : > { %586 = vrot.lane.b32.xlu0 %v581_v25, %s3753_s24 }
  0x83   : > { %612 = vrot.lane.b32.xlu2 %v608_v24, %s3752_s18 }
  0x89   : > { %627 = vrot.lane.b32.xlu1 %v623_v31, %s3753_s24  ;;  %v864_v31 = vmul.f32 0.00940123, %v3911_v8 }
  0x8a   : > { %625 = vrot.lane.b32.xlu0 %v624_v35, %s3753_s24 }
  0x8b   : > { %651 = vrot.lane.b32.xlu2 %v650_v38, %s3752_s18  ;;  %v868_v37 = vrot.slane %v864_v31, 2  ;;  %v869_v38 = vrot.slane %v865_v32, 2  ;;  %v4111_v31 = vmul.f32 0.021465912, %v3919_v15 }
  0x91   : > { %666 = vrot.lane.b32.xlu1 %v665_v41, %s3753_s24  ;;  %v879_v41 = vmul.f32 -0.07434993, %v3911_v8 }
  0x92   : > { %653 = vrot.lane.b32.xlu0 %v649_v34, %s3752_s18  ;;  %v842_v34 = vrot.slane %v838_v30, 1 }
  0x93   : > { %668 = vrot.lane.b32.xlu2 %v664_v40, %s3753_s24 }
  0x94   : > { %v844_v40 = vsel %vm454_vm0, %v842_v34, %v843_v33 }
  0x95   : > { %v3983_v42 = vpop.permute.xlu2 %360 }
  0x99   : > { %684 = vrot.lane.b32.xlu1 %v679_v43, %s3752_s18  ;;  %v880_v43 = vmul.f32 -0.07434993, %v3923_v17 }
  0x9a   : > { %682 = vrot.lane.b32.xlu0 %v678_v44, %s3752_s18  ;;  %v870_v44 = vsel %vm476_vm1, %v868_v37, %v869_v38 }
  0x9b   : > { %694 = vrot.lane.b32.xlu2 %v690_v45, %s3753_s24  ;;  %v883_v45 = vrot.slane %v879_v41, 2  ;;  %v884_v46 = vrot.slane %v880_v43, 2 }
  0x9d   : > { %v3993_v50 = vpop.permute.xlu2 %362 }
  0xa1   : > { %720 = vrot.lane.b32.xlu1 %v719_v52, %s3752_s18  ;;  %v375_v52 = vadd.f32 %v3993_v50, %v3923_v17  ;;  %v5706_v50 = vmov 0.0  }
  0xa2   : > { %696 = vrot.lane.b32.xlu0 %v691_v51, %s3753_s24  ;;  %v885_v51 = vsel %vm476_vm1, %v883_v45, %v884_v46  ;;  %301 = vst.msk [vmem:[#allocation2] sm:$0xff] %vm300_vm2, %v5706_v50 }
  0xa3   : > { %722 = vrot.lane.b32.xlu2 %v718_v49, %s3752_s18  ;;  %303 = vst.msk [vmem:[#allocation2 + $0x8] sm:$0xf] %vm302_vm3, %v5706_v50  ;;  %v1353_v50 = vmul.f32 -0.025857255, %v3921_v16 }
  0xa5   : > { %v4004_v61 = vpop.permute.xlu2 %380 }
  0xa9   : > { %737 = vrot.lane.b32.xlu1 %v733_v57, %s3753_s24  ;;  %v899_v57 = vmul.f32 -0.045772582, %v3919_v15 }
  0xaa   : > { %735 = vrot.lane.b32.xlu0 %v734_v62, %s3753_s24  ;;  %v934_v62 = vmul.f32 -0.020917557, %v3919_v15 }
  0xab   : > { %761 = vrot.lane.b32.xlu2 %v760_v1, %s3752_s18  ;;  %v357_v4 = vpop.permute.xlu1 %356 }
  0xac   : > { %v4013_v5 = vpop.permute.xlu0 %352  ;;  %v372_v53 = vadd.f32 %v357_v4, %v3909_v7 }
  0xad   : > { %v4015_v9 = vpop.permute.xlu2 %386  ;;  %v370_v63 = vadd.f32 %v4013_v5, %v3907_v6  ;;  %v938_v5 = vrot.slane %v934_v62, 1 }
  0xae   : > { %v399_v59 = vadd.f32 %v4015_v9, %v375_v52  ;;  %v396_v0 = vadd.f32 %v4004_v61, %v372_v53  ;;  %v989_v53 = vmul.f32 0.03553727, %v3907_v6 }
  0xb1   : > { %776 = vrot.lane.b32.xlu1 %v775_v10, %s3753_s24 }
  0xb2   : > { %763 = vrot.lane.b32.xlu0 %v759_v60, %s3752_s18  ;;  %v933_v60 = vmul.f32 -0.020917557, %v3907_v6 }
  0xb3   : > { %778 = vrot.lane.b32.xlu2 %v774_v3, %s3753_s24  ;;  %v4021_v11 = vpop.permute.xlu1 %358 }
  0xb4   : > { %v4023_v12 = vpop.permute.xlu0 %354 }
  0xb5   : > { %v4025_v13 = vpop.permute.xlu2 %404  ;;  %v371_v1 = vadd.f32 %v4023_v12, %v3919_v15  ;;  %v374_v12 = vadd.f32 %v3983_v42, %v3911_v8  ;;  %v974_v42 = vmul.f32 0.021465912, %v3907_v6 }
  0xb6   : > { %v420_v4 = vadd.f32 %v4025_v13, %v396_v0  ;;  %v373_v13 = vadd.f32 %v4021_v11, %v3921_v16 }
  0xb7   : > { %v978_v45 = vrot.slane %v974_v42, 2 }
  0xb9   : > { %794 = vrot.lane.b32.xlu1 %v789_v14, %s3752_s18 }
  0xba   : > { %792 = vrot.lane.b32.xlu0 %v788_v18, %s3752_s18  ;;  %v937_v18 = vrot.slane %v933_v60, 1 }
  0xbb   : > { %804 = vrot.lane.b32.xlu2 %v800_v19, %s3753_s24  ;;  %v379_v24 = vpop.permute.xlu1 %378 }
  0xbc   : > { %v377_v25 = vpop.permute.xlu0 %376  ;;  %v395_v9 = vadd.f32 %v379_v24, %v371_v1  ;;  %v948_v24 = vmul.f32 -0.015922502, %v3907_v6  ;;  %v939_v30 = vsel %vm454_vm0, %v937_v18, %v938_v5 }
  0xbd   : > { %v411_v26 = vpop.permute.xlu2 %410  ;;  %v394_v10 = vadd.f32 %v377_v25, %v370_v63 }
  0xbe   : > { %v423_v3 = vadd.f32 %v411_v26, %v399_v59 }
  0xc1   : > { %830 = vrot.lane.b32.xlu1 %v829_v28, %s3752_s18  ;;  %v911_v28 = vmul.f32 0.022019513, %v3919_v15 }
  0xc2   : > { %806 = vrot.lane.b32.xlu0 %v801_v27, %s3753_s24 }
  0xc3   : > { %832 = vrot.lane.b32.xlu2 %v828_v23, %s3752_s18  ;;  %v4044_v35 = vpop.permute.xlu1 %384  ;;  %v4096_v23 = vmul.f32 -0.015922502, %v3919_v15 }
  0xc4   : > { %v4046_v36 = vpop.permute.xlu0 %382  ;;  %v398_v29 = vadd.f32 %v4044_v35, %v374_v12 }
  0xc5   : > { %v429_v39 = vpop.permute.xlu2 %428  ;;  %v397_v34 = vadd.f32 %v4046_v36, %v373_v13 }
  0xc6   : > { %v4088_v19 = vadd.f32 %v429_v39, %v420_v4  ;;  %v953_v39 = vrot.slane %v4096_v23, 1 }
  0xc8   : > { %v458_v32 = vrot.slane %v4088_v19, 1  ;;  %v524_v41 = vrot.slane %v4088_v19, 4 }
  0xc9   : > { %847 = vrot.lane.b32.xlu1 %v843_v33, %s3753_s24  ;;  %v480_v33 = vrot.slane %v4088_v19, 2 }
  0xca   : > { %845 = vrot.lane.b32.xlu0 %v844_v40, %s3753_s24  ;;  %v952_v40 = vrot.slane %v948_v24, 1 }
  0xcb   : > { %871 = vrot.lane.b32.xlu2 %v870_v44, %s3752_s18  ;;  %v403_v47 = vpop.permute.xlu1 %402 }
  0xcc   : > { %v401_v48 = vpop.permute.xlu0 %400  ;;  %v419_v61 = vadd.f32 %v403_v47, %v395_v9  ;;  %v954_v62 = vsel %vm454_vm0, %v952_v40, %v953_v39 }
  0xcd   : > { %v435_v49 = vpop.permute.xlu2 %434  ;;  %v418_v20 = vadd.f32 %v401_v48, %v394_v10  ;;  %v979_v48 = vrot.slane %v4111_v31, 2 }
  0xce   : > { %v4084_v14 = vadd.f32 %v435_v49, %v423_v3 }
  0xcf   : > { %v980_v10 = vsel %vm476_vm1, %v978_v45, %v979_v48 }
  0xd0   : > { %v462_v11 = vrot.slane %v4084_v14, 1  ;;  %v506_v3 = vrot.slane %v4084_v14, 3 }
  0xd1   : > { %886 = vrot.lane.b32.xlu1 %v885_v51, %s3753_s24 }
  0xd2   : > { %873 = vrot.lane.b32.xlu0 %v869_v38, %s3752_s18  ;;  %v502_v38 = vrot.slane %v4088_v19, 3 }
  0xd3   : > { %888 = vrot.lane.b32.xlu2 %v884_v46, %s3753_s24  ;;  %v4062_v54 = vpop.permute.xlu1 %408  ;;  %v475_v46 = vadd.f32 %v462_v11, %v4084_v14 }
  0xd4   : > { %v4064_v55 = vpop.permute.xlu0 %406  ;;  %v422_v49 = vadd.f32 %v4062_v54, %v398_v29  ;;  %v4138_v54 = vmul.f32 0.03553727, %v3919_v15 }
  0xd5   : > { %v4066_v56 = vpop.permute.xlu2 %584  ;;  %v421_v51 = vadd.f32 %v4064_v55, %v397_v34 }
  0xd9   : > { %904 = vrot.lane.b32.xlu1 %v899_v57, %s3752_s18  ;;  %v484_v57 = vrot.slane %v4084_v14, 2 }
  0xda   : > { %902 = vrot.lane.b32.xlu0 %v898_v58, %s3752_s18 }
  0xdb   : > { %914 = vrot.lane.b32.xlu2 %v910_v2, %s3753_s24  ;;  %v427_v21 = vpop.permute.xlu1 %426  ;;  %v497_v18 = vadd.f32 %v484_v57, %v475_v46 }
  0xdc   : > { %v425_v22 = vpop.permute.xlu0 %424  ;;  %v4099_v25 = vadd.f32 %v427_v21, %v419_v61 }
  0xdd   : > { %v4101_v26 = vadd.f32 %v425_v22, %v418_v20  ;;  %v4103_v27 = vpop.permute.xlu2 %612  ;;  %v993_v20 = vrot.slane %v989_v53, 2  ;;  %v994_v22 = vrot.slane %v4138_v54, 2  ;;  %v519_v46 = vadd.f32 %v506_v3, %v497_v18 }
  0xde   : > { %v456_v37 = vrot.slane %v4099_v25, 1  ;;  %v478_v43 = vrot.slane %v4099_v25, 2  ;;  %v500_v58 = vrot.slane %v4099_v25, 3  ;;  %v522_v12 = vrot.slane %v4099_v25, 4 }
  0xdf   : > { %v455_v35 = vrot.slane %v4101_v26, 1  ;;  %v477_v44 = vrot.slane %v4101_v26, 2  ;;  %v499_v63 = vrot.slane %v4101_v26, 3  ;;  %v521_v24 = vrot.slane %v4101_v26, 4 }
  0xe0   : > { %v471_v36 = vadd.f32 %v456_v37, %v4099_v25 }
  0xe1   : > { %v457_v47 = vsel %vm454_vm0, %v455_v35, %v456_v37  ;;  %940 = vrot.lane.b32.xlu1 %v939_v30, %s3752_s18  ;;  %v479_v55 = vsel %vm476_vm1, %v477_v44, %v478_v43  ;;  %v501_v23 = vsel %vm498_vm4, %v499_v63, %v500_v58  ;;  %v523_v53 = vsel %vm520_vm5, %v521_v24, %v522_v12 }
  0xe2   : > { %v470_v52 = vadd.f32 %v457_v47, %v4101_v26  ;;  %916 = vrot.lane.b32.xlu0 %v911_v28, %s3753_s24  ;;  %v493_v4 = vadd.f32 %v478_v43, %v471_v36 }
  0xe3   : > { %942 = vrot.lane.b32.xlu2 %v938_v5, %s3752_s18  ;;  %v433_v59 = vpop.permute.xlu1 %432 }
  0xe4   : > { %v431_v60 = vpop.permute.xlu0 %430  ;;  %v446_v0 = vadd.f32 %v433_v59, %v422_v49  ;;  %v492_v9 = vadd.f32 %v479_v55, %v470_v52  ;;  %v515_v29 = vadd.f32 %v500_v58, %v493_v4  ;;  %v528_v52 = vrot.slane %v4084_v14, 4 }
  0xe5   : > { %v445_v1 = vadd.f32 %v431_v60, %v421_v51  ;;  %v4142_v2 = vpop.permute.xlu2 %651 }
  0xe6   : > { %v461_v5 = vrot.slane %v446_v0, 1  ;;  %v483_v61 = vrot.slane %v446_v0, 2  ;;  %v505_v42 = vrot.slane %v446_v0, 3  ;;  %v514_v30 = vadd.f32 %v501_v23, %v492_v9 }
  0xe7   : > { %v459_v13 = vrot.slane %v445_v1, 1  ;;  %v481_v21 = vrot.slane %v445_v1, 2  ;;  %v527_v35 = vrot.slane %v446_v0, 4  ;;  %v503_v44 = vrot.slane %v445_v1, 3 }
  0xe8   : > { %v463_v28 = vsel %vm454_vm0, %v461_v5, %v462_v11  ;;  %v485_v25 = vsel %vm476_vm1, %v483_v61, %v484_v57  ;;  %v525_v45 = vrot.slane %v445_v1, 4  ;;  %v507_v36 = vsel %vm498_vm4, %v505_v42, %v506_v3  ;;  %v542_v42 = vld [vmem:[#allocation2] sm:$0xff] }
  0xe9   : > { %v474_v34 = vadd.f32 %v463_v28, %v446_v0  ;;  %v460_v37 = vsel %vm454_vm0, %v458_v32, %v459_v13  ;;  %957 = vrot.lane.b32.xlu1 %v953_v39, %s3753_s24  ;;  %v473_v43 = vadd.f32 %v459_v13, %v445_v1  ;;  %v482_v11 = vsel %vm476_vm1, %v480_v33, %v481_v21 }
  0xea   : > { %v472_v40 = vadd.f32 %v460_v37, %v4088_v19  ;;  %955 = vrot.lane.b32.xlu0 %v954_v62, %s3753_s24  ;;  %v504_v33 = vsel %vm498_vm4, %v502_v38, %v503_v44  ;;  %v536_v58 = vadd.f32 %v523_v53, %v514_v30  ;;  %v995_v62 = vsel %vm476_vm1, %v993_v20, %v994_v22 }
  0xeb   : > { %981 = vrot.lane.b32.xlu2 %v980_v10, %s3752_s18  ;;  %v496_v26 = vadd.f32 %v485_v25, %v474_v34  ;;  %v4162_v32 = vpop.permute.xlu1 %574  ;;  %v495_v49 = vadd.f32 %v481_v21, %v473_v43  ;;  %v537_v54 = vadd.f32 %v522_v12, %v515_v29  ;;  %v529_v55 = vsel %vm520_vm5, %v527_v35, %v528_v52 }
  0xec   : > { %v4164_v39 = vpop.permute.xlu0 %572  ;;  %v494_v47 = vadd.f32 %v482_v11, %v472_v40  ;;  %v526_v63 = vsel %vm520_vm5, %v524_v41, %v525_v45  ;;  %v541_v14 = vadd.f32 %v528_v52, %v519_v46  ;;  %v544_v4 = vand.u32 2147483647, %v536_v58  ;;  %v543_v40 = vld [vmem:[#allocation2 + $0x8] sm:$0xf] }
  0xed   : > { %v4167_v51 = vpop.permute.xlu2 %668  ;;  %v518_v57 = vadd.f32 %v507_v36, %v496_v26  ;;  %v517_v60 = vadd.f32 %v503_v44, %v495_v49  ;;  %v545_v9 = vand.u32 2147483647, %v537_v54  ;;  %v1009_v20 = vmul.f32 -0.012961364, %v3921_v16 }
  0xee   : > { %v516_v59 = vadd.f32 %v504_v33, %v494_v47  ;;  %v549_v41 = vand.u32 2147483647, %v541_v14  ;;  %v1008_v12 = vmul.f32 -0.012961364, %v3909_v7  ;;  %v1020_v13 = vmul.f32 0.07839755, %v3909_v7 }
  0xef   : > { %v540_v0 = vadd.f32 %v529_v55, %v518_v57  ;;  %v539_v3 = vadd.f32 %v525_v45, %v517_v60  ;;  %v1044_v21 = vmul.f32 -0.12590656, %v3921_v16  ;;  %v557_v24 = vsel %vm302_vm3, %v545_v9, 0.0 }
  0xf0   : > { %v538_v1 = vadd.f32 %v526_v63, %v516_v59  ;;  %v560_v37 = vsel %vm302_vm3, %v549_v41, 0.0  ;;  %v1021_v47 = vmul.f32 0.07839755, %v3921_v16  ;;  %v1059_v49 = vmul.f32 0.15139239, %v3921_v16 }
  0xf1   : > { %996 = vrot.lane.b32.xlu1 %v995_v62, %s3753_s24  ;;  %v547_v10 = vand.u32 2147483647, %v539_v3  ;;  %v548_v5 = vand.u32 2147483647, %v540_v0  ;;  %v1048_v35 = vrot.slane %v1044_v21, 1 }
  0xf2   : > { %v546_v38 = vand.u32 2147483647, %v538_v1  ;;  %983 = vrot.lane.b32.xlu0 %v979_v48, %s3752_s18  ;;  %v1043_v48 = vmul.f32 -0.12590656, %v3909_v7  ;;  %v1058_v52 = vmul.f32 0.15139239, %v3909_v7 }
  0xf3   : > { %998 = vrot.lane.b32.xlu2 %v994_v22, %s3753_s24  ;;  %v4184_v18 = vpop.permute.xlu1 %610  ;;  %v551_v22 = vsel %vm300_vm2, %v544_v4, 0.0  ;;  %v558_v28 = vsel %vm302_vm3, %v547_v10, 0.0  ;;  %v554_v29 = vsel %vm300_vm2, %v548_v5, 0.0  ;;  %v1084_v53 = vmul.f32 0.07813114, %v3909_v7 }
  0xf4   : > { %v4186_v19 = vpop.permute.xlu0 %586  ;;  %v552_v31 = vsel %vm300_vm2, %v546_v38, 0.0  ;;  %v559_v30 = vadd.f32 %v558_v28, %v557_v24  ;;  %v1047_v25 = vrot.slane %v1043_v48, 1  ;;  %v1085_v57 = vmul.f32 0.07813114, %v3921_v16 }
  0xf5   : > { %v4188_v61 = vpop.permute.xlu2 %694  ;;  %v553_v23 = vadd.f32 %v552_v31, %v551_v22  ;;  %v1063_v59 = vrot.slane %v1059_v49, 1  ;;  %v1062_v60 = vrot.slane %v1058_v52, 1  ;;  %v1088_v62 = vrot.slane %v1084_v53, 2 }
  0xf6   : > { %v561_v43 = vadd.f32 %v560_v37, %v559_v30  ;;  %v1049_v36 = vsel %vm454_vm0, %v1047_v25, %v1048_v35  ;;  %v1089_v54 = vrot.slane %v1085_v57, 2  ;;  %v1099_v0 = vmul.f32 0.026445562, %v3909_v7 }
  0xf7   : > { %v555_v34 = vadd.f32 %v554_v29, %v553_v23  ;;  %v1100_v1 = vmul.f32 0.026445562, %v3921_v16  ;;  %v1064_v4 = vsel %vm454_vm0, %v1062_v60, %v1063_v59  ;;  %v1119_v23 = vmul.f32 0.14580207, %v3923_v17 }
  0xf8   : > { %v563_v46 = vadd.f32 %v561_v43, %v543_v40  ;;  %v1090_v38 = vsel %vm476_vm1, %v1088_v62, %v1089_v54  ;;  %v1103_v41 = vrot.slane %v1099_v0, 2  ;;  %v1118_v24 = vmul.f32 0.14580207, %v3911_v8 }
  0xf9   : > { %1014 = vrot.lane.b32.xlu1 %v1009_v20, %s3752_s18  ;;  %v562_v44 = vadd.f32 %v555_v34, %v542_v42  ;;  %v1104_v5 = vrot.slane %v1100_v1, 2  ;;  %v1130_v28 = vmul.f32 0.19602583, %v3911_v8  ;;  %v1153_v42 = vmul.f32 0.13151038, %v3911_v8 }
  0xfa   : > { %1012 = vrot.lane.b32.xlu0 %v1008_v12, %s3752_s18  ;;  %565 = vst.msk [vmem:[#allocation2 + $0x8] sm:$0xf] %vm302_vm3, %v563_v46  ;;  %v1154_v29 = vmul.f32 0.13151038, %v3923_v17  ;;  %v1131_v43 = vmul.f32 0.19602583, %v3923_v17 }
  0xfb   : > { %1024 = vrot.lane.b32.xlu2 %v1020_v13, %s3753_s24  ;;  %v4204_v26 = vpop.permute.xlu1 %627  ;;  %564 = vst.msk [vmem:[#allocation2] sm:$0xff] %vm300_vm2, %v562_v44  ;;  %v1105_v31 = vsel %vm476_vm1, %v1103_v41, %v1104_v5  ;;  %v1157_v30 = vrot.slane %v1153_v42, 1  ;;  %v1169_v44 = vmul.f32 0.035738043, %v3923_v17  ;;  %v1168_v46 = vmul.f32 0.035738043, %v3911_v8 }
  0xfc   : > { %v4206_v11 = vpop.permute.xlu0 %625  ;;  %v1158_v34 = vrot.slane %v1154_v29, 1  ;;  %v1242_v42 = vmul.f32 0.04298637, %v3907_v6  ;;  %v1265_v29 = vmul.f32 -0.118411794, %v3907_v6 }
  0xfd   : > { %v4208_v45 = vpop.permute.xlu2 %722  ;;  %v1173_v53 = vrot.slane %v1169_v44, 1  ;;  %v1172_v57 = vrot.slane %v1168_v46, 1 }
  0xfe   : > { %v1159_v40 = vsel %vm454_vm0, %v1157_v30, %v1158_v34  ;;  %v1266_v30 = vmul.f32 -0.118411794, %v3919_v15 }
 0x101   : > { %1050 = vrot.lane.b32.xlu1 %v1049_v36, %s3752_s18  ;;  %v3255_v3 = vld [vmem:[#allocation2 + $0x8] sm:$0xf]  ;;  %v1194_v36 = vmul.f32 -0.00044541332, %v3911_v8 }
 0x102   : > { %1026 = vrot.lane.b32.xlu0 %v1021_v47, %s3753_s24  ;;  %v3254_v63 = vld [vmem:[#allocation2] sm:$0xff]  ;;  %v3257_v9 = vsel %vm302_vm3, %v3255_v3, 0.0  ;;  %v1195_v47 = vmul.f32 -0.00044541332, %v3923_v17 }
 0x103   : > { %1052 = vrot.lane.b32.xlu2 %v1048_v35, %s3752_s18  ;;  %v4221_v33 = vpop.permute.xlu1 %666  ;;  %v3256_v14 = vsel %vm300_vm2, %v3254_v63, 0.0  ;;  %v1210_v63 = vmul.f32 0.0656475, %v3923_v17 }
 0x104   : > { %v4223_v58 = vpop.permute.xlu0 %653  ;;  %v4233_v10 = vadd.f32 %v3257_v9, %v3256_v14  ;;  %v1199_v60 = vrot.slane %v1195_v47, 2  ;;  %v1174_v14 = vsel %vm454_vm0, %v1172_v57, %v1173_v53  ;;  %v1243_v47 = vmul.f32 0.04298637, %v3919_v15 }
 0x105   : > { %v4225_v55 = vpop.permute.xlu2 %761  ;;  %v1214_v3 = vrot.slane %v1210_v63, 2  ;;  %v1280_v57 = vmul.f32 -0.06617026, %v3907_v6 }
 0x106   : > { %5724 = vst [vmem:[#allocation22_spill] sm:$0xff] %v4233_v10  ;;  %v1391_v10 = vmul.f32 0.06333526, %v3921_v16 }
 0x109   : > { %1067 = vrot.lane.b32.xlu1 %v1063_v59, %s3753_s24  ;;  %v1198_v59 = vrot.slane %v1194_v36, 2 }
 0x10a   : > { %1065 = vrot.lane.b32.xlu0 %v1064_v4, %s3753_s24 }
 0x10b   : > { %1091 = vrot.lane.b32.xlu2 %v1090_v38, %s3752_s18  ;;  %v4238_v20 = vpop.permute.xlu1 %684  ;;  %v1200_v0 = vsel %vm476_vm1, %v1198_v59, %v1199_v60  ;;  %v1306_v59 = vmul.f32 -0.116980195, %v3907_v6 }
 0x10c   : > { %v4240_v12 = vpop.permute.xlu0 %682 }
 0x10d   : > { %v4242_v13 = vpop.permute.xlu2 %778 }
 0x111   : > { %1106 = vrot.lane.b32.xlu1 %v1105_v31, %s3753_s24 }
 0x112   : > { %1093 = vrot.lane.b32.xlu0 %v1089_v54, %s3752_s18  ;;  %v1209_v54 = vmul.f32 0.0656475, %v3911_v8 }
 0x113   : > { %1108 = vrot.lane.b32.xlu2 %v1104_v5, %s3753_s24  ;;  %v4248_v48 = vpop.permute.xlu1 %720 }
 0x114   : > { %v4250_v21 = vpop.permute.xlu0 %696  ;;  %v1213_v1 = vrot.slane %v1209_v54, 2 }
 0x115   : > { %v4252_v22 = vpop.permute.xlu2 %804 }
 0x116   : > { %5725 = vst [vmem:[#allocation23_spill] sm:$0xff] %v4252_v22  ;;  %v1215_v41 = vsel %vm476_vm1, %v1213_v1, %v1214_v3  ;;  %v1310_v1 = vrot.slane %v1306_v59, 2 }
 0x119   : > { %1124 = vrot.lane.b32.xlu1 %v1119_v23, %s3752_s18 }
 0x11a   : > { %1122 = vrot.lane.b32.xlu0 %v1118_v24, %s3752_s18  ;;  %v1231_v24 = vmul.f32 0.039512206, %v3919_v15 }
 0x11b   : > { %1134 = vrot.lane.b32.xlu2 %v1130_v28, %s3753_s24  ;;  %v4262_v37 = vpop.permute.xlu1 %737  ;;  %v1230_v28 = vmul.f32 0.039512206, %v3907_v6 }
 0x11c   : > { %v4264_v25 = vpop.permute.xlu0 %735 }
 0x11d   : > { %v4266_v35 = vpop.permute.xlu2 %832 }
 0x11e   : > { %5726 = vst [vmem:[#allocation24_spill] sm:$0xff] %v4266_v35  ;;  %v1541_v35 = vmul.f32 0.01885192, %v3911_v8 }
 0x121   : > { %1160 = vrot.lane.b32.xlu1 %v1159_v40, %s3752_s18  ;;  %v1270_v40 = vrot.slane %v1266_v30, 1 }
 0x122   : > { %1136 = vrot.lane.b32.xlu0 %v1131_v43, %s3753_s24 }
 0x123   : > { %1162 = vrot.lane.b32.xlu2 %v1158_v34, %s3752_s18  ;;  %v4277_v49 = vpop.permute.xlu1 %776  ;;  %v1269_v34 = vrot.slane %v1265_v29, 1 }
 0x124   : > { %v4279_v52 = vpop.permute.xlu0 %763 }
 0x125   : > { %v4281_v62 = vpop.permute.xlu2 %871  ;;  %v1271_v36 = vsel %vm454_vm0, %v1269_v34, %v1270_v40 }
 0x126   : > { %5727 = vst [vmem:[#allocation25_spill] sm:$0xff] %v4281_v62 }
 0x129   : > { %1177 = vrot.lane.b32.xlu1 %v1173_v53, %s3753_s24  ;;  %v1281_v53 = vmul.f32 -0.06617026, %v3919_v15 }
 0x12a   : > { %1175 = vrot.lane.b32.xlu0 %v1174_v14, %s3753_s24 }
 0x12b   : > { %1201 = vrot.lane.b32.xlu2 %v1200_v0, %s3752_s18  ;;  %v4290_v4 = vpop.permute.xlu1 %794  ;;  %v1285_v14 = vrot.slane %v1281_v53, 1  ;;  %v1284_v0 = vrot.slane %v1280_v57, 1 }
 0x12c   : > { %5728 = vst [vmem:[#allocation26_spill] sm:$0xff] %v4290_v4  ;;  %v4292_v38 = vpop.permute.xlu0 %792 }
 0x12d   : > { %v4294_v9 = vpop.permute.xlu2 %888 }
 0x12e   : > { %5729 = vst [vmem:[#allocation27_spill] sm:$0xff] %v4294_v9 }
 0x131   : > { %1216 = vrot.lane.b32.xlu1 %v1215_v41, %s3753_s24 }
 0x132   : > { %1203 = vrot.lane.b32.xlu0 %v1199_v60, %s3752_s18  ;;  %v1307_v60 = vmul.f32 -0.116980195, %v3919_v15 }
 0x133   : > { %1218 = vrot.lane.b32.xlu2 %v1214_v3, %s3753_s24  ;;  %v4300_v5 = vpop.permute.xlu1 %830 }
 0x134   : > { %5730 = vst [vmem:[#allocation28_spill] sm:$0xff] %v4300_v5  ;;  %v4302_v31 = vpop.permute.xlu0 %806  ;;  %v1311_v3 = vrot.slane %v1307_v60, 2  ;;  %v593_v5 = vmul.f32 0.010490011, %v3919_v15 }
 0x135   : > { %5731 = vst [vmem:[#allocation29_spill] sm:$0xff] %v4302_v31  ;;  %v4304_v23 = vpop.permute.xlu2 %914  ;;  %v1892_v31 = vmul.f32 -0.22501412, %v3907_v6 }
 0x136   : > { %v1312_v29 = vsel %vm476_vm1, %v1310_v1, %v1311_v3  ;;  %v1352_v1 = vmul.f32 -0.025857255, %v3909_v7 }
 0x139   : > { %1236 = vrot.lane.b32.xlu1 %v1231_v24, %s3752_s18  ;;  %v1321_v24 = vmul.f32 0.17393678, %v3907_v6 }
 0x13a   : > { %1234 = vrot.lane.b32.xlu0 %v1230_v28, %s3752_s18  ;;  %v1322_v28 = vmul.f32 0.17393678, %v3919_v15 }
 0x13b   : > { %1246 = vrot.lane.b32.xlu2 %v1242_v42, %s3753_s24  ;;  %v4314_v43 = vpop.permute.xlu1 %847  ;;  %v1286_v42 = vsel %vm454_vm0, %v1284_v0, %v1285_v14  ;;  %v1325_v30 = vrot.slane %v1321_v24, 2  ;;  %v1340_v0 = vmul.f32 0.032896962, %v3909_v7  ;;  %v1375_v24 = vmul.f32 0.1320361, %v3909_v7 }
 0x13c   : > { %5732 = vst [vmem:[#allocation30_spill] sm:$0xff] %v4314_v43  ;;  %v4316_v44 = vpop.permute.xlu0 %845  ;;  %v1326_v34 = vrot.slane %v1322_v28, 2  ;;  %v1376_v28 = vmul.f32 0.1320361, %v3921_v16  ;;  %v1432_v43 = vmul.f32 0.06836862, %v3921_v16 }
 0x13d   : > { %5733 = vst [vmem:[#allocation31_spill] sm:$0xff] %v4316_v44  ;;  %v4318_v46 = vpop.permute.xlu2 %942  ;;  %v1501_v44 = vmul.f32 0.093505, %v3923_v17 }
 0x13e   : > { %v1327_v53 = vsel %vm476_vm1, %v1325_v30, %v1326_v34 }
 0x141   : > { %1272 = vrot.lane.b32.xlu1 %v1271_v36, %s3752_s18 }
 0x142   : > { %1248 = vrot.lane.b32.xlu0 %v1243_v47, %s3753_s24 }
 0x143   : > { %1274 = vrot.lane.b32.xlu2 %v1270_v40, %s3752_s18  ;;  %v4329_v54 = vpop.permute.xlu1 %886 }
 0x144   : > { %5734 = vst [vmem:[#allocation32_spill] sm:$0xff] %v4329_v54  ;;  %v4331_v63 = vpop.permute.xlu0 %873 }
 0x145   : > { %5735 = vst [vmem:[#allocation33_spill] sm:$0xff] %v4331_v63  ;;  %v4333_v41 = vpop.permute.xlu2 %981 }
 0x146   : > { %5736 = vst [vmem:[#allocation34_spill] sm:$0xff] %v4333_v41 }
 0x149   : > { %1289 = vrot.lane.b32.xlu1 %v1285_v14, %s3753_s24  ;;  %v1341_v14 = vmul.f32 0.032896962, %v3921_v16 }
 0x14a   : > { %1287 = vrot.lane.b32.xlu0 %v1286_v42, %s3753_s24  ;;  %v1380_v42 = vrot.slane %v1376_v28, 1  ;;  %v1395_v28 = vrot.slane %v1391_v10, 1 }
 0x14b   : > { %1313 = vrot.lane.b32.xlu2 %v1312_v29, %s3752_s18  ;;  %v4342_v40 = vpop.permute.xlu1 %904 }
 0x14c   : > { %v4344_v36 = vpop.permute.xlu0 %902 }
 0x14d   : > { %v4346_v47 = vpop.permute.xlu2 %998 }
 0x14e   : > { %5737 = vst [vmem:[#allocation35_spill] sm:$0xff] %v4346_v47 }
 0x151   : > { %1328 = vrot.lane.b32.xlu1 %v1327_v53, %s3753_s24 }
 0x152   : > { %1315 = vrot.lane.b32.xlu0 %v1311_v3, %s3752_s18  ;;  %v1379_v3 = vrot.slane %v1375_v24, 1 }
 0x153   : > { %1330 = vrot.lane.b32.xlu2 %v1326_v34, %s3753_s24  ;;  %v4352_v57 = vpop.permute.xlu1 %940 }
 0x154   : > { %v4354_v59 = vpop.permute.xlu0 %916  ;;  %v1381_v53 = vsel %vm454_vm0, %v1379_v3, %v1380_v42 }
 0x155   : > { %v4356_v60 = vpop.permute.xlu2 %1024 }
 0x156   : > { %5738 = vst [vmem:[#allocation36_spill] sm:$0xff] %v4356_v60  ;;  %v1463_v60 = vmul.f32 0.18220113, %v3923_v17 }
 0x159   : > { %1346 = vrot.lane.b32.xlu1 %v1341_v14, %s3752_s18  ;;  %v1390_v14 = vmul.f32 0.06333526, %v3909_v7 }
 0x15a   : > { %1344 = vrot.lane.b32.xlu0 %v1340_v0, %s3752_s18  ;;  %v1416_v0 = vmul.f32 0.0052028974, %v3909_v7 }
 0x15b   : > { %1356 = vrot.lane.b32.xlu2 %v1352_v1, %s3753_s24  ;;  %v4366_v29 = vpop.permute.xlu1 %957  ;;  %v1417_v1 = vmul.f32 0.0052028974, %v3921_v16  ;;  %v1394_v3 = vrot.slane %v1390_v14, 1 }
 0x15c   : > { %v4368_v30 = vpop.permute.xlu0 %955  ;;  %v1420_v9 = vrot.slane %v1416_v0, 2 }
 0x15d   : > { %5739 = vst [vmem:[#allocation37_spill] sm:$0xff] %v4368_v30  ;;  %v4370_v34 = vpop.permute.xlu2 %1052  ;;  %v1421_v63 = vrot.slane %v1417_v1, 2 }
 0x15e   : > { %5740 = vst [vmem:[#allocation38_spill] sm:$0xff] %v4370_v34  ;;  %v1431_v34 = vmul.f32 0.06836862, %v3909_v7 }
 0x160   : > { %v1435_v10 = vrot.slane %v1431_v34, 2 }
 0x161   : > { %1382 = vrot.lane.b32.xlu1 %v1381_v53, %s3752_s18  ;;  %v1396_v53 = vsel %vm454_vm0, %v1394_v3, %v1395_v28  ;;  %v1450_v3 = vmul.f32 -0.061790705, %v3911_v8 }
 0x162   : > { %1358 = vrot.lane.b32.xlu0 %v1353_v50, %s3753_s24  ;;  %v1422_v50 = vsel %vm476_vm1, %v1420_v9, %v1421_v63 }
 0x163   : > { %1384 = vrot.lane.b32.xlu2 %v1380_v42, %s3752_s18  ;;  %v4381_v24 = vpop.permute.xlu1 %996  ;;  %v1436_v42 = vrot.slane %v1432_v43, 2  ;;  %v1451_v43 = vmul.f32 -0.061790705, %v3923_v17 }
 0x164   : > { %5741 = vst [vmem:[#allocation39_spill] sm:$0xff] %v4381_v24  ;;  %v4383_v54 = vpop.permute.xlu0 %983  ;;  %v597_v24 = vrot.slane %v593_v5, 1 }
 0x165   : > { %5742 = vst [vmem:[#allocation40_spill] sm:$0xff] %v4383_v54  ;;  %v4385_v62 = vpop.permute.xlu2 %1091 }
 0x166   : > { %5743 = vst [vmem:[#allocation41_spill] sm:$0xff] %v4385_v62  ;;  %v1437_v62 = vsel %vm476_vm1, %v1435_v10, %v1436_v42 }
 0x169   : > { %1399 = vrot.lane.b32.xlu1 %v1395_v28, %s3753_s24 }
 0x16a   : > { %1397 = vrot.lane.b32.xlu0 %v1396_v53, %s3753_s24  ;;  %v1462_v53 = vmul.f32 0.18220113, %v3911_v8 }
 0x16b   : > { %1423 = vrot.lane.b32.xlu2 %v1422_v50, %s3752_s18  ;;  %v4394_v14 = vpop.permute.xlu1 %1014  ;;  %v1485_v50 = vmul.f32 -0.0661528, %v3911_v8 }
 0x16c   : > { %5744 = vst [vmem:[#allocation42_spill] sm:$0xff] %v4394_v14  ;;  %v4396_v0 = vpop.permute.xlu0 %1012  ;;  %v566_v14 = vmul.f32 0.012573021, %v3907_v6 }
 0x16d   : > { %5745 = vst [vmem:[#allocation43_spill] sm:$0xff] %v4396_v0  ;;  %v4398_v1 = vpop.permute.xlu2 %1108  ;;  %v1542_v0 = vmul.f32 0.01885192, %v3923_v17 }
 0x16e   : > { %5746 = vst [vmem:[#allocation44_spill] sm:$0xff] %v4398_v1 }
 0x171   : > { %1438 = vrot.lane.b32.xlu1 %v1437_v62, %s3753_s24  ;;  %v1486_v62 = vmul.f32 -0.0661528, %v3923_v17 }
 0x172   : > { %1425 = vrot.lane.b32.xlu0 %v1421_v63, %s3752_s18  ;;  %v1489_v63 = vrot.slane %v1485_v50, 1 }
 0x173   : > { %1440 = vrot.lane.b32.xlu2 %v1436_v42, %s3753_s24  ;;  %v4404_v9 = vpop.permute.xlu1 %1050  ;;  %v1490_v10 = vrot.slane %v1486_v62, 1  ;;  %v1505_v62 = vrot.slane %v1501_v44, 1  ;;  %v1545_v44 = vrot.slane %v1541_v35, 2 }
 0x174   : > { %5747 = vst [vmem:[#allocation45_spill] sm:$0xff] %v4404_v9  ;;  %v4406_v28 = vpop.permute.xlu0 %1026 }
 0x175   : > { %5748 = vst [vmem:[#allocation46_spill] sm:$0xff] %v4406_v28  ;;  %v4408_v34 = vpop.permute.xlu2 %1134  ;;  %v1491_v9 = vsel %vm454_vm0, %v1489_v63, %v1490_v10 }
 0x176   : > { %5749 = vst [vmem:[#allocation47_spill] sm:$0xff] %v4408_v34 }
 0x179   : > { %1456 = vrot.lane.b32.xlu1 %v1451_v43, %s3752_s18  ;;  %v1500_v43 = vmul.f32 0.093505, %v3911_v8 }
 0x17a   : > { %1454 = vrot.lane.b32.xlu0 %v1450_v3, %s3752_s18  ;;  %v1526_v3 = vmul.f32 0.20023926, %v3911_v8 }
 0x17b   : > { %1466 = vrot.lane.b32.xlu2 %v1462_v53, %s3753_s24  ;;  %v4418_v42 = vpop.permute.xlu1 %1067  ;;  %v1527_v53 = vmul.f32 0.20023926, %v3923_v17  ;;  %v1504_v63 = vrot.slane %v1500_v43, 1 }
 0x17c   : > { %5750 = vst [vmem:[#allocation48_spill] sm:$0xff] %v4418_v42  ;;  %v4420_v34 = vpop.permute.xlu0 %1065 }
 0x17d   : > { %5751 = vst [vmem:[#allocation49_spill] sm:$0xff] %v4420_v34  ;;  %v4422_v1 = vpop.permute.xlu2 %1162  ;;  %v1531_v34 = vrot.slane %v1527_v53, 2 }
 0x17e   : > { %5752 = vst [vmem:[#allocation50_spill] sm:$0xff] %v4422_v1  ;;  %v1530_v1 = vrot.slane %v1526_v3, 2 }
 0x181   : > { %1492 = vrot.lane.b32.xlu1 %v1491_v9, %s3752_s18  ;;  %v1506_v9 = vsel %vm454_vm0, %v1504_v63, %v1505_v62  ;;  %v1562_v63 = vmul.f32 -0.03775635, %v3907_v6 }
 0x182   : > { %1468 = vrot.lane.b32.xlu0 %v1463_v60, %s3753_s24  ;;  %v1532_v60 = vsel %vm476_vm1, %v1530_v1, %v1531_v34 }
 0x183   : > { %1494 = vrot.lane.b32.xlu2 %v1490_v10, %s3752_s18  ;;  %v4433_v50 = vpop.permute.xlu1 %1106  ;;  %v1546_v10 = vrot.slane %v1542_v0, 2  ;;  %v1563_v0 = vmul.f32 -0.03775635, %v3919_v15 }
 0x184   : > { %5753 = vst [vmem:[#allocation51_spill] sm:$0xff] %v4433_v50  ;;  %v4435_v42 = vpop.permute.xlu0 %1093 }
 0x185   : > { %5754 = vst [vmem:[#allocation52_spill] sm:$0xff] %v4435_v42  ;;  %v4437_v28 = vpop.permute.xlu2 %1201 }
 0x186   : > { %5755 = vst [vmem:[#allocation53_spill] sm:$0xff] %v4437_v28  ;;  %v1547_v28 = vsel %vm476_vm1, %v1545_v44, %v1546_v10 }
 0x189   : > { %1509 = vrot.lane.b32.xlu1 %v1505_v62, %s3753_s24 }
 0x18a   : > { %1507 = vrot.lane.b32.xlu0 %v1506_v9, %s3753_s24  ;;  %v1574_v9 = vmul.f32 -0.10911461, %v3907_v6 }
 0x18b   : > { %1533 = vrot.lane.b32.xlu2 %v1532_v60, %s3752_s18  ;;  %v4446_v43 = vpop.permute.xlu1 %1124  ;;  %v1597_v60 = vmul.f32 0.06304115, %v3907_v6 }
 0x18c   : > { %5756 = vst [vmem:[#allocation54_spill] sm:$0xff] %v4446_v43  ;;  %v4448_v3 = vpop.permute.xlu0 %1122  ;;  %v1575_v43 = vmul.f32 -0.10911461, %v3919_v15 }
 0x18d   : > { %5757 = vst [vmem:[#allocation55_spill] sm:$0xff] %v4448_v3  ;;  %v4450_v53 = vpop.permute.xlu2 %1218  ;;  %v1613_v3 = vmul.f32 0.05811658, %v3919_v15 }
 0x18e   : > { %5758 = vst [vmem:[#allocation56_spill] sm:$0xff] %v4450_v53 }
 0x191   : > { %1548 = vrot.lane.b32.xlu1 %v1547_v28, %s3753_s24  ;;  %v1598_v28 = vmul.f32 0.06304115, %v3919_v15 }
 0x192   : > { %1535 = vrot.lane.b32.xlu0 %v1531_v34, %s3752_s18  ;;  %v1601_v34 = vrot.slane %v1597_v60, 1 }
 0x193   : > { %1550 = vrot.lane.b32.xlu2 %v1546_v10, %s3753_s24  ;;  %v4456_v1 = vpop.permute.xlu1 %1160  ;;  %v1602_v44 = vrot.slane %v1598_v28, 1  ;;  %v1617_v28 = vrot.slane %v1613_v3, 1 }
 0x194   : > { %5759 = vst [vmem:[#allocation57_spill] sm:$0xff] %v4456_v1  ;;  %v4458_v62 = vpop.permute.xlu0 %1136 }
 0x195   : > { %5760 = vst [vmem:[#allocation58_spill] sm:$0xff] %v4458_v62  ;;  %v4460_v35 = vpop.permute.xlu2 %1246  ;;  %v1603_v62 = vsel %vm454_vm0, %v1601_v34, %v1602_v44 }
 0x196   : > { %5761 = vst [vmem:[#allocation59_spill] sm:$0xff] %v4460_v35  ;;  %v1654_v35 = vmul.f32 0.16891074, %v3919_v15 }
 0x199   : > { %1568 = vrot.lane.b32.xlu1 %v1563_v0, %s3752_s18  ;;  %v1612_v0 = vmul.f32 0.05811658, %v3907_v6 }
 0x19a   : > { %1566 = vrot.lane.b32.xlu0 %v1562_v63, %s3752_s18  ;;  %v1638_v63 = vmul.f32 -0.075460576, %v3907_v6 }
 0x19b   : > { %1578 = vrot.lane.b32.xlu2 %v1574_v9, %s3753_s24  ;;  %v4470_v10 = vpop.permute.xlu1 %1177  ;;  %v1639_v9 = vmul.f32 -0.075460576, %v3919_v15  ;;  %v1616_v34 = vrot.slane %v1612_v0, 1 }
 0x19c   : > { %5762 = vst [vmem:[#allocation60_spill] sm:$0xff] %v4470_v10  ;;  %v4472_v53 = vpop.permute.xlu0 %1175 }
 0x19d   : > { %5763 = vst [vmem:[#allocation61_spill] sm:$0xff] %v4472_v53  ;;  %v4474_v1 = vpop.permute.xlu2 %1274  ;;  %v1642_v53 = vrot.slane %v1638_v63, 2  ;;  %v1643_v10 = vrot.slane %v1639_v9, 2 }
 0x19e   : > { %5764 = vst [vmem:[#allocation62_spill] sm:$0xff] %v4474_v1  ;;  %v1653_v1 = vmul.f32 0.16891074, %v3907_v6 }
 0x1a0   : > { %v1657_v3 = vrot.slane %v1653_v1, 2 }
 0x1a1   : > { %1604 = vrot.lane.b32.xlu1 %v1603_v62, %s3752_s18  ;;  %v1618_v62 = vsel %vm454_vm0, %v1616_v34, %v1617_v28  ;;  %v1672_v34 = vmul.f32 0.15744083, %v3909_v7 }
 0x1a2   : > { %1580 = vrot.lane.b32.xlu0 %v1575_v43, %s3753_s24  ;;  %v1644_v43 = vsel %vm476_vm1, %v1642_v53, %v1643_v10 }
 0x1a3   : > { %1606 = vrot.lane.b32.xlu2 %v1602_v44, %s3752_s18  ;;  %v4485_v60 = vpop.permute.xlu1 %1216  ;;  %v1658_v44 = vrot.slane %v1654_v35, 2  ;;  %v1673_v35 = vmul.f32 0.15744083, %v3921_v16 }
 0x1a4   : > { %5765 = vst [vmem:[#allocation63_spill] sm:$0xff] %v4485_v60  ;;  %v4487_v50 = vpop.permute.xlu0 %1203 }
 0x1a5   : > { %5766 = vst [vmem:[#allocation64_spill] sm:$0xff] %v4487_v50  ;;  %v4489_v42 = vpop.permute.xlu2 %1313  ;;  %v1659_v60 = vsel %vm476_vm1, %v1657_v3, %v1658_v44 }
 0x1a6   : > { %5767 = vst [vmem:[#allocation65_spill] sm:$0xff] %v4489_v42  ;;  %v1685_v42 = vmul.f32 -0.043278586, %v3921_v16 }
 0x1a9   : > { %1621 = vrot.lane.b32.xlu1 %v1617_v28, %s3753_s24 }
 0x1aa   : > { %1619 = vrot.lane.b32.xlu0 %v1618_v62, %s3753_s24  ;;  %v1684_v62 = vmul.f32 -0.043278586, %v3909_v7 }
 0x1ab   : > { %1645 = vrot.lane.b32.xlu2 %v1644_v43, %s3752_s18  ;;  %v4498_v0 = vpop.permute.xlu1 %1236  ;;  %v1707_v43 = vmul.f32 0.024978539, %v3909_v7 }
 0x1ac   : > { %5768 = vst [vmem:[#allocation66_spill] sm:$0xff] %v4498_v0  ;;  %v4500_v63 = vpop.permute.xlu0 %1234  ;;  %v1764_v0 = vmul.f32 -0.13412197, %v3921_v16 }
 0x1ad   : > { %5769 = vst [vmem:[#allocation67_spill] sm:$0xff] %v4500_v63  ;;  %v4502_v9 = vpop.permute.xlu2 %1330  ;;  %v1763_v63 = vmul.f32 -0.13412197, %v3909_v7 }
 0x1ae   : > { %5770 = vst [vmem:[#allocation68_spill] sm:$0xff] %v4502_v9 }
 0x1b1   : > { %1660 = vrot.lane.b32.xlu1 %v1659_v60, %s3753_s24  ;;  %v1708_v60 = vmul.f32 0.024978539, %v3921_v16 }
 0x1b2   : > { %1647 = vrot.lane.b32.xlu0 %v1643_v10, %s3752_s18  ;;  %v1711_v10 = vrot.slane %v1707_v43, 1 }
 0x1b3   : > { %1662 = vrot.lane.b32.xlu2 %v1658_v44, %s3753_s24  ;;  %v4508_v53 = vpop.permute.xlu1 %1272  ;;  %v1712_v3 = vrot.slane %v1708_v60, 1 }
 0x1b4   : > { %5771 = vst [vmem:[#allocation69_spill] sm:$0xff] %v4508_v53  ;;  %v4510_v28 = vpop.permute.xlu0 %1248  ;;  %v1723_v53 = vmul.f32 0.103145316, %v3921_v16 }
 0x1b5   : > { %5772 = vst [vmem:[#allocation70_spill] sm:$0xff] %v4510_v28  ;;  %v4512_v1 = vpop.permute.xlu2 %1356  ;;  %v1713_v9 = vsel %vm454_vm0, %v1711_v10, %v1712_v3 }
 0x1b6   : > { %5773 = vst [vmem:[#allocation71_spill] sm:$0xff] %v4512_v1  ;;  %v1727_v60 = vrot.slane %v1723_v53, 1  ;;  %v1767_v53 = vrot.slane %v1763_v63, 2 }
 0x1b9   : > { %1678 = vrot.lane.b32.xlu1 %v1673_v35, %s3752_s18  ;;  %v1722_v35 = vmul.f32 0.103145316, %v3909_v7 }
 0x1ba   : > { %1676 = vrot.lane.b32.xlu0 %v1672_v34, %s3752_s18  ;;  %v1748_v34 = vmul.f32 -0.058552887, %v3909_v7 }
 0x1bb   : > { %1688 = vrot.lane.b32.xlu2 %v1684_v62, %s3753_s24  ;;  %v4522_v44 = vpop.permute.xlu1 %1289  ;;  %v1749_v62 = vmul.f32 -0.058552887, %v3921_v16  ;;  %v1726_v10 = vrot.slane %v1722_v35, 1 }
 0x1bc   : > { %5774 = vst [vmem:[#allocation72_spill] sm:$0xff] %v4522_v44  ;;  %v4524_v50 = vpop.permute.xlu0 %1287 }
 0x1bd   : > { %5775 = vst [vmem:[#allocation73_spill] sm:$0xff] %v4524_v50  ;;  %v4526_v1 = vpop.permute.xlu2 %1384  ;;  %v1753_v50 = vrot.slane %v1749_v62, 2 }
 0x1be   : > { %5776 = vst [vmem:[#allocation74_spill] sm:$0xff] %v4526_v1  ;;  %v1752_v1 = vrot.slane %v1748_v34, 2 }
 0x1c1   : > { %1714 = vrot.lane.b32.xlu1 %v1713_v9, %s3752_s18  ;;  %v1728_v9 = vsel %vm454_vm0, %v1726_v10, %v1727_v60  ;;  %v1782_v10 = vmul.f32 0.05026829, %v3911_v8 }
 0x1c2   : > { %1690 = vrot.lane.b32.xlu0 %v1685_v42, %s3753_s24  ;;  %v1754_v42 = vsel %vm476_vm1, %v1752_v1, %v1753_v50 }
 0x1c3   : > { %1716 = vrot.lane.b32.xlu2 %v1712_v3, %s3752_s18  ;;  %v4537_v43 = vpop.permute.xlu1 %1328  ;;  %v1768_v3 = vrot.slane %v1764_v0, 2  ;;  %v1783_v0 = vmul.f32 0.05026829, %v3923_v17 }
 0x1c4   : > { %5777 = vst [vmem:[#allocation75_spill] sm:$0xff] %v4537_v43  ;;  %v4539_v44 = vpop.permute.xlu0 %1315  ;;  %v1873_v43 = vmul.f32 0.06210179, %v3911_v8 }
 0x1c5   : > { %5778 = vst [vmem:[#allocation76_spill] sm:$0xff] %v4539_v44  ;;  %v4541_v28 = vpop.permute.xlu2 %1423  ;;  %v1874_v44 = vmul.f32 0.06210179, %v3923_v17 }
 0x1c6   : > { %5779 = vst [vmem:[#allocation77_spill] sm:$0xff] %v4541_v28  ;;  %v1769_v28 = vsel %vm476_vm1, %v1767_v53, %v1768_v3 }
 0x1c9   : > { %1731 = vrot.lane.b32.xlu1 %v1727_v60, %s3753_s24 }
 0x1ca   : > { %1729 = vrot.lane.b32.xlu0 %v1728_v9, %s3753_s24  ;;  %v1794_v9 = vmul.f32 0.0989713, %v3911_v8 }
 0x1cb   : > { %1755 = vrot.lane.b32.xlu2 %v1754_v42, %s3752_s18  ;;  %v4550_v35 = vpop.permute.xlu1 %1346  ;;  %v1817_v42 = vmul.f32 -0.10743649, %v3911_v8 }
 0x1cc   : > { %5780 = vst [vmem:[#allocation78_spill] sm:$0xff] %v4550_v35  ;;  %v4552_v34 = vpop.permute.xlu0 %1344  ;;  %v1833_v35 = vmul.f32 0.08730422, %v3923_v17 }
 0x1cd   : > { %5781 = vst [vmem:[#allocation79_spill] sm:$0xff] %v4552_v34  ;;  %v4554_v62 = vpop.permute.xlu2 %1440 }
 0x1ce   : > { %5782 = vst [vmem:[#allocation80_spill] sm:$0xff] %v4554_v62 }
 0x1d1   : > { %1770 = vrot.lane.b32.xlu1 %v1769_v28, %s3753_s24  ;;  %v1818_v28 = vmul.f32 -0.10743649, %v3923_v17 }
 0x1d2   : > { %1757 = vrot.lane.b32.xlu0 %v1753_v50, %s3752_s18  ;;  %v1821_v50 = vrot.slane %v1817_v42, 1 }
 0x1d3   : > { %1772 = vrot.lane.b32.xlu2 %v1768_v3, %s3753_s24  ;;  %v4560_v1 = vpop.permute.xlu1 %1382  ;;  %v1822_v53 = vrot.slane %v1818_v28, 1  ;;  %v1837_v28 = vrot.slane %v1833_v35, 1  ;;  %v1877_v35 = vrot.slane %v1873_v43, 2 }
 0x1d4   : > { %5783 = vst [vmem:[#allocation81_spill] sm:$0xff] %v4560_v1  ;;  %v4562_v60 = vpop.permute.xlu0 %1358 }
 0x1d5   : > { %5784 = vst [vmem:[#allocation82_spill] sm:$0xff] %v4562_v60  ;;  %v4564_v63 = vpop.permute.xlu2 %1466  ;;  %v1823_v1 = vsel %vm454_vm0, %v1821_v50, %v1822_v53  ;;  %v1795_v60 = vmul.f32 0.0989713, %v3923_v17 }
 0x1d6   : > { %5785 = vst [vmem:[#allocation83_spill] sm:$0xff] %v4564_v63 }
 0x1d9   : > { %1788 = vrot.lane.b32.xlu1 %v1783_v0, %s3752_s18  ;;  %v1832_v0 = vmul.f32 0.08730422, %v3911_v8 }
 0x1da   : > { %1786 = vrot.lane.b32.xlu0 %v1782_v10, %s3752_s18  ;;  %v1858_v10 = vmul.f32 -0.07130681, %v3911_v8 }
 0x1db   : > { %1798 = vrot.lane.b32.xlu2 %v1794_v9, %s3753_s24  ;;  %v4574_v3 = vpop.permute.xlu1 %1399  ;;  %v1859_v9 = vmul.f32 -0.07130681, %v3923_v17  ;;  %v1836_v50 = vrot.slane %v1832_v0, 1 }
 0x1dc   : > { %5786 = vst [vmem:[#allocation84_spill] sm:$0xff] %v4574_v3  ;;  %v4576_v63 = vpop.permute.xlu0 %1397 }
 0x1dd   : > { %5787 = vst [vmem:[#allocation85_spill] sm:$0xff] %v4576_v63  ;;  %v4578_v62 = vpop.permute.xlu2 %1494  ;;  %v1863_v3 = vrot.slane %v1859_v9, 2 }
 0x1de   : > { %5788 = vst [vmem:[#allocation86_spill] sm:$0xff] %v4578_v62  ;;  %v1862_v62 = vrot.slane %v1858_v10, 2 }
 0x1e1   : > { %1824 = vrot.lane.b32.xlu1 %v1823_v1, %s3752_s18  ;;  %v1838_v1 = vsel %vm454_vm0, %v1836_v50, %v1837_v28  ;;  %v1894_v50 = vmul.f32 0.03863696, %v3907_v6 }
 0x1e2   : > { %1800 = vrot.lane.b32.xlu0 %v1795_v60, %s3753_s24  ;;  %v1864_v60 = vsel %vm476_vm1, %v1862_v62, %v1863_v3 }
 0x1e3   : > { %1826 = vrot.lane.b32.xlu2 %v1822_v53, %s3752_s18  ;;  %v4589_v42 = vpop.permute.xlu1 %1438  ;;  %v1878_v53 = vrot.slane %v1874_v44, 2  ;;  %v1895_v44 = vmul.f32 0.03863696, %v3919_v15 }
 0x1e4   : > { %5789 = vst [vmem:[#allocation87_spill] sm:$0xff] %v4589_v42  ;;  %v4591_v63 = vpop.permute.xlu0 %1425 }
 0x1e5   : > { %5790 = vst [vmem:[#allocation88_spill] sm:$0xff] %v4591_v63  ;;  %v4593_v34 = vpop.permute.xlu2 %1533 }
 0x1e6   : > { %5791 = vst [vmem:[#allocation89_spill] sm:$0xff] %v4593_v34  ;;  %v1879_v34 = vsel %vm476_vm1, %v1877_v35, %v1878_v53 }
 0x1e9   : > { %1841 = vrot.lane.b32.xlu1 %v1837_v28, %s3753_s24 }
 0x1ea   : > { %1839 = vrot.lane.b32.xlu0 %v1838_v1, %s3753_s24  ;;  %v1906_v1 = vmul.f32 -0.058164086, %v3907_v6 }
 0x1eb   : > { %1865 = vrot.lane.b32.xlu2 %v1864_v60, %s3752_s18  ;;  %v4602_v0 = vpop.permute.xlu1 %1456  ;;  %v1929_v60 = vmul.f32 -0.0075701526, %v3907_v6 }
 0x1ec   : > { %5792 = vst [vmem:[#allocation90_spill] sm:$0xff] %v4602_v0  ;;  %v4604_v10 = vpop.permute.xlu0 %1454  ;;  %v1907_v0 = vmul.f32 -0.058164086, %v3919_v15 }
 0x1ed   : > { %5793 = vst [vmem:[#allocation91_spill] sm:$0xff] %v4604_v10  ;;  %v4606_v9 = vpop.permute.xlu2 %1550  ;;  %v1945_v10 = vmul.f32 0.02021144, %v3919_v15 }
 0x1ee   : > { %5794 = vst [vmem:[#allocation92_spill] sm:$0xff] %v4606_v9 }
 0x1f1   : > { %1880 = vrot.lane.b32.xlu1 %v1879_v34, %s3753_s24  ;;  %v1930_v34 = vmul.f32 -0.0075701526, %v3919_v15 }
 0x1f2   : > { %1867 = vrot.lane.b32.xlu0 %v1863_v3, %s3752_s18  ;;  %v1933_v3 = vrot.slane %v1929_v60, 1 }
 0x1f3   : > { %1882 = vrot.lane.b32.xlu2 %v1878_v53, %s3753_s24  ;;  %v4612_v62 = vpop.permute.xlu1 %1492  ;;  %v1934_v35 = vrot.slane %v1930_v34, 1  ;;  %v1949_v34 = vrot.slane %v1945_v10, 1 }
 0x1f4   : > { %5795 = vst [vmem:[#allocation93_spill] sm:$0xff] %v4612_v62  ;;  %v4614_v28 = vpop.permute.xlu0 %1468 }
 0x1f5   : > { %5796 = vst [vmem:[#allocation94_spill] sm:$0xff] %v4614_v28  ;;  %v4616_v43 = vpop.permute.xlu2 %1578  ;;  %v1935_v28 = vsel %vm454_vm0, %v1933_v3, %v1934_v35 }
 0x1f6   : > { %5797 = vst [vmem:[#allocation95_spill] sm:$0xff] %v4616_v43  ;;  %v1986_v43 = vmul.f32 0.1420982, %v3919_v15 }
 0x1f9   : > { %1900 = vrot.lane.b32.xlu1 %v1895_v44, %s3752_s18  ;;  %v1944_v44 = vmul.f32 0.02021144, %v3907_v6 }
 0x1fa   : > { %1898 = vrot.lane.b32.xlu0 %v1894_v50, %s3752_s18  ;;  %v1970_v50 = vmul.f32 -0.07583698, %v3907_v6 }
 0x1fb   : > { %1910 = vrot.lane.b32.xlu2 %v1906_v1, %s3753_s24  ;;  %v4626_v53 = vpop.permute.xlu1 %1509  ;;  %v1971_v1 = vmul.f32 -0.07583698, %v3919_v15  ;;  %v1948_v3 = vrot.slane %v1944_v44, 1 }
 0x1fc   : > { %5798 = vst [vmem:[#allocation96_spill] sm:$0xff] %v4626_v53  ;;  %v4628_v9 = vpop.permute.xlu0 %1507  ;;  %v1974_v53 = vrot.slane %v1970_v50, 2 }
 0x1fd   : > { %5799 = vst [vmem:[#allocation97_spill] sm:$0xff] %v4628_v9  ;;  %v4630_v62 = vpop.permute.xlu2 %1606  ;;  %v1975_v9 = vrot.slane %v1971_v1, 2 }
 0x1fe   : > { %5800 = vst [vmem:[#allocation98_spill] sm:$0xff] %v4630_v62  ;;  %v1985_v62 = vmul.f32 0.1420982, %v3907_v6 }
 0x200   : > { %v1989_v10 = vrot.slane %v1985_v62, 2 }
 0x201   : > { %1936 = vrot.lane.b32.xlu1 %v1935_v28, %s3752_s18  ;;  %v1950_v28 = vsel %vm454_vm0, %v1948_v3, %v1949_v34  ;;  %v2004_v3 = vmul.f32 0.084373266, %v3909_v7 }
 0x202   : > { %1912 = vrot.lane.b32.xlu0 %v1907_v0, %s3753_s24  ;;  %v1976_v0 = vsel %vm476_vm1, %v1974_v53, %v1975_v9 }
 0x203   : > { %1938 = vrot.lane.b32.xlu2 %v1934_v35, %s3752_s18  ;;  %v4641_v60 = vpop.permute.xlu1 %1548  ;;  %v1990_v35 = vrot.slane %v1986_v43, 2  ;;  %v2005_v43 = vmul.f32 0.084373266, %v3921_v16 }
 0x204   : > { %5801 = vst [vmem:[#allocation99_spill] sm:$0xff] %v4641_v60  ;;  %v4643_v42 = vpop.permute.xlu0 %1535 }
 0x205   : > { %5802 = vst [vmem:[#allocation100_spill] sm:$0xff] %v4643_v42  ;;  %v4645_v63 = vpop.permute.xlu2 %1645  ;;  %v1991_v60 = vsel %vm476_vm1, %v1989_v10, %v1990_v35 }
 0x206   : > { %5803 = vst [vmem:[#allocation101_spill] sm:$0xff] %v4645_v63  ;;  %v2017_v63 = vmul.f32 0.11648639, %v3921_v16 }
 0x209   : > { %1953 = vrot.lane.b32.xlu1 %v1949_v34, %s3753_s24 }
 0x20a   : > { %1951 = vrot.lane.b32.xlu0 %v1950_v28, %s3753_s24  ;;  %v2016_v28 = vmul.f32 0.11648639, %v3909_v7 }
 0x20b   : > { %1977 = vrot.lane.b32.xlu2 %v1976_v0, %s3752_s18  ;;  %v4654_v44 = vpop.permute.xlu1 %1568  ;;  %v2039_v0 = vmul.f32 0.084407866, %v3909_v7 }
 0x20c   : > { %5804 = vst [vmem:[#allocation102_spill] sm:$0xff] %v4654_v44  ;;  %v4656_v50 = vpop.permute.xlu0 %1566  ;;  %v2095_v44 = vmul.f32 -0.07695147, %v3909_v7 }
 0x20d   : > { %5805 = vst [vmem:[#allocation103_spill] sm:$0xff] %v4656_v50  ;;  %v4658_v1 = vpop.permute.xlu2 %1662  ;;  %v2096_v50 = vmul.f32 -0.07695147, %v3921_v16 }
 0x20e   : > { %5806 = vst [vmem:[#allocation104_spill] sm:$0xff] %v4658_v1 }
 0x211   : > { %1992 = vrot.lane.b32.xlu1 %v1991_v60, %s3753_s24  ;;  %v2040_v60 = vmul.f32 0.084407866, %v3921_v16 }
 0x212   : > { %1979 = vrot.lane.b32.xlu0 %v1975_v9, %s3752_s18  ;;  %v2043_v9 = vrot.slane %v2039_v0, 1 }
 0x213   : > { %1994 = vrot.lane.b32.xlu2 %v1990_v35, %s3753_s24  ;;  %v4664_v53 = vpop.permute.xlu1 %1604  ;;  %v2044_v10 = vrot.slane %v2040_v60, 1 }
 0x214   : > { %5807 = vst [vmem:[#allocation105_spill] sm:$0xff] %v4664_v53  ;;  %v4666_v34 = vpop.permute.xlu0 %1580  ;;  %v2055_v53 = vmul.f32 0.0075593614, %v3921_v16 }
 0x215   : > { %5808 = vst [vmem:[#allocation106_spill] sm:$0xff] %v4666_v34  ;;  %v4668_v62 = vpop.permute.xlu2 %1688  ;;  %v2045_v1 = vsel %vm454_vm0, %v2043_v9, %v2044_v10 }
 0x216   : > { %5809 = vst [vmem:[#allocation107_spill] sm:$0xff] %v4668_v62  ;;  %v2059_v60 = vrot.slane %v2055_v53, 1  ;;  %v2099_v53 = vrot.slane %v2095_v44, 2 }
 0x219   : > { %2010 = vrot.lane.b32.xlu1 %v2005_v43, %s3752_s18  ;;  %v2054_v43 = vmul.f32 0.0075593614, %v3909_v7 }
 0x21a   : > { %2008 = vrot.lane.b32.xlu0 %v2004_v3, %s3752_s18  ;;  %v2080_v3 = vmul.f32 -0.01350451, %v3909_v7 }
 0x21b   : > { %2020 = vrot.lane.b32.xlu2 %v2016_v28, %s3753_s24  ;;  %v4678_v35 = vpop.permute.xlu1 %1621  ;;  %v2081_v28 = vmul.f32 -0.01350451, %v3921_v16  ;;  %v2058_v9 = vrot.slane %v2054_v43, 1 }
 0x21c   : > { %5810 = vst [vmem:[#allocation108_spill] sm:$0xff] %v4678_v35  ;;  %v4680_v42 = vpop.permute.xlu0 %1619 }
 0x21d   : > { %5811 = vst [vmem:[#allocation109_spill] sm:$0xff] %v4680_v42  ;;  %v4682_v62 = vpop.permute.xlu2 %1716  ;;  %v2085_v35 = vrot.slane %v2081_v28, 2 }
 0x21e   : > { %5812 = vst [vmem:[#allocation110_spill] sm:$0xff] %v4682_v62  ;;  %v2084_v62 = vrot.slane %v2080_v3, 2 }
 0x221   : > { %2046 = vrot.lane.b32.xlu1 %v2045_v1, %s3752_s18  ;;  %v2060_v1 = vsel %vm454_vm0, %v2058_v9, %v2059_v60  ;;  %v2114_v9 = vmul.f32 0.02584528, %v3911_v8 }
 0x222   : > { %2022 = vrot.lane.b32.xlu0 %v2017_v63, %s3753_s24  ;;  %v2086_v63 = vsel %vm476_vm1, %v2084_v62, %v2085_v35 }
 0x223   : > { %2048 = vrot.lane.b32.xlu2 %v2044_v10, %s3752_s18  ;;  %v4693_v0 = vpop.permute.xlu1 %1660  ;;  %v2100_v10 = vrot.slane %v2096_v50, 2  ;;  %v2115_v50 = vmul.f32 0.02584528, %v3923_v17 }
 0x224   : > { %5813 = vst [vmem:[#allocation111_spill] sm:$0xff] %v4693_v0  ;;  %v4695_v42 = vpop.permute.xlu0 %1647  ;;  %v2205_v0 = vmul.f32 -0.0013914669, %v3911_v8 }
 0x225   : > { %5814 = vst [vmem:[#allocation112_spill] sm:$0xff] %v4695_v42  ;;  %v4697_v34 = vpop.permute.xlu2 %1755  ;;  %v2206_v42 = vmul.f32 -0.0013914669, %v3923_v17 }
 0x226   : > { %5815 = vst [vmem:[#allocation113_spill] sm:$0xff] %v4697_v34  ;;  %v2101_v34 = vsel %vm476_vm1, %v2099_v53, %v2100_v10 }
 0x229   : > { %2063 = vrot.lane.b32.xlu1 %v2059_v60, %s3753_s24 }
 0x22a   : > { %2061 = vrot.lane.b32.xlu0 %v2060_v1, %s3753_s24  ;;  %v2126_v1 = vmul.f32 -0.056854945, %v3911_v8 }
 0x22b   : > { %2087 = vrot.lane.b32.xlu2 %v2086_v63, %s3752_s18  ;;  %v4706_v43 = vpop.permute.xlu1 %1678  ;;  %v2149_v63 = vmul.f32 -0.104300104, %v3911_v8 }
 0x22c   : > { %5816 = vst [vmem:[#allocation114_spill] sm:$0xff] %v4706_v43  ;;  %v4708_v3 = vpop.permute.xlu0 %1676  ;;  %v2165_v43 = vmul.f32 0.02684171, %v3923_v17 }
 0x22d   : > { %5817 = vst [vmem:[#allocation115_spill] sm:$0xff] %v4708_v3  ;;  %v4710_v28 = vpop.permute.xlu2 %1772 }
 0x22e   : > { %5818 = vst [vmem:[#allocation116_spill] sm:$0xff] %v4710_v28 }
 0x231   : > { %2102 = vrot.lane.b32.xlu1 %v2101_v34, %s3753_s24  ;;  %v2150_v34 = vmul.f32 -0.104300104, %v3923_v17 }
 0x232   : > { %2089 = vrot.lane.b32.xlu0 %v2085_v35, %s3752_s18  ;;  %v2153_v35 = vrot.slane %v2149_v63, 1 }
 0x233   : > { %2104 = vrot.lane.b32.xlu2 %v2100_v10, %s3753_s24  ;;  %v4716_v62 = vpop.permute.xlu1 %1714  ;;  %v2154_v53 = vrot.slane %v2150_v34, 1  ;;  %v2169_v34 = vrot.slane %v2165_v43, 1  ;;  %v2209_v43 = vrot.slane %v2205_v0, 2 }
 0x234   : > { %5819 = vst [vmem:[#allocation117_spill] sm:$0xff] %v4716_v62  ;;  %v4718_v60 = vpop.permute.xlu0 %1690 }
 0x235   : > { %5820 = vst [vmem:[#allocation118_spill] sm:$0xff] %v4718_v60  ;;  %v4720_v44 = vpop.permute.xlu2 %1798  ;;  %v2155_v62 = vsel %vm454_vm0, %v2153_v35, %v2154_v53  ;;  %v2127_v60 = vmul.f32 -0.056854945, %v3923_v17 }
 0x236   : > { %5821 = vst [vmem:[#allocation119_spill] sm:$0xff] %v4720_v44 }
 0x239   : > { %2120 = vrot.lane.b32.xlu1 %v2115_v50, %s3752_s18  ;;  %v2164_v50 = vmul.f32 0.02684171, %v3911_v8 }
 0x23a   : > { %2118 = vrot.lane.b32.xlu0 %v2114_v9, %s3752_s18  ;;  %v2190_v9 = vmul.f32 0.13224575, %v3911_v8 }
 0x23b   : > { %2130 = vrot.lane.b32.xlu2 %v2126_v1, %s3753_s24  ;;  %v4730_v10 = vpop.permute.xlu1 %1731  ;;  %v2191_v1 = vmul.f32 0.13224575, %v3923_v17  ;;  %v2168_v35 = vrot.slane %v2164_v50, 1 }
 0x23c   : > { %5822 = vst [vmem:[#allocation120_spill] sm:$0xff] %v4730_v10  ;;  %v4732_v44 = vpop.permute.xlu0 %1729 }
 0x23d   : > { %5823 = vst [vmem:[#allocation121_spill] sm:$0xff] %v4732_v44  ;;  %v4734_v28 = vpop.permute.xlu2 %1826  ;;  %v2195_v10 = vrot.slane %v2191_v1, 2 }
 0x23e   : > { %5824 = vst [vmem:[#allocation122_spill] sm:$0xff] %v4734_v28  ;;  %v2194_v28 = vrot.slane %v2190_v9, 2 }
 0x241   : > { %2156 = vrot.lane.b32.xlu1 %v2155_v62, %s3752_s18  ;;  %v2170_v62 = vsel %vm454_vm0, %v2168_v35, %v2169_v34  ;;  %v2226_v35 = vmul.f32 0.14022648, %v3907_v6 }
 0x242   : > { %2132 = vrot.lane.b32.xlu0 %v2127_v60, %s3753_s24  ;;  %v2196_v60 = vsel %vm476_vm1, %v2194_v28, %v2195_v10 }
 0x243   : > { %2158 = vrot.lane.b32.xlu2 %v2154_v53, %s3752_s18  ;;  %v4745_v63 = vpop.permute.xlu1 %1770  ;;  %v2210_v53 = vrot.slane %v2206_v42, 2  ;;  %v2227_v42 = vmul.f32 0.14022648, %v3919_v15 }
 0x244   : > { %5825 = vst [vmem:[#allocation123_spill] sm:$0xff] %v4745_v63  ;;  %v4747_v44 = vpop.permute.xlu0 %1757 }
 0x245   : > { %5826 = vst [vmem:[#allocation124_spill] sm:$0xff] %v4747_v44  ;;  %v4749_v3 = vpop.permute.xlu2 %1865 }
 0x246   : > { %5827 = vst [vmem:[#allocation125_spill] sm:$0xff] %v4749_v3  ;;  %v2211_v3 = vsel %vm476_vm1, %v2209_v43, %v2210_v53 }
 0x249   : > { %2173 = vrot.lane.b32.xlu1 %v2169_v34, %s3753_s24 }
 0x24a   : > { %2171 = vrot.lane.b32.xlu0 %v2170_v62, %s3753_s24  ;;  %v2238_v62 = vmul.f32 0.11501657, %v3907_v6 }
 0x24b   : > { %2197 = vrot.lane.b32.xlu2 %v2196_v60, %s3752_s18  ;;  %v4758_v50 = vpop.permute.xlu1 %1788  ;;  %v2261_v60 = vmul.f32 0.122868374, %v3907_v6 }
 0x24c   : > { %5828 = vst [vmem:[#allocation126_spill] sm:$0xff] %v4758_v50  ;;  %v4760_v9 = vpop.permute.xlu0 %1786  ;;  %v2239_v50 = vmul.f32 0.11501657, %v3919_v15 }
 0x24d   : > { %5829 = vst [vmem:[#allocation127_spill] sm:$0xff] %v4760_v9  ;;  %v4762_v1 = vpop.permute.xlu2 %1882  ;;  %v2277_v9 = vmul.f32 0.033962, %v3919_v15 }
 0x24e   : > { %5830 = vst [vmem:[#allocation128_spill] sm:$0xff] %v4762_v1 }
 0x251   : > { %2212 = vrot.lane.b32.xlu1 %v2211_v3, %s3753_s24  ;;  %v2262_v3 = vmul.f32 0.122868374, %v3919_v15 }
 0x252   : > { %2199 = vrot.lane.b32.xlu0 %v2195_v10, %s3752_s18  ;;  %v2265_v10 = vrot.slane %v2261_v60, 1 }
 0x253   : > { %2214 = vrot.lane.b32.xlu2 %v2210_v53, %s3753_s24  ;;  %v4768_v28 = vpop.permute.xlu1 %1824  ;;  %v2266_v43 = vrot.slane %v2262_v3, 1  ;;  %v2281_v3 = vrot.slane %v2277_v9, 1 }
 0x254   : > { %5831 = vst [vmem:[#allocation129_spill] sm:$0xff] %v4768_v28  ;;  %v4770_v34 = vpop.permute.xlu0 %1800 }
 0x255   : > { %5832 = vst [vmem:[#allocation130_spill] sm:$0xff] %v4770_v34  ;;  %v4772_v0 = vpop.permute.xlu2 %1910  ;;  %v2267_v34 = vsel %vm454_vm0, %v2265_v10, %v2266_v43 }
 0x259   : > { %2232 = vrot.lane.b32.xlu1 %v2227_v42, %s3752_s18  ;;  %v2276_v42 = vmul.f32 0.033962, %v3907_v6 }
 0x25a   : > { %2230 = vrot.lane.b32.xlu0 %v2226_v35, %s3752_s18  ;;  %v2302_v35 = vmul.f32 0.03712274, %v3907_v6 }
 0x25b   : > { %2242 = vrot.lane.b32.xlu2 %v2238_v62, %s3753_s24  ;;  %v4782_v53 = vpop.permute.xlu1 %1841  ;;  %v2303_v62 = vmul.f32 0.03712274, %v3919_v15  ;;  %v2280_v10 = vrot.slane %v2276_v42, 1 }
 0x25c   : > { %5833 = vst [vmem:[#allocation131_spill] sm:$0xff] %v4782_v53  ;;  %v4784_v1 = vpop.permute.xlu0 %1839  ;;  %v2306_v53 = vrot.slane %v2302_v35, 2  ;;  %v1918_v35 = vmul.f32 0.0109279705, %v3907_v6 }
 0x25d   : > { %5834 = vst [vmem:[#allocation132_spill] sm:$0xff] %v4784_v1  ;;  %v4786_v28 = vpop.permute.xlu2 %1938  ;;  %v2307_v1 = vrot.slane %v2303_v62, 2  ;;  %v2282_v9 = vsel %vm454_vm0, %v2280_v10, %v2281_v3  ;;  %v1919_v62 = vmul.f32 0.0109279705, %v3919_v15 }
 0x25e   : > { %v1922_v54 = vrot.slane %v1918_v35, 1 }
 0x25f   : > { %v2308_v42 = vsel %vm476_vm1, %v2306_v53, %v2307_v1  ;;  %v1923_v22 = vrot.slane %v1919_v62, 1 }
 0x261   : > { %2268 = vrot.lane.b32.xlu1 %v2267_v34, %s3752_s18  ;;  %v592_v34 = vmul.f32 0.010490011, %v3907_v6 }
 0x262   : > { %2244 = vrot.lane.b32.xlu0 %v2239_v50, %s3753_s24  ;;  %v567_v50 = vmul.f32 0.012573021, %v3919_v15 }
 0x263   : > { %2270 = vrot.lane.b32.xlu2 %v2266_v43, %s3752_s18  ;;  %v4797_v60 = vpop.permute.xlu1 %1880  ;;  %v2317_v43 = vmul.f32 0.038275715, %v3907_v6  ;;  %v596_v41 = vrot.slane %v592_v34, 1  ;;  %v633_v34 = vmul.f32 0.1304, %v3907_v6 }
 0x264   : > { %5835 = vst [vmem:[#allocation133_spill] sm:$0xff] %v4797_v60  ;;  %v4799_v63 = vpop.permute.xlu0 %1867  ;;  %v2318_v60 = vmul.f32 0.038275715, %v3919_v15  ;;  %v579_v47 = vadd.f32 %v4162_v32, %v567_v50  ;;  %v634_v50 = vmul.f32 0.1304, %v3919_v15 }
 0x265   : > { %5836 = vst [vmem:[#allocation134_spill] sm:$0xff] %v4799_v63  ;;  %v4801_v44 = vpop.permute.xlu2 %1977  ;;  %v578_v63 = vadd.f32 %v4164_v39, %v566_v14  ;;  %v2321_v10 = vrot.slane %v2317_v43, 2  ;;  %v598_v32 = vsel %vm454_vm0, %v596_v41, %v597_v24 }
 0x266   : > { %v2322_v53 = vrot.slane %v2318_v60, 2  ;;  %v591_v30 = vadd.f32 %v4186_v19, %v579_v47  ;;  %v1893_v60 = vmul.f32 -0.22501412, %v3919_v15  ;;  %v1924_v19 = vsel %vm454_vm0, %v1922_v54, %v1923_v22 }
 0x267   : > { %v590_v14 = vadd.f32 %v4066_v56, %v578_v63  ;;  %v637_v56 = vrot.slane %v633_v34, 2 }
 0x268   : > { %v2323_v43 = vsel %vm476_vm1, %v2321_v10, %v2322_v53  ;;  %v602_v47 = vadd.f32 %v597_v24, %v591_v30  ;;  %v1959_v30 = vmul.f32 0.0694172, %v3907_v6  ;;  %v1960_v24 = vmul.f32 0.0694172, %v3919_v15 }
 0x269   : > { %2285 = vrot.lane.b32.xlu1 %v2281_v3, %s3753_s24 }
 0x26a   : > { %2283 = vrot.lane.b32.xlu0 %v2282_v9, %s3753_s24  ;;  %v617_v10 = vadd.f32 %v4103_v27, %v602_v47  ;;  %v2371_v27 = vmul.f32 -0.08037319, %v3909_v7 }
 0x26b   : > { %2309 = vrot.lane.b32.xlu2 %v2308_v42, %s3752_s18  ;;  %v1901_v4 = vpop.permute.xlu1 %1900  ;;  %v601_v42 = vadd.f32 %v598_v32, %v590_v14  ;;  %v2372_v32 = vmul.f32 -0.08037319, %v3921_v16 }
 0x26c   : > { %v1899_v39 = vpop.permute.xlu0 %1898  ;;  %v1905_v35 = vadd.f32 %v1901_v4, %v1893_v60  ;;  %v2348_v4 = vmul.f32 -0.19016354, %v3909_v7  ;;  %v632_v34 = vadd.f32 %v4204_v26, %v617_v10  ;;  %v1964_v60 = vrot.slane %v1960_v24, 2 }
 0x26d   : > { %v4820_v5 = vpop.permute.xlu2 %1994  ;;  %v1904_v3 = vadd.f32 %v1899_v39, %v1892_v31  ;;  %v638_v31 = vrot.slane %v634_v50, 2  ;;  %v616_v63 = vadd.f32 %v4184_v18, %v601_v42  ;;  %v2376_v47 = vrot.slane %v2372_v32, 1 }
 0x26e   : > { %v2386_v24 = vmul.f32 0.108016334, %v3909_v7 }
 0x26f   : > { %v1916_v9 = vadd.f32 %v4772_v0, %v1904_v3  ;;  %v631_v14 = vadd.f32 %v4206_v11, %v616_v63  ;;  %v2337_v3 = vmul.f32 -0.03589133, %v3921_v16  ;;  %v639_v18 = vsel %vm476_vm1, %v637_v56, %v638_v31 }
 0x270   : > { %v643_v42 = vadd.f32 %v638_v31, %v632_v34  ;;  %v2387_v31 = vmul.f32 0.108016334, %v3921_v16 }
 0x271   : > { %2324 = vrot.lane.b32.xlu1 %v2323_v43, %s3753_s24  ;;  %v1927_v41 = vadd.f32 %v1924_v19, %v1916_v9  ;;  %v1963_v43 = vrot.slane %v1959_v30, 2  ;;  %v642_v9 = vadd.f32 %v639_v18, %v631_v14  ;;  %v2375_v19 = vrot.slane %v2371_v27, 1 }
 0x272   : > { %2311 = vrot.lane.b32.xlu0 %v2307_v1, %s3752_s18  ;;  %v2349_v30 = vmul.f32 -0.19016354, %v3921_v16  ;;  %v675_v18 = vmul.f32 -0.12654215, %v3921_v16  ;;  %v2390_v27 = vrot.slane %v2386_v24, 1 }
 0x273   : > { %2326 = vrot.lane.b32.xlu2 %v2322_v53, %s3753_s24  ;;  %v1937_v62 = vpop.permute.xlu1 %1936  ;;  %v2336_v53 = vmul.f32 -0.03589133, %v3909_v7  ;;  %v1965_v63 = vsel %vm476_vm1, %v1963_v43, %v1964_v60  ;;  %v743_v24 = vmul.f32 -0.07322674, %v3909_v7 }
 0x274   : > { %v1942_v0 = vadd.f32 %v1937_v62, %v1927_v41  ;;  %v1913_v39 = vpop.permute.xlu0 %1912  ;;  %v658_v62 = vadd.f32 %v4223_v58, %v643_v42  ;;  %v702_v58 = vmul.f32 -0.23250309, %v3909_v7 }
 0x275   : > { %v4835_v54 = vpop.permute.xlu2 %2020  ;;  %v1917_v1 = vadd.f32 %v1913_v39, %v1905_v35  ;;  %v657_v35 = vadd.f32 %v4142_v2, %v642_v9  ;;  %v2377_v39 = vsel %vm454_vm0, %v2375_v19, %v2376_v47  ;;  %v4864_v2 = vmul.f32 0.008347536, %v3921_v16 }
 0x277   : > { %v1928_v50 = vadd.f32 %v1923_v22, %v1917_v1  ;;  %v672_v14 = vadd.f32 %v4221_v33, %v657_v35  ;;  %v2391_v33 = vrot.slane %v2387_v31, 1  ;;  %v2417_v9 = vrot.slane %v4864_v2, 2 }
 0x279   : > { %2342 = vrot.lane.b32.xlu1 %v2337_v3, %s3752_s18  ;;  %v1943_v11 = vadd.f32 %v4786_v28, %v1928_v50  ;;  %v674_v28 = vmul.f32 -0.12654215, %v3909_v7  ;;  %v2412_v3 = vmul.f32 0.008347536, %v3909_v7  ;;  %v2392_v35 = vsel %vm454_vm0, %v2390_v27, %v2391_v33 }
 0x27a   : > { %2340 = vrot.lane.b32.xlu0 %v2336_v53, %s3752_s18  ;;  %v673_v53 = vadd.f32 %v4167_v51, %v658_v62  ;;  %v2000_v62 = vmul.f32 0.07260938, %v3909_v7 }
 0x27b   : > { %2352 = vrot.lane.b32.xlu2 %v2348_v4, %s3753_s24  ;;  %v1954_v56 = vpop.permute.xlu1 %1953  ;;  %v676_v32 = vadd.f32 %v674_v28, %v672_v14  ;;  %v2416_v43 = vrot.slane %v2412_v3, 2  ;;  %v4891_v14 = vmul.f32 -0.07322674, %v3921_v16 }
 0x27c   : > { %v1958_v41 = vadd.f32 %v1954_v56, %v1943_v11  ;;  %v1952_v26 = vpop.permute.xlu0 %1951  ;;  %v706_v11 = vrot.slane %v702_v58, 1 }
 0x27d   : > { %v4852_v22 = vpop.permute.xlu2 %2048  ;;  %v1957_v10 = vadd.f32 %v1952_v26, %v1942_v0  ;;  %v703_v0 = vmul.f32 -0.23250309, %v3921_v16 }
 0x27e   : > { %v1969_v50 = vadd.f32 %v1964_v60, %v1958_v41  ;;  %v2427_v60 = vmul.f32 -0.0849606, %v3909_v7  ;;  %v2428_v41 = vmul.f32 -0.0849606, %v3921_v16 }
 0x27f   : > { %v1968_v1 = vadd.f32 %v1965_v63, %v1957_v10  ;;  %v707_v51 = vrot.slane %v703_v0, 1  ;;  %v677_v63 = vadd.f32 %v675_v18, %v673_v53  ;;  %v2418_v10 = vsel %vm476_vm1, %v2416_v43, %v2417_v9 }
 0x280   : > { %v2431_v3 = vrot.slane %v2427_v60, 2  ;;  %v2432_v2 = vrot.slane %v2428_v41, 2 }
 0x281   : > { %2378 = vrot.lane.b32.xlu1 %v2377_v39, %s3752_s18  ;;  %v1983_v4 = vadd.f32 %v4801_v44, %v1968_v1  ;;  %v688_v44 = vadd.f32 %v4240_v12, %v676_v32  ;;  %v2028_v39 = vmul.f32 0.07875883, %v3909_v7  ;;  %v689_v12 = vadd.f32 %v4238_v20, %v677_v63 }
 0x282   : > { %2354 = vrot.lane.b32.xlu0 %v2349_v30, %s3753_s24  ;;  %v2029_v30 = vmul.f32 0.07875883, %v3921_v16  ;;  %v708_v31 = vsel %vm454_vm0, %v706_v11, %v707_v51  ;;  %v748_v11 = vrot.slane %v4891_v14, 2  ;;  %v897_v63 = vmul.f32 -0.09217254, %v3919_v15 }
 0x283   : > { %2380 = vrot.lane.b32.xlu2 %v2376_v47, %s3752_s18  ;;  %v1993_v34 = vpop.permute.xlu1 %1992  ;;  %v2001_v47 = vmul.f32 0.07260938, %v3921_v16  ;;  %v700_v1 = vadd.f32 %v4188_v61, %v688_v44  ;;  %v701_v20 = vadd.f32 %v4250_v21, %v689_v12  ;;  %v2032_v53 = vrot.slane %v2028_v39, 1 }
 0x284   : > { %v1998_v19 = vadd.f32 %v1993_v34, %v1983_v4  ;;  %v1980_v42 = vpop.permute.xlu0 %1979  ;;  %v2033_v18 = vrot.slane %v2029_v30, 1  ;;  %v747_v61 = vrot.slane %v743_v24, 2  ;;  %v2447_v39 = vmul.f32 -0.0011533062, %v3923_v17 }
 0x285   : > { %v4875_v56 = vpop.permute.xlu2 %2087  ;;  %v1984_v26 = vadd.f32 %v1980_v42, %v1969_v50  ;;  %v711_v34 = vadd.f32 %v708_v31, %v700_v1  ;;  %v2433_v50 = vsel %vm476_vm1, %v2431_v3, %v2432_v2  ;;  %v712_v43 = vadd.f32 %v707_v51, %v701_v20 }
 0x286   : > { %v2002_v0 = vadd.f32 %v2000_v62, %v1998_v19  ;;  %v2034_v21 = vsel %vm454_vm0, %v2032_v53, %v2033_v18  ;;  %v923_v62 = vmul.f32 -0.10096182, %v3919_v15  ;;  %v2446_v30 = vmul.f32 -0.0011533062, %v3911_v8 }
 0x287   : > { %v1999_v28 = vadd.f32 %v4820_v5, %v1984_v26  ;;  %v726_v19 = vadd.f32 %v4248_v48, %v711_v34  ;;  %v727_v51 = vadd.f32 %v4208_v45, %v712_v43  ;;  %v909_v45 = vadd.f32 %v4342_v40, %v897_v63 }
 0x288   : > { %v2458_v31 = vmul.f32 -0.14853752, %v3911_v8  ;;  %v2481_v24 = vmul.f32 -0.010607226, %v3911_v8  ;;  %v2482_v14 = vmul.f32 -0.010607226, %v3923_v17 }
 0x289   : > { %2395 = vrot.lane.b32.xlu1 %v2391_v33, %s3753_s24  ;;  %v2003_v5 = vadd.f32 %v2001_v47, %v1999_v28  ;;  %v741_v44 = vadd.f32 %v4264_v25, %v726_v19  ;;  %v749_v47 = vsel %vm476_vm1, %v747_v61, %v748_v11  ;;  %v2069_v25 = vmul.f32 -0.1426774, %v3909_v7 }
 0x28a   : > { %2393 = vrot.lane.b32.xlu0 %v2392_v35, %s3753_s24  ;;  %v922_v35 = vmul.f32 -0.10096182, %v3907_v6  ;;  %v742_v1 = vadd.f32 %v4262_v37, %v727_v51  ;;  %v927_v53 = vrot.slane %v923_v62, 1  ;;  %v4936_v37 = vmul.f32 0.041163053, %v3923_v17 }
 0x28b   : > { %2419 = vrot.lane.b32.xlu2 %v2418_v10, %s3752_s18  ;;  %v2011_v58 = vpop.permute.xlu1 %2010  ;;  %v752_v12 = vadd.f32 %v749_v47, %v741_v44  ;;  %v2073_v40 = vrot.slane %v2069_v25, 2  ;;  %v4944_v34 = vmul.f32 0.13664635, %v3923_v17  ;;  %v963_v63 = vmul.f32 0.054084558, %v3907_v6 }
 0x28c   : > { %v2015_v4 = vadd.f32 %v2011_v58, %v2003_v5  ;;  %v2009_v27 = vpop.permute.xlu0 %2008  ;;  %v921_v5 = vadd.f32 %v4354_v59, %v909_v45  ;;  %v784_v58 = vmul.f32 0.041163053, %v3911_v8  ;;  %v2486_v59 = vrot.slane %v2482_v14, 1 }
 0x28d   : > { %v4898_v32 = vpop.permute.xlu2 %2104  ;;  %v2014_v33 = vadd.f32 %v2009_v27, %v2002_v0  ;;  %v926_v0 = vrot.slane %v922_v35, 1  ;;  %v767_v27 = vadd.f32 %v4225_v55, %v752_v12  ;;  %v964_v44 = vmul.f32 0.054084558, %v3919_v15 }
 0x28e   : > { %v932_v61 = vadd.f32 %v927_v53, %v921_v5  ;;  %v2459_v47 = vmul.f32 -0.14853752, %v3923_v17  ;;  %v4961_v62 = vmul.f32 0.051305212, %v3923_v17  ;;  %v817_v25 = vrot.slane %v4944_v34, 1 }
 0x28f   : > { %v2026_v42 = vadd.f32 %v4835_v54, %v2014_v33  ;;  %v896_v54 = vmul.f32 -0.09217254, %v3907_v6  ;;  %v4941_v33 = vmul.f32 0.13664635, %v3911_v8  ;;  %v782_v55 = vadd.f32 %v4277_v49, %v767_v27 }
 0x290   : > { %v2497_v49 = vmul.f32 -0.11857199, %v3923_v17  ;;  %v2527_v5 = vrot.slane %v4961_v62, 2  ;;  %v2179_v34 = vmul.f32 0.035867196, %v3911_v8 }
 0x291   : > { %2434 = vrot.lane.b32.xlu1 %v2433_v50, %s3753_s24  ;;  %v2037_v26 = vadd.f32 %v2034_v21, %v2026_v42 }
 0x292   : > { %2421 = vrot.lane.b32.xlu0 %v2417_v9, %s3752_s18  ;;  %v4919_v9 = vmul.f32 -0.1426774, %v3921_v16 }
 0x293   : > { %2436 = vrot.lane.b32.xlu2 %v2432_v2, %s3753_s24  ;;  %v2047_v48 = vpop.permute.xlu1 %2046  ;;  %v908_v2 = vadd.f32 %v4344_v36, %v896_v54  ;;  %v2485_v36 = vrot.slane %v2481_v24, 1  ;;  %v947_v54 = vadd.f32 %v4318_v46, %v932_v61  ;;  %v853_v24 = vmul.f32 0.090347014, %v3911_v8 }
 0x294   : > { %v2052_v60 = vadd.f32 %v2047_v48, %v2037_v26  ;;  %v2023_v41 = vpop.permute.xlu0 %2022  ;;  %v2074_v20 = vrot.slane %v4919_v9, 2  ;;  %v2522_v48 = vmul.f32 0.051305212, %v3911_v8  ;;  %v2138_v61 = vmul.f32 -0.10298045, %v3911_v8 }
 0x295   : > { %v4915_v28 = vpop.permute.xlu2 %2130  ;;  %v2027_v10 = vadd.f32 %v2023_v41, %v2015_v4  ;;  %v920_v50 = vadd.f32 %v4304_v23, %v908_v2  ;;  %v2487_v51 = vsel %vm454_vm0, %v2485_v36, %v2486_v59  ;;  %v2496_v23 = vmul.f32 -0.11857199, %v3911_v8  ;;  %v5837_v2 = vld [vmem:[#allocation37_spill] sm:$0xff] }
 0x296   : > { %v2075_v42 = vsel %vm476_vm1, %v2073_v40, %v2074_v20  ;;  %v962_v45 = vadd.f32 %v4366_v29, %v947_v54  ;;  %v2526_v29 = vrot.slane %v2522_v48, 2  ;;  %v2110_v36 = vmul.f32 -0.14227419, %v3911_v8  ;;  %v5840_v48 = vld [vmem:[#allocation26_spill] sm:$0xff] }
 0x297   : > { %v2038_v3 = vadd.f32 %v2033_v18, %v2027_v10  ;;  %v753_v18 = vadd.f32 %v748_v11, %v742_v1  ;;  %v928_v11 = vsel %vm454_vm0, %v926_v0, %v927_v53  ;;  %v967_v10 = vrot.slane %v963_v63, 2 }
 0x298   : > { %v931_v9 = vadd.f32 %v928_v11, %v920_v50  ;;  %v5839_v11 = vld [vmem:[#allocation40_spill] sm:$0xff]  ;;  %v2142_v54 = vrot.slane %v2138_v61, 1 }
 0x299   : > { %2452 = vrot.lane.b32.xlu1 %v2447_v39, %s3752_s18  ;;  %v2053_v4 = vadd.f32 %v4852_v22, %v2038_v3  ;;  %v768_v41 = vadd.f32 %v4279_v52, %v753_v18  ;;  %v968_v39 = vrot.slane %v964_v44, 2  ;;  %v2501_v52 = vrot.slane %v2497_v49, 1 }
 0x29a   : > { %2450 = vrot.lane.b32.xlu0 %v2446_v30, %s3752_s18  ;;  %v786_v30 = vadd.f32 %v784_v58, %v782_v55  ;;  %v946_v12 = vadd.f32 %v4352_v57, %v931_v9  ;;  %v4992_v55 = vmul.f32 0.090347014, %v3923_v17 }
 0x29b   : > { %2462 = vrot.lane.b32.xlu2 %v2458_v31, %s3753_s24  ;;  %v2064_v22 = vpop.permute.xlu1 %2063  ;;  %v2500_v31 = vrot.slane %v2496_v23, 1  ;;  %v783_v3 = vadd.f32 %v4242_v13, %v768_v41  ;;  %v969_v53 = vsel %vm476_vm1, %v967_v10, %v968_v39  ;;  %v2537_v13 = vmul.f32 -0.029758403, %v3911_v8 }
 0x29c   : > { %v2068_v43 = vadd.f32 %v2064_v22, %v2053_v4  ;;  %v2062_v21 = vpop.permute.xlu0 %2061  ;;  %v961_v40 = vadd.f32 %v5837_v2, %v946_v12  ;;  %v973_v4 = vadd.f32 %v968_v39, %v962_v45  ;;  %v4989_v22 = vmul.f32 -0.10298045, %v3923_v17 }
 0x29d   : > { %v4949_v19 = vpop.permute.xlu2 %2158  ;;  %v2067_v26 = vadd.f32 %v2062_v21, %v2052_v60  ;;  %v816_v60 = vrot.slane %v4941_v33, 1  ;;  %v2528_v33 = vsel %vm476_vm1, %v2526_v29, %v2527_v5  ;;  %v858_v41 = vrot.slane %v4992_v55, 2  ;;  %v5902_v55 = vld [vmem:[#allocation117_spill] sm:$0xff] }
 0x29e   : > { %v2079_v1 = vadd.f32 %v2074_v20, %v2068_v43  ;;  %v2502_v20 = vsel %vm454_vm0, %v2500_v31, %v2501_v52  ;;  %v972_v50 = vadd.f32 %v969_v53, %v961_v40  ;;  %v5838_v43 = vld [vmem:[#allocation23_spill] sm:$0xff]  ;;  %v988_v63 = vadd.f32 %v5839_v11, %v973_v4  ;;  %v5843_v31 = vld [vmem:[#allocation29_spill] sm:$0xff] }
 0x29f   : > { %v2078_v35 = vadd.f32 %v2075_v42, %v2067_v26  ;;  %v818_v21 = vsel %vm454_vm0, %v816_v60, %v817_v25  ;;  %v2541_v26 = vrot.slane %v2537_v13, 2  ;;  %v5841_v60 = vld [vmem:[#allocation34_spill] sm:$0xff]  ;;  %v1005_v12 = vmul.f32 -0.06538286, %v3921_v16 }
 0x2a0   : > { %v987_v9 = vadd.f32 %v5841_v60, %v972_v50  ;;  %v1004_v29 = vmul.f32 -0.06538286, %v3909_v7  ;;  %v1033_v2 = vmul.f32 0.14934312, %v3921_v16 }
 0x2a1   : > { %2488 = vrot.lane.b32.xlu1 %v2487_v51, %s3752_s18  ;;  %v2093_v46 = vadd.f32 %v4875_v56, %v2078_v35  ;;  %v798_v56 = vadd.f32 %v4292_v38, %v786_v30  ;;  %v2538_v38 = vmul.f32 -0.029758403, %v3923_v17  ;;  %v2143_v35 = vrot.slane %v4989_v22, 1  ;;  %v5847_v22 = vld [vmem:[#allocation43_spill] sm:$0xff] }
 0x2a2   : > { %2464 = vrot.lane.b32.xlu0 %v2459_v47, %s3753_s24  ;;  %v857_v47 = vrot.slane %v853_v24, 2 }
 0x2a3   : > { %2490 = vrot.lane.b32.xlu2 %v2486_v59, %s3752_s18  ;;  %v2103_v14 = vpop.permute.xlu1 %2102  ;;  %v2111_v59 = vmul.f32 -0.14227419, %v3923_v17  ;;  %v810_v42 = vadd.f32 %v5838_v43, %v798_v56  ;;  %v2542_v51 = vrot.slane %v2538_v38, 2  ;;  %v1032_v56 = vmul.f32 0.14934312, %v3909_v7 }
 0x2a4   : > { %v2108_v57 = vadd.f32 %v2103_v14, %v2093_v46  ;;  %v2090_v58 = vpop.permute.xlu0 %2089  ;;  %v5842_v46 = vld [vmem:[#allocation35_spill] sm:$0xff]  ;;  %v859_v4 = vsel %vm476_vm1, %v857_v47, %v858_v41  ;;  %v2593_v47 = vmul.f32 0.008661927, %v3907_v6 }
 0x2a5   : > { %v4977_v0 = vpop.permute.xlu2 %2197  ;;  %v2094_v27 = vadd.f32 %v2090_v58, %v2079_v1  ;;  %v821_v39 = vadd.f32 %v818_v21, %v810_v42  ;;  %v1003_v30 = vadd.f32 %v5842_v46, %v988_v63  ;;  %v5844_v14 = vld [vmem:[#allocation39_spill] sm:$0xff]  ;;  %v5845_v58 = vld [vmem:[#allocation28_spill] sm:$0xff]  ;;  %v1036_v38 = vrot.slane %v1032_v56, 1 }
 0x2a6   : > { %v2112_v23 = vadd.f32 %v2110_v36, %v2108_v57  ;;  %v1002_v1 = vadd.f32 %v5844_v14, %v987_v9  ;;  %v2144_v57 = vsel %vm454_vm0, %v2142_v54, %v2143_v35  ;;  %v2559_v63 = vmul.f32 -0.023615463, %v3919_v15  ;;  %v5850_v46 = vld [vmem:[#allocation31_spill] sm:$0xff] }
 0x2a7   : > { %v2109_v18 = vadd.f32 %v4898_v32, %v2094_v27  ;;  %v787_v32 = vadd.f32 %v4936_v37, %v783_v3  ;;  %v2543_v3 = vsel %vm476_vm1, %v2541_v26, %v2542_v51  ;;  %v836_v53 = vadd.f32 %v5845_v58, %v821_v39  ;;  %v5854_v58 = vld [vmem:[#allocation70_spill] sm:$0xff] }
 0x2a8   : > { %v1007_v27 = vadd.f32 %v1005_v12, %v1003_v30  ;;  %v1254_v9 = vmul.f32 0.06960427, %v3907_v6  ;;  %v5851_v12 = vld [vmem:[#allocation36_spill] sm:$0xff] }
 0x2a9   : > { %2505 = vrot.lane.b32.xlu1 %v2501_v52, %s3753_s24  ;;  %v2113_v44 = vadd.f32 %v2111_v59, %v2109_v18  ;;  %v799_v62 = vadd.f32 %v5840_v48, %v787_v32  ;;  %v1037_v18 = vrot.slane %v1033_v2, 1  ;;  %v2558_v32 = vmul.f32 -0.023615463, %v3907_v6 }
 0x2aa   : > { %2503 = vrot.lane.b32.xlu0 %v2502_v20, %s3753_s24  ;;  %v1006_v20 = vadd.f32 %v1004_v29, %v1002_v1  ;;  %v5046_v48 = vmul.f32 0.13458754, %v3921_v16  ;;  %v851_v30 = vadd.f32 %v5850_v46, %v836_v53  ;;  %v2597_v29 = vrot.slane %v2593_v47, 1 }
 0x2ab   : > { %2529 = vrot.lane.b32.xlu2 %v2528_v33, %s3752_s18  ;;  %v2121_v49 = vpop.permute.xlu1 %2120  ;;  %v811_v24 = vadd.f32 %v5843_v31, %v799_v62  ;;  %v1073_v33 = vmul.f32 0.13458754, %v3909_v7  ;;  %v1228_v62 = vmul.f32 -0.12883614, %v3907_v6  ;;  %v5852_v31 = vld [vmem:[#allocation66_spill] sm:$0xff]  ;;  %v1038_v1 = vsel %vm454_vm0, %v1036_v38, %v1037_v18 }
 0x2ac   : > { %v2125_v37 = vadd.f32 %v2121_v49, %v2113_v44  ;;  %v2119_v45 = vpop.permute.xlu0 %2118  ;;  %v1018_v50 = vadd.f32 %v5847_v22, %v1006_v20  ;;  %v5848_v44 = vld [vmem:[#allocation24_spill] sm:$0xff]  ;;  %v2594_v49 = vmul.f32 0.008661927, %v3919_v15  ;;  %v1078_v2 = vrot.slane %v5046_v48, 2  ;;  %v5855_v38 = vld [vmem:[#allocation30_spill] sm:$0xff] }
 0x2ad   : > { %v5007_v10 = vpop.permute.xlu2 %2214  ;;  %v2124_v52 = vadd.f32 %v2119_v45, %v2112_v23  ;;  %v822_v36 = vadd.f32 %v817_v25, %v811_v24  ;;  %v5035_v25 = vmul.f32 0.035867196, %v3923_v17  ;;  %v5849_v23 = vld [vmem:[#allocation46_spill] sm:$0xff]  ;;  %v2183_v45 = vrot.slane %v2179_v34, 2 }
 0x2ae   : > { %v5084_v47 = vmul.f32 -0.031392284, %v3911_v8 }
 0x2af   : > { %v2136_v40 = vadd.f32 %v4915_v28, %v2124_v52  ;;  %v5846_v28 = vld [vmem:[#allocation42_spill] sm:$0xff]  ;;  %v837_v26 = vadd.f32 %v5848_v44, %v822_v36  ;;  %v2184_v39 = vrot.slane %v5035_v25, 2  ;;  %v1030_v52 = vadd.f32 %v5851_v12, %v1018_v50  ;;  %v5857_v44 = vld [vmem:[#allocation45_spill] sm:$0xff] }
 0x2b0   : > { %v1019_v13 = vadd.f32 %v5846_v28, %v1007_v27  ;;  %v1258_v36 = vrot.slane %v1254_v9, 1  ;;  %v1295_v50 = vmul.f32 -0.043643527, %v3907_v6  ;;  %v2571_v25 = vmul.f32 0.1816476, %v3919_v15  ;;  %v5859_v9 = vld [vmem:[#allocation48_spill] sm:$0xff] }
 0x2b1   : > { %2544 = vrot.lane.b32.xlu1 %v2543_v3, %s3753_s24  ;;  %v2147_v59 = vadd.f32 %v2144_v57, %v2136_v40  ;;  %v2598_v3 = vrot.slane %v2594_v49, 1  ;;  %v5853_v40 = vld [vmem:[#allocation67_spill] sm:$0xff] }
 0x2b2   : > { %2531 = vrot.lane.b32.xlu0 %v2527_v5, %s3752_s18  ;;  %v1229_v5 = vmul.f32 -0.12883614, %v3919_v15  ;;  %v1031_v54 = vadd.f32 %v5849_v23, %v1019_v13  ;;  %v1240_v57 = vadd.f32 %v5853_v40, %v1228_v62  ;;  %v5088_v23 = vmul.f32 -0.031392284, %v3923_v17 }
 0x2b3   : > { %2546 = vrot.lane.b32.xlu2 %v2542_v51, %s3753_s24  ;;  %v2157_v61 = vpop.permute.xlu1 %2156  ;;  %v2570_v51 = vmul.f32 0.1816476, %v3907_v6  ;;  %v2599_v34 = vsel %vm454_vm0, %v2597_v29, %v2598_v3  ;;  %v5094_v62 = vmul.f32 0.18016349, %v3923_v17  ;;  %v1587_v29 = vmul.f32 -0.12776802, %v3919_v15 }
 0x2b4   : > { %v2162_v43 = vadd.f32 %v2157_v61, %v2147_v59  ;;  %v2133_v42 = vpop.permute.xlu0 %2132  ;;  %v1241_v24 = vadd.f32 %v5852_v31, %v1229_v5  ;;  %v1042_v56 = vadd.f32 %v1037_v18, %v1031_v54  ;;  %v2185_v59 = vsel %vm476_vm1, %v2183_v45, %v2184_v39  ;;  %v5860_v45 = vld [vmem:[#allocation49_spill] sm:$0xff]  ;;  %v5861_v31 = vld [vmem:[#allocation62_spill] sm:$0xff] }
 0x2b5   : > { %v5031_v21 = vpop.permute.xlu2 %2242  ;;  %v2137_v11 = vadd.f32 %v2133_v42, %v2125_v37  ;;  %v1255_v37 = vmul.f32 0.06960427, %v3919_v15  ;;  %v5069_v61 = vadd.f32 %v859_v4, %v851_v30  ;;  %v1041_v18 = vadd.f32 %v1038_v1, %v1030_v52 }
 0x2b6   : > { %v1253_v53 = vadd.f32 %v5854_v58, %v1241_v24  ;;  %v5073_v42 = vmul.f32 -0.043643527, %v3919_v15  ;;  %v5091_v54 = vmul.f32 0.18016349, %v3911_v8  ;;  %v1299_v30 = vrot.slane %v1295_v50, 2 }
 0x2b7   : > { %v2148_v60 = vadd.f32 %v2143_v35, %v2137_v11  ;;  %v1077_v35 = vrot.slane %v1073_v33, 2  ;;  %v1259_v20 = vrot.slane %v1255_v37, 1  ;;  %v5067_v33 = vadd.f32 %v5855_v38, %v837_v26  ;;  %v5856_v11 = vld [vmem:[#allocation59_spill] sm:$0xff] }
 0x2b8   : > { %v1056_v26 = vadd.f32 %v5857_v44, %v1041_v18  ;;  %v1300_v12 = vrot.slane %v5073_v42, 2  ;;  %v2891_v58 = vmul.f32 -0.1944265, %v3919_v15  ;;  %v5863_v18 = vld [vmem:[#allocation72_spill] sm:$0xff]  ;;  %v1561_v50 = vmul.f32 -0.06331941, %v3919_v15 }
 0x2b9   : > { %2564 = vrot.lane.b32.xlu1 %v2559_v63, %s3752_s18  ;;  %v2163_v14 = vadd.f32 %v4949_v19, %v2148_v60  ;;  %v1079_v5 = vsel %vm476_vm1, %v1077_v35, %v1078_v2  ;;  %v1252_v63 = vadd.f32 %v5856_v11, %v1240_v57  ;;  %v1260_v49 = vsel %vm454_vm0, %v1258_v36, %v1259_v20 }
 0x2ba   : > { %2562 = vrot.lane.b32.xlu0 %v2558_v32, %s3752_s18  ;;  %v1264_v32 = vadd.f32 %v1259_v20, %v1253_v53  ;;  %v1071_v46 = vadd.f32 %v5860_v45, %v1056_v26  ;;  %v2608_v36 = vmul.f32 -0.14870729, %v3907_v6  ;;  %v5862_v20 = vld [vmem:[#allocation69_spill] sm:$0xff]  ;;  %v1301_v44 = vsel %vm476_vm1, %v1299_v30, %v1300_v12  ;;  %v5865_v26 = vld [vmem:[#allocation103_spill] sm:$0xff] }
 0x2bb   : > { %2574 = vrot.lane.b32.xlu2 %v2570_v51, %s3753_s24  ;;  %v2174_v27 = vpop.permute.xlu1 %2173  ;;  %v1263_v52 = vadd.f32 %v1260_v49, %v1252_v63 }
 0x2bc   : > { %v2178_v19 = vadd.f32 %v2174_v27, %v2163_v14  ;;  %v2172_v28 = vpop.permute.xlu0 %2171  ;;  %v1279_v24 = vadd.f32 %v5861_v31, %v1264_v32  ;;  %v1560_v14 = vmul.f32 -0.06331941, %v3907_v6  ;;  %v2902_v27 = vmul.f32 -0.13077532, %v3907_v6 }
 0x2bd   : > { %v5064_v13 = vpop.permute.xlu2 %2270  ;;  %v2177_v22 = vadd.f32 %v2172_v28, %v2162_v43  ;;  %v5858_v43 = vld [vmem:[#allocation38_spill] sm:$0xff]  ;;  %v5119_v28 = vmul.f32 -0.23653041, %v3919_v15  ;;  %v1082_v38 = vadd.f32 %v1079_v5, %v1071_v46  ;;  %v1591_v32 = vrot.slane %v1587_v29, 1  ;;  %v5869_v29 = vld [vmem:[#allocation95_spill] sm:$0xff] }
 0x2be   : > { %v1057_v51 = vadd.f32 %v5858_v43, %v1042_v56  ;;  %v2189_v35 = vadd.f32 %v2184_v39, %v2178_v19  ;;  %v1278_v39 = vadd.f32 %v5862_v20, %v1263_v52  ;;  %v2609_v19 = vmul.f32 -0.14870729, %v3919_v15  ;;  %v5868_v46 = vld [vmem:[#allocation102_spill] sm:$0xff] }
 0x2bf   : > { %v2188_v4 = vadd.f32 %v2185_v59, %v2177_v22  ;;  %v2250_v59 = vmul.f32 -0.23653041, %v3907_v6  ;;  %v1294_v22 = vadd.f32 %v5863_v18, %v1279_v24  ;;  %v1572_v5 = vadd.f32 %v5865_v26, %v1560_v14  ;;  %v5871_v18 = vld [vmem:[#allocation51_spill] sm:$0xff]  ;;  %v5874_v26 = vld [vmem:[#allocation76_spill] sm:$0xff] }
 0x2c0   : > { %v1072_v37 = vadd.f32 %v5859_v9, %v1057_v51  ;;  %v2224_v43 = vmul.f32 0.10418397, %v3907_v6  ;;  %v2613_v51 = vrot.slane %v2609_v19, 1  ;;  %v5866_v9 = vld [vmem:[#allocation41_spill] sm:$0xff]  ;;  %v1573_v30 = vadd.f32 %v5868_v46, %v1561_v50  ;;  %v5872_v50 = vld [vmem:[#allocation44_spill] sm:$0xff] }
 0x2c1   : > { %2600 = vrot.lane.b32.xlu1 %v2599_v34, %s3752_s18  ;;  %v2203_v60 = vadd.f32 %v4977_v0, %v2188_v4  ;;  %v1586_v0 = vmul.f32 -0.12776802, %v3907_v6  ;;  %v1146_v34 = vrot.slane %v5091_v54, 1  ;;  %v2254_v49 = vrot.slane %v2250_v59, 1 }
 0x2c2   : > { %2576 = vrot.lane.b32.xlu0 %v2571_v25, %s3753_s24  ;;  %v5864_v25 = vld [vmem:[#allocation73_spill] sm:$0xff]  ;;  %v1083_v4 = vadd.f32 %v1078_v2, %v1072_v37  ;;  %v1097_v48 = vadd.f32 %v5866_v9, %v1082_v38  ;;  %v5867_v2 = vld [vmem:[#allocation52_spill] sm:$0xff]  ;;  %v1305_v45 = vadd.f32 %v1300_v12, %v1294_v22  ;;  %v1627_v14 = vmul.f32 0.12945588, %v3907_v6 }
 0x2c3   : > { %2602 = vrot.lane.b32.xlu2 %v2598_v3, %s3752_s18  ;;  %v2213_v1 = vpop.permute.xlu1 %2212  ;;  %v2890_v3 = vmul.f32 -0.1944265, %v3907_v6  ;;  %v1293_v11 = vadd.f32 %v5864_v25, %v1278_v39  ;;  %v1590_v63 = vrot.slane %v1586_v0, 1  ;;  %v2225_v12 = vmul.f32 0.10418397, %v3919_v15 }
 0x2c4   : > { %v5107_v56 = vadd.f32 %v2213_v1, %v2203_v60  ;;  %v2200_v40 = vpop.permute.xlu0 %2199  ;;  %v2255_v60 = vrot.slane %v5119_v28, 1  ;;  %v1098_v37 = vadd.f32 %v5867_v2, %v1083_v4  ;;  %v5143_v1 = vmul.f32 0.12945588, %v3919_v15  ;;  %v5873_v4 = vld [vmem:[#allocation65_spill] sm:$0xff] }
 0x2c5   : > { %v5109_v57 = vpop.permute.xlu2 %2309  ;;  %v2204_v53 = vadd.f32 %v2200_v40, %v2189_v35  ;;  %v1304_v31 = vadd.f32 %v1301_v44, %v1293_v11  ;;  %v1592_v24 = vsel %vm454_vm0, %v1590_v63, %v1591_v32  ;;  %v1584_v40 = vadd.f32 %v5869_v29, %v1572_v5 }
 0x2c6   : > { %v2256_v20 = vsel %vm454_vm0, %v2254_v49, %v2255_v60  ;;  %v2926_v39 = vmul.f32 -0.0050604064, %v3919_v15  ;;  %v2925_v59 = vmul.f32 -0.0050604064, %v3907_v6  ;;  %v2940_v28 = vmul.f32 -0.028312508, %v3907_v6 }
 0x2c7   : > { %v5124_v42 = vadd.f32 %v5007_v10, %v2204_v53  ;;  %v2612_v10 = vrot.slane %v2608_v36, 1  ;;  %v2903_v36 = vmul.f32 -0.13077532, %v3919_v15  ;;  %v5158_v38 = vmul.f32 -0.028312508, %v3919_v15 }
 0x2c8   : > { %v1112_v22 = vadd.f32 %v5871_v18, %v1097_v48  ;;  %v1113_v25 = vadd.f32 %v5872_v50, %v1098_v37  ;;  %v1337_v11 = vmul.f32 -0.049591076, %v3921_v16  ;;  %v1336_v63 = vmul.f32 -0.049591076, %v3909_v7 }
 0x2c9   : > { %2896 = vrot.lane.b32.xlu1 %v2891_v58, %s3752_s18  ;;  %v5870_v58 = vld [vmem:[#allocation106_spill] sm:$0xff]  ;;  %v1319_v44 = vadd.f32 %v5873_v4, %v1304_v31  ;;  %v1320_v5 = vadd.f32 %v5874_v26, %v1305_v45  ;;  %v1632_v49 = vrot.slane %v5143_v1, 2  ;;  %v2930_v48 = vrot.slane %v2926_v39, 1  ;;  %v5875_v45 = vld [vmem:[#allocation105_spill] sm:$0xff] }
 0x2ca   : > { %2894 = vrot.lane.b32.xlu0 %v2890_v3, %s3752_s18  ;;  %v1585_v53 = vadd.f32 %v5870_v58, %v1573_v30  ;;  %v2929_v46 = vrot.slane %v2925_v59, 1  ;;  %v2944_v30 = vrot.slane %v2940_v28, 1  ;;  %v2945_v31 = vrot.slane %v5158_v38, 1  ;;  %v5877_v58 = vld [vmem:[#allocation68_spill] sm:$0xff] }
 0x2cb   : > { %2906 = vrot.lane.b32.xlu2 %v2902_v27, %s3753_s24  ;;  %v2233_v52 = vpop.permute.xlu1 %2232  ;;  %v2614_v27 = vsel %vm454_vm0, %v2612_v10, %v2613_v51  ;;  %v1595_v10 = vadd.f32 %v1592_v24, %v1584_v40  ;;  %v2291_v24 = vmul.f32 0.042377137, %v3907_v6  ;;  %v5176_v1 = vmul.f32 0.042377137, %v3919_v15  ;;  %v5876_v40 = vld [vmem:[#allocation75_spill] sm:$0xff]  ;;  %v5880_v59 = vld [vmem:[#allocation108_spill] sm:$0xff] }
 0x2cc   : > { %v2231_v35 = vpop.permute.xlu0 %2230  ;;  %v2237_v2 = vadd.f32 %v2233_v52, %v2225_v12  ;;  %v1335_v52 = vadd.f32 %v5877_v58, %v1320_v5  ;;  %v2634_v39 = vmul.f32 0.0917488, %v3907_v6  ;;  %v2931_v50 = vsel %vm454_vm0, %v2929_v46, %v2930_v48 }
 0x2cd   : > { %v5145_v0 = vpop.permute.xlu2 %2326  ;;  %v2236_v3 = vadd.f32 %v2231_v35, %v2224_v43  ;;  %v1631_v43 = vrot.slane %v1627_v14, 2  ;;  %v2946_v4 = vsel %vm454_vm0, %v2944_v30, %v2945_v31  ;;  %v1365_v26 = vmul.f32 0.1583473, %v3921_v16 }
 0x2ce   : > { %v2295_v5 = vrot.slane %v2291_v24, 2  ;;  %v2638_v46 = vrot.slane %v2634_v39, 2  ;;  %v2649_v39 = vmul.f32 0.106693484, %v3907_v6  ;;  %v5288_v54 = vadd.f32 %v858_v41, %v5067_v33 }
 0x2cf   : > { %v2248_v19 = vadd.f32 %v5031_v21, %v2236_v3  ;;  %v1596_v21 = vadd.f32 %v1591_v32, %v1585_v53  ;;  %v1610_v32 = vadd.f32 %v5875_v45, %v1595_v10  ;;  %v5878_v53 = vld [vmem:[#allocation98_spill] sm:$0xff]  ;;  %v1147_v10 = vrot.slane %v5094_v62, 1  ;;  %v5881_v45 = vld [vmem:[#allocation55_spill] sm:$0xff] }
 0x2d1   : > { %2615 = vrot.lane.b32.xlu1 %v2614_v27, %s3753_s24  ;;  %v2259_v9 = vadd.f32 %v2256_v20, %v2248_v19  ;;  %v1611_v12 = vadd.f32 %v5878_v53, %v1596_v21  ;;  %v1633_v27 = vsel %vm476_vm1, %v1631_v43, %v1632_v49  ;;  %v2635_v19 = vmul.f32 0.0917488, %v3919_v15  ;;  %v5884_v53 = vld [vmem:[#allocation78_spill] sm:$0xff] }
 0x2d2   : > { %2908 = vrot.lane.b32.xlu0 %v2903_v36, %s3753_s24  ;;  %v5879_v36 = vld [vmem:[#allocation109_spill] sm:$0xff]  ;;  %v2296_v21 = vrot.slane %v5176_v1, 2  ;;  %v1116_v43 = vadd.f32 %v5084_v47, %v1112_v22  ;;  %v5882_v47 = vld [vmem:[#allocation79_spill] sm:$0xff] }
 0x2d3   : > { %2617 = vrot.lane.b32.xlu2 %v2613_v51, %s3753_s24  ;;  %v2269_v37 = vpop.permute.xlu1 %2268  ;;  %v1334_v51 = vadd.f32 %v5876_v40, %v1319_v44  ;;  %v1625_v20 = vadd.f32 %v5879_v36, %v1610_v32  ;;  %v1626_v28 = vadd.f32 %v5880_v59, %v1611_v12  ;;  %v1364_v44 = vmul.f32 0.1583473, %v3909_v7 }
 0x2d4   : > { %v2274_v14 = vadd.f32 %v2269_v37, %v2259_v9  ;;  %v2245_v35 = vpop.permute.xlu0 %2244  ;;  %v2639_v30 = vrot.slane %v2635_v19, 2  ;;  %v1128_v32 = vadd.f32 %v5881_v45, %v1116_v43  ;;  %v5887_v19 = vld [vmem:[#allocation71_spill] sm:$0xff]  ;;  %v5228_v45 = vmul.f32 -0.12826493, %v3919_v15 }
 0x2d5   : > { %v5172_v29 = vpop.permute.xlu2 %2352  ;;  %v2249_v3 = vadd.f32 %v2245_v35, %v2237_v2  ;;  %v1338_v9 = vadd.f32 %v1336_v63, %v1334_v51  ;;  %v1117_v2 = vadd.f32 %v5088_v23, %v1113_v25  ;;  %v1636_v37 = vadd.f32 %v1633_v27, %v1625_v20  ;;  %v5883_v51 = vld [vmem:[#allocation54_spill] sm:$0xff] }
 0x2d6   : > { %v1339_v35 = vadd.f32 %v1337_v11, %v1335_v52  ;;  %v1637_v24 = vadd.f32 %v1632_v49, %v1626_v28  ;;  %v1368_v1 = vrot.slane %v1364_v44, 1  ;;  %v5886_v52 = vld [vmem:[#allocation101_spill] sm:$0xff]  ;;  %v2640_v49 = vsel %vm476_vm1, %v2638_v46, %v2639_v30  ;;  %v5888_v28 = vld [vmem:[#allocation82_spill] sm:$0xff]  ;;  %v5889_v44 = vld [vmem:[#allocation47_spill] sm:$0xff] }
 0x2d7   : > { %v2260_v18 = vadd.f32 %v2255_v60, %v2249_v3  ;;  %v1350_v22 = vadd.f32 %v5882_v47, %v1338_v9  ;;  %v5206_v58 = vadd.f32 %v5883_v51, %v1117_v2  ;;  %v5885_v3 = vld [vmem:[#allocation112_spill] sm:$0xff]  ;;  %v1651_v36 = vadd.f32 %v5886_v52, %v1636_v37 }
 0x2d8   : > { %v1351_v12 = vadd.f32 %v5884_v53, %v1339_v35  ;;  %v1652_v27 = vadd.f32 %v5885_v3, %v1637_v24  ;;  %v2650_v20 = vmul.f32 0.106693484, %v3919_v15  ;;  %v1668_v9 = vmul.f32 -0.02873877, %v3909_v7 }
 0x2d9   : > { %2934 = vrot.lane.b32.xlu1 %v2930_v48, %s3752_s18  ;;  %v2275_v60 = vadd.f32 %v5064_v13, %v2260_v18  ;;  %v1369_v48 = vrot.slane %v1365_v26, 1  ;;  %v2297_v13 = vsel %vm476_vm1, %v2295_v5, %v2296_v21  ;;  %v1362_v59 = vadd.f32 %v5887_v19, %v1350_v22  ;;  %v5890_v5 = vld [vmem:[#allocation111_spill] sm:$0xff]  ;;  %v5892_v19 = vld [vmem:[#allocation81_spill] sm:$0xff] }
 0x2da   : > { %2932 = vrot.lane.b32.xlu0 %v2931_v50, %s3752_s18  ;;  %v1363_v18 = vadd.f32 %v5888_v28, %v1351_v12  ;;  %v5218_v26 = vadd.f32 %v5889_v44, %v1128_v32  ;;  %v1666_v43 = vadd.f32 %v5890_v5, %v1651_v36  ;;  %v1669_v37 = vmul.f32 -0.02873877, %v3921_v16  ;;  %v5894_v44 = vld [vmem:[#allocation74_spill] sm:$0xff] }
 0x2db   : > { %2947 = vrot.lane.b32.xlu2 %v2946_v4, %s3753_s24  ;;  %v2286_v63 = vpop.permute.xlu1 %2285  ;;  %v2966_v4 = vmul.f32 -0.12826493, %v3907_v6  ;;  %v1405_v32 = vmul.f32 -0.22035098, %v3909_v7  ;;  %v5232_v35 = vmul.f32 -0.22035098, %v3921_v16 }
 0x2dc   : > { %v2290_v40 = vadd.f32 %v2286_v63, %v2275_v60  ;;  %v2284_v23 = vpop.permute.xlu0 %2283  ;;  %v5891_v60 = vld [vmem:[#allocation104_spill] sm:$0xff]  ;;  %v2654_v47 = vrot.slane %v2650_v20, 2  ;;  %v2653_v22 = vrot.slane %v2649_v39, 2  ;;  %v1374_v63 = vadd.f32 %v1369_v48, %v1363_v18  ;;  %v5895_v5 = vld [vmem:[#allocation114_spill] sm:$0xff] }
 0x2dd   : > { %v5203_v25 = vpop.permute.xlu2 %2380  ;;  %v2289_v11 = vadd.f32 %v2284_v23, %v2274_v14  ;;  %v1370_v14 = vsel %vm454_vm0, %v1368_v1, %v1369_v48  ;;  %v1667_v2 = vadd.f32 %v5891_v60, %v1652_v27  ;;  %v1670_v23 = vadd.f32 %v1668_v9, %v1666_v43  ;;  %v5896_v60 = vld [vmem:[#allocation85_spill] sm:$0xff] }
 0x2de   : > { %v1373_v24 = vadd.f32 %v1370_v14, %v1362_v59  ;;  %v1696_v51 = vmul.f32 -0.07354833, %v3909_v7  ;;  %v1697_v53 = vmul.f32 -0.07354833, %v3921_v16  ;;  %v2655_v48 = vsel %vm476_vm1, %v2653_v22, %v2654_v47 }
 0x2df   : > { %v2300_v50 = vadd.f32 %v2297_v13, %v2289_v11  ;;  %v2970_v13 = vrot.slane %v2966_v4, 2  ;;  %v1671_v38 = vadd.f32 %v1669_v37, %v1667_v2  ;;  %v2971_v11 = vrot.slane %v5228_v45, 2 }
 0x2e0   : > { %v2982_v52 = vmul.f32 -0.058565777, %v3919_v15  ;;  %v5251_v20 = vmul.f32 -0.010891473, %v3921_v16  ;;  %v1388_v59 = vadd.f32 %v5892_v19, %v1373_v24  ;;  %v1409_v28 = vrot.slane %v1405_v32, 2  ;;  %v5897_v32 = vld [vmem:[#allocation118_spill] sm:$0xff] }
 0x2e1   : > { %2641 = vrot.lane.b32.xlu1 %v2640_v49, %s3752_s18  ;;  %v2315_v46 = vadd.f32 %v5109_v57, %v2300_v50  ;;  %v2301_v57 = vadd.f32 %v2296_v21, %v2290_v40  ;;  %v2332_v21 = vmul.f32 0.031941425, %v3909_v7  ;;  %v2981_v40 = vmul.f32 -0.058565777, %v3907_v6  ;;  %v5893_v50 = vld [vmem:[#allocation115_spill] sm:$0xff] }
 0x2e2   : > { %2949 = vrot.lane.b32.xlu0 %v2945_v31, %s3753_s24  ;;  %v2360_v49 = vmul.f32 -0.010891473, %v3909_v7  ;;  %v2972_v39 = vsel %vm476_vm1, %v2970_v13, %v2971_v11  ;;  %v1410_v18 = vrot.slane %v5232_v35, 2  ;;  %v1682_v4 = vadd.f32 %v5893_v50, %v1670_v23  ;;  %v5899_v23 = vld [vmem:[#allocation107_spill] sm:$0xff] }
 0x2e3   : > { %2643 = vrot.lane.b32.xlu2 %v2639_v30, %s3752_s18  ;;  %v2325_v1 = vpop.permute.xlu1 %2324  ;;  %v2333_v30 = vmul.f32 0.031941425, %v3921_v16  ;;  %v1389_v14 = vadd.f32 %v5894_v44, %v1374_v63  ;;  %v1683_v43 = vadd.f32 %v5895_v5, %v1671_v38  ;;  %v1700_v9 = vrot.slane %v1696_v51, 1  ;;  %v5903_v5 = vld [vmem:[#allocation77_spill] sm:$0xff] }
 0x2e4   : > { %v2330_v12 = vadd.f32 %v2325_v1, %v2315_v46  ;;  %v2312_v3 = vpop.permute.xlu0 %2311  ;;  %v1403_v2 = vadd.f32 %v5896_v60, %v1388_v59  ;;  %v2985_v46 = vrot.slane %v2981_v40, 2  ;;  %v2986_v45 = vrot.slane %v2982_v52, 2  ;;  %v5900_v40 = vld [vmem:[#allocation58_spill] sm:$0xff]  ;;  %v5901_v59 = vld [vmem:[#allocation25_spill] sm:$0xff] }
 0x2e5   : > { %v5240_v27 = vpop.permute.xlu2 %2419  ;;  %v2316_v31 = vadd.f32 %v2312_v3, %v2301_v57  ;;  %v1695_v35 = vadd.f32 %v5897_v32, %v1683_v43  ;;  %v2364_v63 = vrot.slane %v2360_v49, 1  ;;  %v2365_v1 = vrot.slane %v5251_v20, 1  ;;  %v5898_v57 = vld [vmem:[#allocation84_spill] sm:$0xff] }
 0x2e6   : > { %v2334_v24 = vadd.f32 %v2332_v21, %v2330_v12  ;;  %v1404_v13 = vadd.f32 %v5898_v57, %v1389_v14  ;;  %v1694_v51 = vadd.f32 %v5899_v23, %v1682_v4  ;;  %v1148_v21 = vsel %vm454_vm0, %v1146_v34, %v1147_v10 }
 0x2e7   : > { %v2331_v36 = vadd.f32 %v5145_v0, %v2316_v31  ;;  %v1701_v0 = vrot.slane %v1697_v53, 1  ;;  %v1141_v52 = vadd.f32 %v5900_v40, %v5206_v58  ;;  %v2366_v19 = vsel %vm454_vm0, %v2364_v63, %v2365_v1  ;;  %v5910_v40 = vld [vmem:[#allocation50_spill] sm:$0xff] }
 0x2e8   : > { %v5291_v34 = vmul.f32 -0.12083186, %v3911_v8  ;;  %v1151_v50 = vadd.f32 %v1148_v21, %v5218_v26  ;;  %v1415_v4 = vadd.f32 %v1410_v18, %v1404_v13  ;;  %v2669_v57 = vmul.f32 0.09166548, %v3921_v16  ;;  %v5908_v13 = vld [vmem:[#allocation87_spill] sm:$0xff] }
 0x2e9   : > { %2658 = vrot.lane.b32.xlu1 %v2654_v47, %s3753_s24  ;;  %v2335_v37 = vadd.f32 %v2333_v30, %v2331_v36  ;;  %v1411_v47 = vsel %vm476_vm1, %v1409_v28, %v1410_v18  ;;  %v1702_v31 = vsel %vm454_vm0, %v1700_v9, %v1701_v0  ;;  %v1737_v30 = vmul.f32 0.016100958, %v3909_v7  ;;  %v5904_v18 = vld [vmem:[#allocation88_spill] sm:$0xff] }
 0x2ea   : > { %2656 = vrot.lane.b32.xlu0 %v2655_v48, %s3753_s24  ;;  %v1738_v48 = vmul.f32 0.016100958, %v3921_v16  ;;  %v2987_v36 = vsel %vm476_vm1, %v2985_v46, %v2986_v45  ;;  %v1414_v49 = vadd.f32 %v1411_v47, %v1403_v2  ;;  %v1706_v20 = vadd.f32 %v1701_v0, %v1695_v35  ;;  %v5905_v0 = vld [vmem:[#allocation110_spill] sm:$0xff] }
 0x2eb   : > { %2973 = vrot.lane.b32.xlu2 %v2972_v39, %s3752_s18  ;;  %v2343_v22 = vpop.permute.xlu1 %2342  ;;  %v877_v28 = vadd.f32 %v5901_v59, %v5069_v61  ;;  %v1705_v58 = vadd.f32 %v1702_v31, %v1694_v51  ;;  %v1741_v44 = vrot.slane %v1737_v30, 2  ;;  %v5298_v61 = vmul.f32 -0.12083186, %v3923_v17  ;;  %v5909_v31 = vld [vmem:[#allocation80_spill] sm:$0xff] }
 0x2ec   : > { %v2347_v53 = vadd.f32 %v2343_v22, %v2335_v37  ;;  %v2341_v3 = vpop.permute.xlu0 %2340  ;;  %v1742_v14 = vrot.slane %v1738_v48, 2  ;;  %v1429_v26 = vadd.f32 %v5903_v5, %v1414_v49  ;;  %v1430_v43 = vadd.f32 %v5904_v18, %v1415_v4  ;;  %v5912_v4 = vld [vmem:[#allocation57_spill] sm:$0xff]  ;;  %v5915_v18 = vld [vmem:[#allocation91_spill] sm:$0xff] }
 0x2ed   : > { %v5268_v38 = vpop.permute.xlu2 %2436  ;;  %v2346_v12 = vadd.f32 %v2341_v3, %v2334_v24  ;;  %v1720_v41 = vadd.f32 %v5902_v55, %v1705_v58  ;;  %v1446_v9 = vmul.f32 0.10039616, %v3911_v8  ;;  %v1721_v60 = vadd.f32 %v5905_v0, %v1706_v20  ;;  %v5911_v20 = vld [vmem:[#allocation32_spill] sm:$0xff] }
 0x2ee   : > { %v5312_v35 = vmul.f32 -0.028876651, %v3921_v16  ;;  %v1743_v24 = vsel %vm476_vm1, %v1741_v44, %v1742_v14  ;;  %v1444_v47 = vadd.f32 %v5908_v13, %v1429_v26  ;;  %v1447_v23 = vmul.f32 0.10039616, %v3923_v17  ;;  %v5913_v55 = vld [vmem:[#allocation60_spill] sm:$0xff] }
 0x2ef   : > { %v2358_v39 = vadd.f32 %v5172_v29, %v2346_v12  ;;  %v1152_v29 = vadd.f32 %v1147_v10, %v1141_v52  ;;  %v5906_v10 = vld [vmem:[#allocation121_spill] sm:$0xff]  ;;  %v2668_v51 = vmul.f32 0.09166548, %v3909_v7  ;;  %v2680_v3 = vmul.f32 0.037094682, %v3909_v7 }
 0x2f0   : > { %v1735_v2 = vadd.f32 %v5906_v10, %v1720_v41  ;;  %v1445_v30 = vadd.f32 %v5909_v31, %v1430_v43  ;;  %v1474_v48 = vmul.f32 -0.13204311, %v3911_v8  ;;  %v5324_v12 = vmul.f32 -0.13204311, %v3923_v17  ;;  %v5916_v43 = vld [vmem:[#allocation113_spill] sm:$0xff] }
 0x2f1   : > { %2988 = vrot.lane.b32.xlu1 %v2987_v36, %s3753_s24  ;;  %v2369_v33 = vadd.f32 %v2366_v19, %v2358_v39  ;;  %v2406_v49 = vrot.slane %v5312_v35, 2  ;;  %v5329_v39 = vadd.f32 %v5911_v20, %v877_v28  ;;  %v1187_v19 = vrot.slane %v5291_v34, 2  ;;  %v5922_v20 = vld [vmem:[#allocation94_spill] sm:$0xff] }
 0x2f2   : > { %2975 = vrot.lane.b32.xlu0 %v2971_v11, %s3752_s18  ;;  %v2401_v11 = vmul.f32 -0.028876651, %v3909_v7  ;;  %v1746_v52 = vadd.f32 %v1743_v24, %v1735_v2  ;;  %v1166_v44 = vadd.f32 %v5912_v4, %v1151_v50  ;;  %v1448_v41 = vadd.f32 %v1446_v9, %v1444_v47 }
 0x2f3   : > { %2990 = vrot.lane.b32.xlu2 %v2986_v45, %s3753_s24  ;;  %v2379_v62 = vpop.permute.xlu1 %2378  ;;  %v5907_v45 = vld [vmem:[#allocation120_spill] sm:$0xff]  ;;  %v1449_v28 = vadd.f32 %v1447_v23, %v1445_v30  ;;  %v1479_v34 = vrot.slane %v5324_v12, 1  ;;  %v1778_v10 = vmul.f32 -0.14015202, %v3911_v8  ;;  %v3001_v24 = vmul.f32 0.058633726, %v3921_v16 }
 0x2f4   : > { %v2384_v37 = vadd.f32 %v2379_v62, %v2369_v33  ;;  %v2355_v46 = vpop.permute.xlu0 %2354  ;;  %v1736_v22 = vadd.f32 %v5907_v45, %v1721_v60  ;;  %v2405_v36 = vrot.slane %v2401_v11, 2  ;;  %v1478_v33 = vrot.slane %v1474_v48, 1  ;;  %v5917_v11 = vld [vmem:[#allocation123_spill] sm:$0xff]  ;;  %v5920_v30 = vld [vmem:[#allocation90_spill] sm:$0xff] }
 0x2f5   : > { %v5308_v32 = vpop.permute.xlu2 %2462  ;;  %v2359_v63 = vadd.f32 %v2355_v46, %v2347_v53  ;;  %v1167_v53 = vadd.f32 %v5910_v40, %v1152_v29  ;;  %v1188_v29 = vrot.slane %v5298_v61, 2  ;;  %v1761_v50 = vadd.f32 %v5916_v43, %v1746_v52  ;;  %v5921_v52 = vld [vmem:[#allocation83_spill] sm:$0xff] }
 0x2f6   : > { %v1747_v59 = vadd.f32 %v1742_v14, %v1736_v22  ;;  %v5914_v14 = vld [vmem:[#allocation124_spill] sm:$0xff]  ;;  %v2407_v60 = vsel %vm476_vm1, %v2405_v36, %v2406_v49  ;;  %v1779_v62 = vmul.f32 -0.14015202, %v3923_v17  ;;  %v3000_v46 = vmul.f32 0.058633726, %v3909_v7 }
 0x2f7   : > { %v2370_v21 = vadd.f32 %v2365_v1, %v2359_v63  ;;  %v1182_v1 = vadd.f32 %v5913_v55, %v1167_v53  ;;  %v1776_v35 = vadd.f32 %v5917_v11, %v1761_v50  ;;  %v1806_v45 = vmul.f32 -0.01642946, %v3911_v8  ;;  %v5918_v63 = vld [vmem:[#allocation116_spill] sm:$0xff] }
 0x2f8   : > { %v1762_v5 = vadd.f32 %v5914_v14, %v1747_v59  ;;  %v2681_v22 = vmul.f32 0.037094682, %v3921_v16  ;;  %v5355_v13 = vmul.f32 -0.01642946, %v3923_v17  ;;  %v2703_v23 = vmul.f32 -0.015219296, %v3909_v7 }
 0x2f9   : > { %2674 = vrot.lane.b32.xlu1 %v2669_v57, %s3752_s18  ;;  %v2385_v58 = vadd.f32 %v5203_v25, %v2370_v21  ;;  %v1460_v25 = vadd.f32 %v5915_v18, %v1448_v41  ;;  %v5360_v31 = vadd.f32 %v1188_v29, %v1182_v1  ;;  %v1461_v48 = vadd.f32 %v5920_v30, %v1449_v28 }
 0x2fa   : > { %2672 = vrot.lane.b32.xlu0 %v2668_v51, %s3752_s18  ;;  %v1777_v57 = vadd.f32 %v5918_v63, %v1762_v5  ;;  %v5919_v51 = vld [vmem:[#allocation61_spill] sm:$0xff]  ;;  %v1480_v12 = vsel %vm454_vm0, %v1478_v33, %v1479_v34  ;;  %v5365_v21 = vmul.f32 0.004905462, %v3911_v8  ;;  %v5370_v53 = vmul.f32 -0.015219296, %v3921_v16  ;;  %v5926_v63 = vld [vmem:[#allocation130_spill] sm:$0xff] }
 0x2fb   : > { %2684 = vrot.lane.b32.xlu2 %v2680_v3, %s3753_s24  ;;  %v2396_v26 = vpop.permute.xlu1 %2395  ;;  %v1181_v3 = vadd.f32 %v5919_v51, %v1166_v44  ;;  %v1472_v36 = vadd.f32 %v5921_v52, %v1460_v25  ;;  %v1780_v59 = vadd.f32 %v1778_v10, %v1776_v35  ;;  %v1811_v44 = vrot.slane %v5355_v13, 1 }
 0x2fc   : > { %v2400_v0 = vadd.f32 %v2396_v26, %v2385_v58  ;;  %v2394_v61 = vpop.permute.xlu0 %2393  ;;  %v1810_v58 = vrot.slane %v1806_v45, 1  ;;  %v1781_v4 = vadd.f32 %v1779_v62, %v1777_v57  ;;  %v3013_v5 = vmul.f32 -0.06635352, %v3921_v16 }
 0x2fd   : > { %v5344_v9 = vpop.permute.xlu2 %2490  ;;  %v2399_v2 = vadd.f32 %v2394_v61, %v2384_v37  ;;  %v1189_v37 = vsel %vm476_vm1, %v1187_v19, %v1188_v29  ;;  %v1473_v19 = vadd.f32 %v5922_v20, %v1461_v48  ;;  %v2707_v29 = vrot.slane %v2703_v23, 1 }
 0x2fe   : > { %v2411_v1 = vadd.f32 %v2406_v49, %v2400_v0  ;;  %v3012_v26 = vmul.f32 -0.06635352, %v3909_v7  ;;  %v2443_v25 = vmul.f32 -0.051062245, %v3923_v17  ;;  %v2718_v43 = vmul.f32 -0.1473888, %v3909_v7 }
 0x2ff   : > { %v2410_v47 = vadd.f32 %v2407_v60, %v2399_v2  ;;  %v2708_v50 = vrot.slane %v5370_v53, 1  ;;  %v5924_v60 = vld [vmem:[#allocation126_spill] sm:$0xff]  ;;  %v2719_v0 = vmul.f32 -0.1473888, %v3921_v16  ;;  %v2470_v61 = vmul.f32 0.030068511, %v3911_v8 }
 0x300   : > { %v1793_v49 = vadd.f32 %v5924_v60, %v1781_v4  ;;  %v5389_v62 = vmul.f32 0.030068511, %v3923_v17  ;;  %v1516_v10 = vmul.f32 0.004905462, %v3923_v17  ;;  %v1483_v35 = vadd.f32 %v1480_v12, %v1472_v36 }
 0x301   : > { %3004 = vrot.lane.b32.xlu1 %v3000_v46, %s3752_s18  ;;  %v2425_v40 = vadd.f32 %v5240_v27, %v2410_v47  ;;  %v5923_v27 = vld [vmem:[#allocation127_spill] sm:$0xff]  ;;  %v2442_v46 = vmul.f32 -0.051062245, %v3911_v8  ;;  %v2709_v11 = vsel %vm454_vm0, %v2707_v29, %v2708_v50  ;;  %v1484_v45 = vadd.f32 %v1479_v34, %v1473_v19  ;;  %v5928_v29 = vld [vmem:[#allocation86_spill] sm:$0xff] }
 0x302   : > { %2686 = vrot.lane.b32.xlu0 %v2681_v22, %s3753_s24  ;;  %v1792_v41 = vadd.f32 %v5923_v27, %v1780_v59  ;;  %v5925_v22 = vld [vmem:[#allocation119_spill] sm:$0xff]  ;;  %v1805_v57 = vadd.f32 %v5926_v63, %v1793_v49  ;;  %v1812_v13 = vsel %vm454_vm0, %v1810_v58, %v1811_v44  ;;  %v1847_v47 = vmul.f32 -0.1280394, %v3911_v8  ;;  %v5931_v49 = vld [vmem:[#allocation33_spill] sm:$0xff] }
 0x303   : > { %3006 = vrot.lane.b32.xlu2 %v3001_v24, %s3752_s18  ;;  %v2435_v55 = vpop.permute.xlu1 %2434  ;;  %v5400_v23 = vmul.f32 -0.1280394, %v3923_v17  ;;  %v2723_v30 = vrot.slane %v2719_v0, 1  ;;  %v2474_v48 = vrot.slane %v2470_v61, 1  ;;  %v2475_v34 = vrot.slane %v5389_v62, 1  ;;  %v5932_v61 = vld [vmem:[#allocation96_spill] sm:$0xff] }
 0x304   : > { %v2440_v28 = vadd.f32 %v2435_v55, %v2425_v40  ;;  %v2422_v33 = vpop.permute.xlu0 %2421  ;;  %v1804_v24 = vadd.f32 %v5925_v22, %v1792_v41  ;;  %v1192_v12 = vadd.f32 %v1189_v37, %v1181_v3  ;;  %v5927_v40 = vld [vmem:[#allocation93_spill] sm:$0xff]  ;;  %v1519_v52 = vrot.slane %v5365_v21, 2  ;;  %v5936_v22 = vld [vmem:[#allocation132_spill] sm:$0xff] }
 0x305   : > { %v5378_v14 = vpop.permute.xlu2 %2529  ;;  %v2426_v18 = vadd.f32 %v2422_v33, %v2411_v1  ;;  %v1498_v53 = vadd.f32 %v5927_v40, %v1483_v35  ;;  %v1520_v19 = vrot.slane %v1516_v10, 2  ;;  %v1816_v58 = vadd.f32 %v1811_v44, %v1805_v57  ;;  %v5929_v41 = vld [vmem:[#allocation97_spill] sm:$0xff]  ;;  %v5937_v57 = vld [vmem:[#allocation131_spill] sm:$0xff] }
 0x306   : > { %v2444_v20 = vadd.f32 %v2442_v46, %v2440_v28  ;;  %v1815_v59 = vadd.f32 %v1812_v13, %v1804_v24  ;;  %v1499_v27 = vadd.f32 %v5928_v29, %v1484_v45  ;;  %v5930_v37 = vld [vmem:[#allocation129_spill] sm:$0xff]  ;;  %v2476_v28 = vsel %vm454_vm0, %v2474_v48, %v2475_v34  ;;  %v5935_v45 = vld [vmem:[#allocation64_spill] sm:$0xff] }
 0x307   : > { %v2441_v2 = vadd.f32 %v5268_v38, %v2426_v18  ;;  %v2722_v38 = vrot.slane %v2718_v43, 1  ;;  %v1513_v33 = vadd.f32 %v5929_v41, %v1498_v53  ;;  %v1852_v18 = vrot.slane %v5400_v23, 2  ;;  %v5939_v29 = vld [vmem:[#allocation100_spill] sm:$0xff] }
 0x308   : > { %v1830_v3 = vadd.f32 %v5930_v37, %v1815_v59  ;;  %v3035_v43 = vmul.f32 -0.16051494, %v3909_v7  ;;  %v3050_v60 = vmul.f32 0.07293494, %v3909_v7  ;;  %v878_v0 = vadd.f32 %v5931_v49, %v5288_v54  ;;  %v5938_v59 = vld [vmem:[#allocation63_spill] sm:$0xff] }
 0x309   : > { %3018 = vrot.lane.b32.xlu1 %v3013_v5, %s3753_s24  ;;  %v2445_v51 = vadd.f32 %v2443_v25, %v2441_v2  ;;  %v1851_v5 = vrot.slane %v1847_v47, 2  ;;  %v2724_v21 = vsel %vm454_vm0, %v2722_v38, %v2723_v30  ;;  %v3036_v25 = vmul.f32 -0.16051494, %v3921_v16  ;;  %v5933_v2 = vld [vmem:[#allocation122_spill] sm:$0xff]  ;;  %v5943_v49 = vld [vmem:[#allocation27_spill] sm:$0xff] }
 0x30a   : > { %3016 = vrot.lane.b32.xlu0 %v3012_v26, %s3753_s24  ;;  %v1514_v62 = vadd.f32 %v5932_v61, %v1499_v27  ;;  %v1521_v10 = vsel %vm476_vm1, %v1519_v52, %v1520_v19  ;;  %v1831_v46 = vadd.f32 %v5933_v2, %v1816_v58  ;;  %v1845_v24 = vadd.f32 %v5936_v22, %v1830_v3  ;;  %v5944_v61 = vld [vmem:[#allocation99_spill] sm:$0xff]  ;;  %v5947_v22 = vld [vmem:[#allocation133_spill] sm:$0xff] }
 0x30b   : > { %2710 = vrot.lane.b32.xlu2 %v2709_v11, %s3752_s18  ;;  %v2453_v36 = vpop.permute.xlu1 %2452  ;;  %v5934_v11 = vld [vmem:[#allocation53_spill] sm:$0xff]  ;;  %v5431_v63 = vmul.f32 0.07293494, %v3921_v16  ;;  %v1853_v13 = vsel %vm476_vm1, %v1851_v5, %v1852_v18  ;;  %v1524_v23 = vadd.f32 %v1521_v10, %v1513_v33  ;;  %v3054_v48 = vrot.slane %v3050_v60, 1 }
 0x30c   : > { %v2457_v4 = vadd.f32 %v2453_v36, %v2445_v51  ;;  %v2451_v55 = vpop.permute.xlu0 %2450  ;;  %v1207_v35 = vadd.f32 %v5934_v11, %v1192_v12  ;;  %v1846_v54 = vadd.f32 %v5937_v57, %v1831_v46  ;;  %v3040_v51 = vrot.slane %v3036_v25, 1  ;;  %v5940_v5 = vld [vmem:[#allocation89_spill] sm:$0xff]  ;;  %v5942_v25 = vld [vmem:[#allocation134_spill] sm:$0xff]  ;;  %v5946_v46 = vld [vmem:[#allocation92_spill] sm:$0xff] }
 0x30d   : > { %v5408_v1 = vpop.permute.xlu2 %2546  ;;  %v2456_v26 = vadd.f32 %v2451_v55, %v2444_v20  ;;  %v1525_v12 = vadd.f32 %v1520_v19, %v1514_v62  ;;  %v2511_v36 = vmul.f32 -0.2398233, %v3911_v8  ;;  %v5441_v20 = vmul.f32 -0.2398233, %v3923_v17  ;;  %v5945_v10 = vld [vmem:[#allocation125_spill] sm:$0xff]  ;;  %v5948_v57 = vld [vmem:[#allocation128_spill] sm:$0xff] }
 0x30e   : > { %v1856_v58 = vadd.f32 %v1853_v13, %v1845_v24  ;;  %v1857_v41 = vadd.f32 %v1852_v18, %v1846_v54  ;;  %v2744_v19 = vmul.f32 -0.19349597, %v3909_v7  ;;  %v2745_v33 = vmul.f32 -0.19349597, %v3921_v16 }
 0x30f   : > { %v2468_v44 = vadd.f32 %v5308_v32, %v2456_v26  ;;  %v1208_v32 = vadd.f32 %v5935_v45, %v5360_v31  ;;  %v3039_v31 = vrot.slane %v3035_v43, 1  ;;  %v1540_v27 = vadd.f32 %v5939_v29, %v1525_v12 }
 0x310   : > { %v1539_v26 = vadd.f32 %v5940_v5, %v1524_v23  ;;  %v2515_v43 = vrot.slane %v2511_v36, 2  ;;  %v2516_v60 = vrot.slane %v5441_v20, 2  ;;  %v893_v18 = vadd.f32 %v5943_v49, %v878_v0 }
 0x311   : > { %2725 = vrot.lane.b32.xlu1 %v2724_v21, %s3753_s24  ;;  %v2479_v47 = vadd.f32 %v2476_v28, %v2468_v44  ;;  %v3041_v3 = vsel %vm454_vm0, %v3039_v31, %v3040_v51  ;;  %v5941_v28 = vld [vmem:[#allocation56_spill] sm:$0xff]  ;;  %v1871_v2 = vadd.f32 %v5945_v10, %v1856_v58  ;;  %v1555_v11 = vadd.f32 %v5946_v46, %v1540_v27 }
 0x312   : > { %2712 = vrot.lane.b32.xlu0 %v2708_v50, %s3752_s18  ;;  %v1222_v50 = vadd.f32 %v5938_v59, %v1207_v35  ;;  %v1223_v44 = vadd.f32 %v5941_v28, %v1208_v32  ;;  %v1554_v62 = vadd.f32 %v5944_v61, %v1539_v26  ;;  %v2748_v35 = vrot.slane %v2744_v19, 2 }
 0x313   : > { %2727 = vrot.lane.b32.xlu2 %v2723_v30, %s3753_s24  ;;  %v2489_v38 = vpop.permute.xlu1 %2488  ;;  %v3055_v30 = vrot.slane %v5431_v63, 1  ;;  %v2749_v45 = vrot.slane %v2745_v33, 2  ;;  %v1886_v24 = vadd.f32 %v5947_v22, %v1871_v2  ;;  %v1557_v12 = vand.u32 2147483647, %v1555_v11 }
 0x314   : > { %v2494_v40 = vadd.f32 %v2489_v38, %v2479_v47  ;;  %v2465_v53 = vpop.permute.xlu0 %2464  ;;  %v1224_v32 = vand.u32 2147483647, %v1222_v50  ;;  %v1225_v63 = vand.u32 2147483647, %v1223_v44  ;;  %v2517_v47 = vsel %vm476_vm1, %v2515_v43, %v2516_v60 }
 0x315   : > { %v5437_v52 = vpop.permute.xlu2 %2574  ;;  %v2469_v55 = vadd.f32 %v2465_v53, %v2457_v4  ;;  %v3056_v21 = vsel %vm454_vm0, %v3054_v48, %v3055_v30  ;;  %v1872_v4 = vadd.f32 %v5942_v25, %v1857_v41  ;;  %v894_v38 = vand.u32 2147483647, %v5329_v39 }
 0x316   : > { %v1556_v31 = vand.u32 2147483647, %v1554_v62  ;;  %v2750_v53 = vsel %vm476_vm1, %v2748_v35, %v2749_v45  ;;  %v2760_v36 = vmul.f32 -0.023993667, %v3921_v16  ;;  %v2759_v20 = vmul.f32 -0.023993667, %v3909_v7 }
 0x317   : > { %v2480_v37 = vadd.f32 %v2475_v34, %v2469_v55  ;;  %v1887_v54 = vadd.f32 %v5948_v57, %v1872_v4  ;;  %v1226_v59 = vadd.f32 %v1224_v32, %v894_v38  ;;  %v1888_v50 = vand.u32 2147483647, %v1886_v24 }
 0x318   : > { %v3076_v55 = vmul.f32 -0.047637675, %v3909_v7  ;;  %v2220_v39 = vand.u32 2147483647, %v5107_v56  ;;  %v3077_v19 = vmul.f32 -0.047637675, %v3921_v16 }
 0x319   : > { %3044 = vrot.lane.b32.xlu1 %v3040_v51, %s3752_s18  ;;  %v2495_v34 = vadd.f32 %v5344_v9, %v2480_v37  ;;  %v895_v51 = vand.u32 2147483647, %v893_v18  ;;  %v1889_v27 = vand.u32 2147483647, %v1887_v54  ;;  %v1558_v41 = vadd.f32 %v1556_v31, %v1226_v59 }
 0x31a   : > { %3042 = vrot.lane.b32.xlu0 %v3041_v3, %s3752_s18  ;;  %v2764_v5 = vrot.slane %v2760_v36, 2  ;;  %v2763_v26 = vrot.slane %v2759_v20, 2  ;;  %v3080_v28 = vrot.slane %v3076_v55, 2  ;;  %v3081_v18 = vrot.slane %v3077_v19, 2 }
 0x31b   : > { %3057 = vrot.lane.b32.xlu2 %v3056_v21, %s3753_s24  ;;  %v2506_v0 = vpop.permute.xlu1 %2505  ;;  %v1227_v29 = vadd.f32 %v1225_v63, %v895_v51  ;;  %v1890_v37 = vadd.f32 %v1888_v50, %v1558_v41  ;;  %v3091_v62 = vmul.f32 0.016333995, %v3909_v7  ;;  %v3092_v10 = vmul.f32 0.016333995, %v3921_v16 }
 0x31c   : > { %v2510_v13 = vadd.f32 %v2506_v0, %v2495_v34  ;;  %v2504_v23 = vpop.permute.xlu0 %2503  ;;  %v2582_v2 = vmul.f32 -0.004980097, %v3907_v6  ;;  %v2583_v34 = vmul.f32 -0.004980097, %v3919_v15  ;;  %v3082_v46 = vsel %vm476_vm1, %v3080_v28, %v3081_v18 }
 0x31d   : > { %v5465_v9 = vpop.permute.xlu2 %2602  ;;  %v2509_v48 = vadd.f32 %v2504_v23, %v2494_v40  ;;  %v1559_v33 = vadd.f32 %v1557_v12, %v1227_v29  ;;  %v2222_v43 = vadd.f32 %v2220_v39, %v1890_v37  ;;  %v3095_v32 = vrot.slane %v3091_v62, 2 }
 0x31e   : > { %v2521_v21 = vadd.f32 %v2516_v60, %v2510_v13  ;;  %v3096_v22 = vrot.slane %v3092_v10, 2  ;;  %v2586_v24 = vrot.slane %v2582_v2, 1  ;;  %v2587_v0 = vrot.slane %v2583_v34, 1 }
 0x31f   : > { %v2520_v58 = vadd.f32 %v2517_v47, %v2509_v48  ;;  %v1891_v44 = vadd.f32 %v1889_v27, %v1559_v33  ;;  %v2557_v23 = vmul.f32 -0.053000845, %v3919_v15  ;;  %v2779_v50 = vmul.f32 -0.104286015, %v3923_v17 }
 0x320   : > { %v3097_v47 = vsel %vm476_vm1, %v3095_v32, %v3096_v22  ;;  %v2588_v51 = vsel %vm454_vm0, %v2586_v24, %v2587_v0  ;;  %v2790_v55 = vmul.f32 0.061312314, %v3911_v8  ;;  %v2888_v41 = vmul.f32 -0.047433298, %v3907_v6 }
 0x321   : > { %2751 = vrot.lane.b32.xlu1 %v2750_v53, %s3752_s18  ;;  %v2535_v40 = vadd.f32 %v5378_v14, %v2520_v58  ;;  %v2221_v14 = vand.u32 2147483647, %v5124_v42  ;;  %v2778_v58 = vmul.f32 -0.104286015, %v3911_v8  ;;  %v3111_v28 = vmul.f32 -0.047181316, %v3923_v17 }
 0x322   : > { %3059 = vrot.lane.b32.xlu0 %v3055_v30, %s3753_s24  ;;  %v2765_v30 = vsel %vm476_vm1, %v2763_v26, %v2764_v5  ;;  %v5538_v24 = vmul.f32 0.16432516, %v3919_v15 }
 0x323   : > { %2753 = vrot.lane.b32.xlu2 %v2749_v45, %s3752_s18  ;;  %v2545_v3 = vpop.permute.xlu1 %2544  ;;  %v2223_v42 = vadd.f32 %v2221_v14, %v1891_v44  ;;  %v2556_v45 = vmul.f32 -0.053000845, %v3907_v6  ;;  %v2914_v14 = vmul.f32 0.10868307, %v3907_v6 }
 0x324   : > { %v2550_v25 = vadd.f32 %v2545_v3, %v2535_v40  ;;  %v2532_v56 = vpop.permute.xlu0 %2531  ;;  %v3110_v3 = vmul.f32 -0.047181316, %v3911_v8 }
 0x325   : > { %v5478_v4 = vpop.permute.xlu2 %2906  ;;  %v2536_v49 = vadd.f32 %v2532_v56, %v2521_v21  ;;  %v2791_v21 = vmul.f32 0.061312314, %v3923_v17  ;;  %v2915_v56 = vmul.f32 0.10868307, %v3919_v15  ;;  %v2918_v2 = vrot.slane %v2914_v14, 1 }
 0x326   : > { %v2552_v61 = vand.u32 2147483647, %v2550_v25 }
 0x327   : > { %v2551_v60 = vadd.f32 %v5408_v1, %v2536_v49  ;;  %v2814_v49 = vmul.f32 -0.043686833, %v3923_v17 }
 0x328   : > { %v5488_v11 = vadd.f32 %v2552_v61, %v2222_v43  ;;  %v2813_v43 = vmul.f32 -0.043686833, %v3911_v8 }
 0x329   : > { %v2553_v35 = vand.u32 2147483647, %v2551_v60  ;;  %2768 = vrot.lane.b32.xlu1 %v2764_v5, %s3753_s24  ;;  %v3123_v60 = vmul.f32 0.13779509, %v3923_v17  ;;  %v2818_v32 = vrot.slane %v2814_v49, 1 }
 0x32a   : > { %2766 = vrot.lane.b32.xlu0 %v2765_v30, %s3753_s24  ;;  %v2919_v30 = vrot.slane %v2915_v56, 1 }
 0x32b   : > { %3083 = vrot.lane.b32.xlu2 %v3082_v46, %s3752_s18  ;;  %v2565_v1 = vpop.permute.xlu1 %2564  ;;  %v5494_v63 = vadd.f32 %v2553_v35, %v2223_v42  ;;  %v2623_v46 = vmul.f32 0.16473392, %v3907_v6  ;;  %v3122_v35 = vmul.f32 0.13779509, %v3911_v8 }
 0x32c   : > { %v2563_v57 = vpop.permute.xlu0 %2562  ;;  %v2569_v48 = vadd.f32 %v2565_v1, %v2557_v23  ;;  %v2955_v1 = vmul.f32 0.16432516, %v3907_v6 }
 0x32d   : > { %v2618_v54 = vpop.permute.xlu2 %2617  ;;  %v2568_v13 = vadd.f32 %v2563_v57, %v2556_v45  ;;  %v2828_v45 = vmul.f32 0.051984172, %v3911_v8  ;;  %v2920_v57 = vsel %vm454_vm0, %v2918_v2, %v2919_v30  ;;  %v2869_v2 = vmul.f32 0.035145506, %v3911_v8 }
 0x32f   : > { %v2580_v38 = vadd.f32 %v5437_v52, %v2568_v13  ;;  %v5507_v52 = vmul.f32 0.16473392, %v3919_v15  ;;  %v2627_v13 = vrot.slane %v2623_v46, 2  ;;  %v3187_v46 = vmul.f32 -0.019550582, %v3923_v17 }
 0x331   : > { %3098 = vrot.lane.b32.xlu1 %v3097_v47, %s3753_s24  ;;  %v2591_v31 = vadd.f32 %v2588_v51, %v2580_v38  ;;  %v2628_v39 = vrot.slane %v5507_v52, 2  ;;  %v2959_v38 = vrot.slane %v2955_v1, 2  ;;  %v2960_v51 = vrot.slane %v5538_v24, 2 }
 0x332   : > { %3085 = vrot.lane.b32.xlu0 %v3081_v18, %s3752_s18 }
 0x333   : > { %3100 = vrot.lane.b32.xlu2 %v3096_v22, %s3753_s24  ;;  %v2601_v12 = vpop.permute.xlu1 %2600  ;;  %v2829_v22 = vmul.f32 0.051984172, %v3923_v17 }
 0x334   : > { %v2606_v53 = vadd.f32 %v2601_v12, %v2591_v31  ;;  %v2577_v36 = vpop.permute.xlu0 %2576 }
 0x335   : > { %v5503_v20 = vpop.permute.xlu2 %2947  ;;  %v2581_v59 = vadd.f32 %v2577_v36, %v2569_v48  ;;  %v2833_v23 = vrot.slane %v2829_v22, 1 }
 0x337   : > { %v2592_v29 = vadd.f32 %v2587_v0, %v2581_v59  ;;  %v2961_v59 = vsel %vm476_vm1, %v2959_v38, %v2960_v51  ;;  %v3191_v38 = vrot.slane %v3187_v46, 2 }
 0x339   : > { %v2607_v27 = vadd.f32 %v5465_v9, %v2592_v29  ;;  %2784 = vrot.lane.b32.xlu1 %v2779_v50, %s3752_s18  ;;  %v2889_v9 = vmul.f32 -0.047433298, %v3919_v15  ;;  %v2629_v50 = vsel %vm476_vm1, %v2627_v13, %v2628_v39  ;;  %v3160_v29 = vmul.f32 -0.07871928, %v3911_v8 }
 0x33a   : > { %2782 = vrot.lane.b32.xlu0 %v2778_v58, %s3752_s18  ;;  %v3146_v58 = vmul.f32 0.23103635, %v3923_v17 }
 0x33b   : > { %2794 = vrot.lane.b32.xlu2 %v2790_v55, %s3753_s24  ;;  %v2897_v40 = vpop.permute.xlu1 %2896  ;;  %v2622_v19 = vadd.f32 %v2618_v54, %v2607_v27  ;;  %v2832_v54 = vrot.slane %v2828_v45, 1  ;;  %v3145_v55 = vmul.f32 0.23103635, %v3911_v8 }
 0x33c   : > { %v2895_v33 = vpop.permute.xlu0 %2894  ;;  %v2901_v18 = vadd.f32 %v2897_v40, %v2889_v9 }
 0x33d   : > { %v2644_v5 = vpop.permute.xlu2 %2643  ;;  %v2900_v26 = vadd.f32 %v2895_v33, %v2888_v41  ;;  %v2633_v37 = vadd.f32 %v2628_v39, %v2622_v19  ;;  %v2834_v36 = vsel %vm454_vm0, %v2832_v54, %v2833_v23  ;;  %v3161_v41 = vmul.f32 -0.07871928, %v3923_v17 }
 0x33e   : > { %v3150_v33 = vrot.slane %v3146_v58, 1  ;;  %v3201_v54 = vmul.f32 0.056581784, %v3911_v8 }
 0x33f   : > { %v2912_v44 = vadd.f32 %v5478_v4, %v2900_v26  ;;  %v5522_v25 = vadd.f32 %v2644_v5, %v2633_v37  ;;  %v2817_v4 = vrot.slane %v2813_v43, 1  ;;  %v3164_v5 = vrot.slane %v3160_v29, 1 }
 0x340   : > { %v3205_v58 = vrot.slane %v3201_v54, 2 }
 0x341   : > { %3114 = vrot.lane.b32.xlu1 %v3110_v3, %s3752_s18  ;;  %v2819_v0 = vsel %vm454_vm0, %v2817_v4, %v2818_v32  ;;  %v2923_v15 = vadd.f32 %v2920_v57, %v2912_v44  ;;  %v2855_v44 = vmul.f32 0.138898, %v3923_v17  ;;  %v2664_v57 = vmul.f32 0.004767273, %v3909_v7 }
 0x342   : > { %2796 = vrot.lane.b32.xlu0 %v2791_v21, %s3753_s24  ;;  %v3165_v21 = vrot.slane %v3161_v41, 1 }
 0x343   : > { %3116 = vrot.lane.b32.xlu2 %v3111_v28, %s3752_s18  ;;  %v2616_v61 = vpop.permute.xlu1 %2615  ;;  %v2854_v28 = vmul.f32 0.138898, %v3911_v8  ;;  %v2859_v49 = vrot.slane %v2855_v44, 2 }
 0x344   : > { %v2621_v62 = vadd.f32 %v2616_v61, %v2606_v53  ;;  %v2909_v10 = vpop.permute.xlu0 %2908  ;;  %v3166_v43 = vsel %vm454_vm0, %v3164_v5, %v3165_v21 }
 0x345   : > { %v2974_v34 = vpop.permute.xlu2 %2973  ;;  %v2913_v42 = vadd.f32 %v2909_v10, %v2901_v18  ;;  %v2858_v14 = vrot.slane %v2854_v28, 2 }
 0x346   : > { %v2632_v40 = vadd.f32 %v2629_v50, %v2621_v62 }
 0x347   : > { %v2924_v47 = vadd.f32 %v2919_v30, %v2913_v42  ;;  %v2860_v10 = vsel %vm476_vm1, %v2858_v14, %v2859_v49  ;;  %v2665_v42 = vmul.f32 0.004767273, %v3921_v16 }
 0x349   : > { %3128 = vrot.lane.b32.xlu1 %v3123_v60, %s3753_s24  ;;  %v2870_v60 = vmul.f32 0.035145506, %v3923_v17 }
 0x34a   : > { %3126 = vrot.lane.b32.xlu0 %v3122_v35, %s3753_s24 }
 0x34b   : > { %2820 = vrot.lane.b32.xlu2 %v2819_v0, %s3752_s18  ;;  %v2935_v6 = vpop.permute.xlu1 %2934  ;;  %v2874_v45 = vrot.slane %v2870_v60, 2  ;;  %v2997_v0 = vmul.f32 -0.04725877, %v3921_v16 }
 0x34c   : > { %v2939_v31 = vadd.f32 %v2935_v6, %v2924_v47  ;;  %v2933_v48 = vpop.permute.xlu0 %2932  ;;  %v311_v6 = vld [vmem:[%s3895_s4] sm:$0xff] }
 0x34d   : > { %v5546_v12 = vpop.permute.xlu2 %2990  ;;  %v2938_v53 = vadd.f32 %v2933_v48, %v2923_v15  ;;  %v312_v15 = vld [vmem:[%s3895_s4 + $0x8] sm:$0xff]  ;;  %v327_v48 = vadd.f32 1e-08, %v311_v6 }
 0x34e   : > { %v328_v50 = vadd.f32 1e-08, %v312_v15 }
 0x34f   : > { %v2953_v52 = vadd.f32 %v5503_v20, %v2938_v53  ;;  %v3149_v20 = vrot.slane %v3145_v55, 1  ;;  %3562 = vlog2.f32 %v327_v48 }
 0x350   : > { %3564 = vlog2.f32 %v328_v50 }
 0x351   : > { %2835 = vrot.lane.b32.xlu1 %v2834_v36, %s3753_s24  ;;  %v2964_v27 = vadd.f32 %v2961_v59, %v2953_v52  ;;  %v3151_v56 = vsel %vm454_vm0, %v3149_v20, %v3150_v33 }
 0x352   : > { %2822 = vrot.lane.b32.xlu0 %v2818_v32, %s3752_s18  ;;  %v2873_v32 = vrot.slane %v2869_v2, 2 }
 0x353   : > { %2837 = vrot.lane.b32.xlu2 %v2833_v23, %s3753_s24  ;;  %v2979_v19 = vadd.f32 %v2974_v34, %v2964_v27  ;;  %v2642_v39 = vpop.permute.xlu1 %2641  ;;  %v3186_v34 = vmul.f32 -0.019550582, %v3911_v8  ;;  %v3202_v23 = vmul.f32 0.056581784, %v3923_v17 }
 0x354   : > { %v2647_v26 = vadd.f32 %v2642_v39, %v2632_v40  ;;  %v2950_v37 = vpop.permute.xlu0 %2949  ;;  %v2875_v36 = vsel %vm476_vm1, %v2873_v32, %v2874_v45  ;;  %v5949_v39 = vmov 0.0  }
 0x355   : > { %v5559_v3 = vpop.permute.xlu2 %2684  ;;  %v2954_v9 = vadd.f32 %v2950_v37, %v2939_v31  ;;  %v3190_v22 = vrot.slane %v3186_v34, 2  ;;  %v2693_v31 = vmul.f32 0.06131891, %v3921_v16  ;;  %v3206_v55 = vrot.slane %v3202_v23, 2  ;;  %309 = vst.msk [vmem:[#allocation4] sm:$0xff] %vm308_vm6, %v5949_v39 }
 0x356   : > { %310 = vst.msk [vmem:[#allocation4 + $0x8] sm:$0xff] %vm308_vm6, %v5949_v39 }
 0x357   : > { %v2965_v35 = vadd.f32 %v2960_v51, %v2954_v9  ;;  %v2692_v51 = vmul.f32 0.06131891, %v3909_v7  ;;  %v3192_v59 = vsel %vm476_vm1, %v3190_v22, %v3191_v38  ;;  %v2697_v41 = vrot.slane %v2693_v31, 1  ;;  %305 = vst.msk [vmem:[#allocation3] sm:$0xff] %vm304_vm7, %v5949_v39 }
 0x358   : > { %v3207_v37 = vsel %vm476_vm1, %v3205_v58, %v3206_v55  ;;  %307 = vst.msk [vmem:[#allocation3 + $0x8] sm:$0x3f] %vm306_vm8, %v5949_v39  ;;  %v3176_v39 = vmul.f32 0.05802844, %v3923_v17 }
 0x359   : > { %3154 = vrot.lane.b32.xlu1 %v3150_v33, %s3752_s18  ;;  %v2696_v27 = vrot.slane %v2692_v51, 1 }
 0x35a   : > { %3152 = vrot.lane.b32.xlu0 %v3151_v56, %s3752_s18 }
 0x35b   : > { %3167 = vrot.lane.b32.xlu2 %v3166_v43, %s3753_s24  ;;  %v2659_v18 = vpop.permute.xlu1 %2658  ;;  %v2698_v9 = vsel %vm454_vm0, %v2696_v27, %v2697_v41 }
 0x35c   : > { %v2663_v61 = vadd.f32 %v2659_v18, %v5522_v25  ;;  %v2657_v30 = vpop.permute.xlu0 %2656 }
 0x35d   : > { %v3007_v4 = vpop.permute.xlu2 %3006  ;;  %v2662_v62 = vadd.f32 %v2657_v30, %v2647_v26  ;;  %v3563_v26 = vpop.eup %3562  ;;  %v325_v30 = vld [vmem:[#allocation4] sm:$0xff]  ;;  %v326_v60 = vld [vmem:[#allocation4 + $0x8] sm:$0xff] }
 0x35e   : > { %v2667_v29 = vadd.f32 %v2665_v42, %v2663_v61  ;;  %v3565_v44 = vpop.eup %3564  ;;  %v330_v43 = vmul.f32 0.6931472, %v3563_v26 }
 0x35f   : > { %v332_v14 = vmul.f32 0.6931472, %v3565_v44 }
 0x360   : > { %v333_v18 = vsub.f32 0.0, %v330_v43 }
 0x361   : > { %2861 = vrot.lane.b32.xlu1 %v2860_v10, %s3752_s18 }
 0x362   : > { %3169 = vrot.lane.b32.xlu0 %v3165_v21, %s3753_s24  ;;  %v2996_v21 = vmul.f32 -0.04725877, %v3909_v7  ;;  %v335_v2 = vadd.f32 %v333_v18, %v325_v30  ;;  %v3066_v30 = vmul.f32 0.08061393, %v3921_v16 }
 0x363   : > { %2863 = vrot.lane.b32.xlu2 %v2859_v49, %s3752_s18  ;;  %v2989_v25 = vpop.permute.xlu1 %2988 }
 0x364   : > { %v2994_v1 = vadd.f32 %v2989_v25, %v2979_v19  ;;  %v2976_v24 = vpop.permute.xlu0 %2975  ;;  %v2666_v19 = vadd.f32 %v2664_v57, %v2662_v62  ;;  %338 = vst.msk [vmem:[#allocation4] sm:$0xff] %vm308_vm6, %v335_v2 }
 0x365   : > { %v2711_v13 = vpop.permute.xlu2 %2710  ;;  %v2980_v47 = vadd.f32 %v2976_v24, %v2965_v35  ;;  %v3025_v24 = vmul.f32 -0.06134179, %v3921_v16 }
 0x366   : > { %v2998_v61 = vadd.f32 %v2996_v21, %v2994_v1  ;;  %v2734_v21 = vmul.f32 0.10288544, %v3921_v16  ;;  %v2775_v16 = vmul.f32 -0.02045225, %v3923_v17 }
 0x367   : > { %v2995_v53 = vadd.f32 %v5546_v12, %v2980_v47  ;;  %v3029_v23 = vrot.slane %v3025_v24, 1 }
 0x369   : > { %2878 = vrot.lane.b32.xlu1 %v2874_v45, %s3753_s24  ;;  %v2999_v52 = vadd.f32 %v2997_v0, %v2995_v53 }
 0x36a   : > { %2876 = vrot.lane.b32.xlu0 %v2875_v36, %s3753_s24 }
 0x36b   : > { %3193 = vrot.lane.b32.xlu2 %v3192_v59, %s3752_s18  ;;  %v3011_v12 = vadd.f32 %v3007_v4, %v2999_v52  ;;  %v2675_v40 = vpop.permute.xlu1 %2674  ;;  %v334_v4 = vsub.f32 0.0, %v332_v14  ;;  %v3231_v53 = vld [vmem:[#allocation4] sm:$0xff] }
 0x36c   : > { %v2679_v33 = vadd.f32 %v2675_v40, %v2667_v29  ;;  %v2673_v20 = vpop.permute.xlu0 %2672  ;;  %v3233_v52 = vsel %vm308_vm6, %v3231_v53, 0.0 }
 0x36d   : > { %v2678_v5 = vadd.f32 %v2673_v20, %v2666_v19  ;;  %v2728_v28 = vpop.permute.xlu2 %2727 }
 0x36f   : > { %v2690_v56 = vadd.f32 %v5559_v3, %v2678_v5  ;;  %v336_v3 = vadd.f32 %v334_v4, %v326_v60 }
 0x371   : > { %3208 = vrot.lane.b32.xlu1 %v3207_v37, %s3753_s24  ;;  %v2701_v49 = vadd.f32 %v2698_v9, %v2690_v56  ;;  %339 = vst.msk [vmem:[#allocation4 + $0x8] sm:$0xff] %vm308_vm6, %v336_v3  ;;  %v3024_v37 = vmul.f32 -0.06134179, %v3909_v7 }
 0x372   : > { %3195 = vrot.lane.b32.xlu0 %v3191_v38, %s3752_s18  ;;  %s3307_s18 = scalar_lea.sflag [#allocation7], %s3891_s20 }
 0x373   : > { %3210 = vrot.lane.b32.xlu2 %v3206_v55, %s3753_s24  ;;  %v2716_v62 = vadd.f32 %v2711_v13, %v2701_v49  ;;  %v3005_v10 = vpop.permute.xlu1 %3004  ;;  %v3028_v9 = vrot.slane %v3024_v37, 1  ;;  %v2738_v49 = vrot.slane %v2734_v21, 2  ;;  %s3676_s24 = sshra.s32 %s3322_s16, 4  ;;  %s3677_s24 = int_to_ptr.hbm [resolvable:$true] %s3676_s24 }
 0x374   : > { %v3010_v34 = vadd.f32 %v3005_v10, %v2998_v61  ;;  %v2687_v46 = vpop.permute.xlu0 %2686  ;;  %v3065_v61 = vmul.f32 0.08061393, %v3909_v7  ;;  %s3678_s28 = scalar_lea.hbm %s3677_s24, 8  ;;  %p3683_p7 = scmp.lt.s32.totalorder %s3677_s24, %s5697_s3 }
 0x375   : > { %v2691_v42 = vadd.f32 %v2687_v46, %v2679_v33  ;;  %v3058_v25 = vpop.permute.xlu2 %3057  ;;  %v3030_v14 = vsel %vm454_vm0, %v3028_v9, %v3029_v23  ;;  %p3679_p4 = scmp.ne.s32.totalorder %s3677_s24, %s3678_s28 }
 0x376   : > { %v3069_v2 = vrot.slane %v3065_v61, 2 }
 0x377   : > { %v2702_v57 = vadd.f32 %v2697_v41, %v2691_v42  ;;  %v5950_v41 = vld [vmem:[#allocation22_spill] sm:$0xff]  ;;  %p3680_p5 = pnand %p3679_p4, %p3835_p9 }
 0x378   : > { %v3232_v36 = vld [vmem:[#allocation4 + $0x8] sm:$0xff] }
 0x379   : > { %v3234_v58 = vsel %vm308_vm6, %v3232_v36, 0.0  ;;  %p3681_p6 = pneg %p3680_p5 }
 0x37a   : > { %v3235_v29 = vadd.f32 %v3234_v58, %v3233_v52 }
 0x37b   : > { %v3019_v35 = vpop.permute.xlu1 %3018 }
 0x37c   : > { %v3023_v45 = vadd.f32 %v3019_v35, %v3011_v12  ;;  %v3017_v32 = vpop.permute.xlu0 %3016 }
 0x37d   : > { %v3022_v22 = vadd.f32 %v3017_v32, %v3010_v34  ;;  %v2754_v1 = vpop.permute.xlu2 %2753  ;;  %v3070_v34 = vrot.slane %v3066_v30, 2 }
 0x37e   : > { %v3034_v6 = vadd.f32 %v3029_v23, %v3023_v45  ;;  %v2803_v23 = vmul.f32 -0.02003297, %v3923_v17 }
 0x37f   : > { %v3033_v4 = vadd.f32 %v3030_v14, %v3022_v22  ;;  %v3071_v24 = vsel %vm476_vm1, %v3069_v2, %v3070_v34 }
 0x380   : > { %v2807_v58 = vrot.slane %v2803_v23, 1 }
 0x383   : > { %v2726_v0 = vpop.permute.xlu1 %2725 }
 0x384   : > { %v2731_v54 = vadd.f32 %v2726_v0, %v2716_v62  ;;  %v2713_v13 = vpop.permute.xlu0 %2712 }
 0x385   : > { %v2717_v47 = vadd.f32 %v2713_v13, %v2702_v57  ;;  %v3084_v48 = vpop.permute.xlu2 %3083  ;;  %v2774_v57 = vmul.f32 -0.02045225, %v3911_v8 }
 0x387   : > { %v2732_v38 = vadd.f32 %v2728_v28, %v2717_v47  ;;  %v2733_v28 = vmul.f32 0.10288544, %v3909_v7 }
 0x389   : > { %v2737_v18 = vrot.slane %v2733_v28, 2  ;;  %v2743_v62 = vadd.f32 %v2738_v49, %v2732_v38 }
 0x38b   : > { %v3045_v15 = vpop.permute.xlu1 %3044  ;;  %v2739_v60 = vsel %vm476_vm1, %v2737_v18, %v2738_v49  ;;  %v2758_v35 = vadd.f32 %v2754_v1, %v2743_v62  ;;  %v2843_v18 = vmul.f32 -0.047657903, %v3911_v8 }
 0x38c   : > { %v3049_v51 = vadd.f32 %v3045_v15, %v3034_v6  ;;  %v3043_v31 = vpop.permute.xlu0 %3042  ;;  %v2742_v42 = vadd.f32 %v2739_v60, %v2731_v54  ;;  %v2802_v54 = vmul.f32 -0.02003297, %v3911_v8 }
 0x38d   : > { %v5608_v55 = vpop.permute.xlu2 %3100  ;;  %v3048_v10 = vadd.f32 %v3043_v31, %v3033_v4  ;;  %v2847_v2 = vrot.slane %v2843_v18, 2 }
 0x38f   : > { %v3063_v45 = vadd.f32 %v3058_v25, %v3048_v10 }
 0x391   : > { %v3074_v13 = vadd.f32 %v3071_v24, %v3063_v45 }
 0x393   : > { %v2752_v59 = vpop.permute.xlu1 %2751  ;;  %v3089_v15 = vadd.f32 %v3084_v48, %v3074_v13 }
 0x394   : > { %v3060_v50 = vpop.permute.xlu0 %3059  ;;  %v2757_v0 = vadd.f32 %v2752_v59, %v2742_v42  ;;  %v2806_v59 = vrot.slane %v2802_v54, 1  ;;  %v3175_v42 = vmul.f32 0.05802844, %v3911_v8 }
 0x395   : > { %v2795_v40 = vpop.permute.xlu2 %2794  ;;  %v3064_v47 = vadd.f32 %v3060_v50, %v3049_v51  ;;  %v3135_v50 = vmul.f32 0.013573073, %v3923_v17 }
 0x396   : > { %v2808_v21 = vsel %vm454_vm0, %v2806_v59, %v2807_v58 }
 0x397   : > { %v3075_v53 = vadd.f32 %v3070_v34, %v3064_v47  ;;  %v3139_v14 = vrot.slane %v3135_v50, 1 }
 0x39b   : > { %v2769_v27 = vpop.permute.xlu1 %2768  ;;  %3259 = vadd.xlane.f32.xlu1 %v5950_v41 }
 0x39c   : > { %v2767_v12 = vpop.permute.xlu0 %2766  ;;  %3236 = vadd.xlane.f32.xlu0 %v3235_v29  ;;  %v2773_v7 = vadd.f32 %v2769_v27, %v2758_v35  ;;  %v3106_v29 = vmul.f32 -0.12926462, %v3911_v8 }
 0x39d   : > { %v5611_v20 = vpop.permute.xlu2 %3116  ;;  %v2772_v22 = vadd.f32 %v2767_v12, %v2757_v0  ;;  %v3134_v12 = vmul.f32 0.013573073, %v3911_v8 }
 0x39e   : > { %v2777_v25 = vadd.f32 %v2775_v16, %v2773_v7 }
 0x39f   : > { %v2776_v6 = vadd.f32 %v2774_v57, %v2772_v22  ;;  %v3179_v22 = vrot.slane %v3175_v42, 2  ;;  %v3180_v57 = vrot.slane %v3176_v39, 2 }
 0x3a3   : > { %v3099_v19 = vpop.permute.xlu1 %3098 }
 0x3a4   : > { %v3086_v33 = vpop.permute.xlu0 %3085  ;;  %v3104_v52 = vadd.f32 %v3099_v19, %v3089_v15 }
 0x3a5   : > { %v5616_v56 = vpop.permute.xlu2 %2820  ;;  %v3090_v51 = vadd.f32 %v3086_v33, %v3075_v53 }
 0x3a6   : > { %v3108_v48 = vadd.f32 %v3106_v29, %v3104_v52 }
 0x3a7   : > { %v3105_v19 = vadd.f32 %v5608_v55, %v3090_v51 }
 0x3ab   : > { %v2785_v5 = vpop.permute.xlu1 %2784 }
 0x3ac   : > { %v2783_v26 = vpop.permute.xlu0 %2782  ;;  %v2789_v31 = vadd.f32 %v2785_v5, %v2777_v25 }
 0x3ad   : > { %v2838_v32 = vpop.permute.xlu2 %2837  ;;  %v2788_v36 = vadd.f32 %v2783_v26, %v2776_v6  ;;  %v3107_v26 = vmul.f32 -0.12926462, %v3923_v17 }
 0x3af   : > { %v2800_v37 = vadd.f32 %v2795_v40, %v2788_v36  ;;  %v2844_v40 = vmul.f32 -0.047657903, %v3923_v17  ;;  %v3109_v4 = vadd.f32 %v3107_v26, %v3105_v19  ;;  %v3181_v17 = vsel %vm476_vm1, %v3179_v22, %v3180_v57 }
 0x3b1   : > { %v2811_v61 = vadd.f32 %v2808_v21, %v2800_v37  ;;  %v2848_v55 = vrot.slane %v2844_v40, 2  ;;  %v3121_v24 = vadd.f32 %v5611_v20, %v3109_v4  ;;  %v3220_v37 = vld [vmem:[#allocation3] sm:$0xff]  ;;  %v3758_v40 = vmov 21600.0  }
 0x3b3   : > { %v3115_v44 = vpop.permute.xlu1 %3114  ;;  %v2826_v34 = vadd.f32 %v5616_v56, %v2811_v61  ;;  %v2849_v16 = vsel %vm476_vm1, %v2847_v2, %v2848_v55 }
 0x3b4   : > { %v2797_v43 = vpop.permute.xlu0 %2796  ;;  %v3120_v33 = vadd.f32 %v3115_v44, %v3108_v48 }
 0x3b5   : > { %v2801_v27 = vadd.f32 %v2797_v43, %v2789_v31  ;;  %v3168_v41 = vpop.permute.xlu2 %3167  ;;  %v3138_v43 = vrot.slane %v3134_v12, 1 }
 0x3b7   : > { %v2812_v5 = vadd.f32 %v2807_v58, %v2801_v27  ;;  %v3140_v62 = vsel %vm454_vm0, %v3138_v43, %v3139_v14 }
 0x3bb   : > { %v5622_v46 = vpop.permute.xlu1 %3128 }
 0x3bc   : > { %v3127_v3 = vpop.permute.xlu0 %3126 }
 0x3bd   : > { %v3132_v30 = vadd.f32 %v3127_v3, %v3120_v33  ;;  %v2864_v60 = vpop.permute.xlu2 %2863 }
 0x3bf   : > { %v3143_v35 = vadd.f32 %v3140_v62, %v3132_v30 }
 0x3c3   : > { %v2836_v1 = vpop.permute.xlu1 %2835 }
 0x3c4   : > { %v2823_v38 = vpop.permute.xlu0 %2822  ;;  %v2841_v0 = vadd.f32 %v2836_v1, %v2826_v34 }
 0x3c5   : > { %v2827_v49 = vadd.f32 %v2823_v38, %v2812_v5  ;;  %v3194_v23 = vpop.permute.xlu2 %3193 }
 0x3c6   : > { %v2852_v13 = vadd.f32 %v2849_v16, %v2841_v0 }
 0x3c7   : > { %v2842_v10 = vadd.f32 %v2838_v32, %v2827_v49  ;;  %v3133_v32 = vadd.f32 %v5622_v46, %v3121_v24  ;;  %v3757_v49 = vmov 512.0  }
 0x3c8   : > { %3566 = vrcp.f32 %v3757_v49 }
 0x3c9   : > { %v2853_v3 = vadd.f32 %v2848_v55, %v2842_v10  ;;  %v3144_v8 = vadd.f32 %v3139_v14, %v3133_v32  ;;  %3568 = vrcp.f32 %v3758_v40 }
 0x3cb   : > { %v3155_v9 = vpop.permute.xlu1 %3154  ;;  %v2868_v56 = vadd.f32 %v2864_v60, %v2853_v3 }
 0x3cc   : > { %v3153_v28 = vpop.permute.xlu0 %3152  ;;  %v3159_v1 = vadd.f32 %v3155_v9, %v3144_v8  ;;  %v3759_v8 = vmov 3136.0  }
 0x3cd   : > { %v3158_v7 = vadd.f32 %v3153_v28, %v3143_v35  ;;  %v3211_v51 = vpop.permute.xlu2 %3210  ;;  %v3221_v28 = vld [vmem:[#allocation3 + $0x8] sm:$0x3f]  ;;  %3570 = vrcp.f32 %v3759_v8 }
 0x3ce   : > { %v3567_v18 = vpop.eup %3566 }
 0x3cf   : > { %v3173_v47 = vadd.f32 %v3168_v41, %v3158_v7  ;;  %v3569_v61 = vpop.eup %3568  ;;  %v3246_v30 = vmul.f32 512.0, %v3567_v18  ;;  %vm3250_vm9 = vweird.f32 %v3567_v18 }
 0x3d0   : > { %v3269_v4 = vmul.f32 21600.0, %v3569_v61  ;;  %vm3273_vm10 = vweird.f32 %v3569_v61 }
 0x3d1   : > { %v3184_v15 = vadd.f32 %v3181_v17, %v3173_v47  ;;  %v3247_v10 = vsub.f32 1.0, %v3246_v30 }
 0x3d2   : > { %v3270_v34 = vsub.f32 1.0, %v3269_v4 }
 0x3d3   : > { %v2862_v44 = vpop.permute.xlu1 %2861  ;;  %v3199_v52 = vadd.f32 %v3194_v23, %v3184_v15  ;;  %v3571_v17 = vpop.eup %3570 }
 0x3d4   : > { %v3170_v45 = vpop.permute.xlu0 %3169  ;;  %v2867_v54 = vadd.f32 %v2862_v44, %v2852_v13  ;;  %v3248_v44 = vmul.f32 %v3567_v18, %v3247_v10  ;;  %v3271_v24 = vmul.f32 %v3569_v61, %v3270_v34  ;;  %vm3296_vm11 = vweird.f32 %v3571_v17 }
 0x3d5   : > { %v3174_v53 = vadd.f32 %v3170_v45, %v3159_v1 }
 0x3d6   : > { %v3249_v7 = vadd.f32 %v3567_v18, %v3248_v44  ;;  %v3272_v22 = vadd.f32 %v3569_v61, %v3271_v24 }
 0x3d7   : > { %v3185_v29 = vadd.f32 %v3180_v57, %v3174_v53 }
 0x3d8   : > { %v3251_v13 = vsel %vm3250_vm9, %v3567_v18, %v3249_v7  ;;  %v3274_v47 = vsel %vm3273_vm10, %v3569_v61, %v3272_v22 }
 0x3db   : > { %v2879_v25 = vpop.permute.xlu1 %2878 }
 0x3dc   : > { %v2883_v38 = vadd.f32 %v2879_v25, %v2868_v56  ;;  %v2877_v20 = vpop.permute.xlu0 %2876 }
 0x3dd   : > { %v2882_v6 = vadd.f32 %v2877_v20, %v2867_v54  ;;  %v3292_v54 = vmul.f32 3136.0, %v3571_v17 }
 0x3de   : > { %v2885_v31 = vand.u32 2147483647, %v2883_v38 }
 0x3df   : > { %v2884_v36 = vand.u32 2147483647, %v2882_v6  ;;  %v3293_v25 = vsub.f32 1.0, %v3292_v54 }
 0x3e0   : > { %v2887_v46 = vadd.f32 %v2885_v31, %v5494_v63 }
 0x3e1   : > { %v2886_v59 = vadd.f32 %v2884_v36, %v5488_v11  ;;  %v3294_v1 = vmul.f32 %v3571_v17, %v3293_v25 }
 0x3e3   : > { %v3209_v58 = vpop.permute.xlu1 %3208  ;;  %v3295_v31 = vadd.f32 %v3571_v17, %v3294_v1 }
 0x3e4   : > { %v3214_v27 = vadd.f32 %v3209_v58, %v3199_v52  ;;  %v3196_v41 = vpop.permute.xlu0 %3195 }
 0x3e5   : > { %v3200_v50 = vadd.f32 %v3196_v41, %v3185_v29 }
 0x3e6   : > { %v3216_v12 = vand.u32 2147483647, %v3214_v27 }
 0x3e7   : > { %v3215_v21 = vadd.f32 %v3211_v51, %v3200_v50 }
 0x3e8   : > { %v3218_v9 = vadd.f32 %v3216_v12, %v2886_v59 }
 0x3e9   : > { %v3217_v48 = vand.u32 2147483647, %v3215_v21 }
 0x3ea   : > { %v3222_v5 = vadd.f32 %v3220_v37, %v3218_v9 }
 0x3eb   : > { %v3219_v19 = vadd.f32 %v3217_v48, %v2887_v46  ;;  %v3297_v46 = vsel %vm3296_vm11, %v3571_v17, %v3295_v31 }
 0x3ec   : > { %3225 = vst.msk [vmem:[#allocation3] sm:$0xff] %vm304_vm7, %v3222_v5 }
 0x3ed   : > { %v3223_v63 = vadd.f32 %v3221_v28, %v3219_v19 }
 0x3ef   : > { %3227 = vst.msk [vmem:[#allocation3 + $0x8] sm:$0x3f] %vm306_vm8, %v3223_v63 }
 0x3f3   : > { %v3277_v11 = vld [vmem:[#allocation3] sm:$0xff] }
 0x3f4   : > { %v3279_v14 = vsel %vm304_vm7, %v3277_v11, 0.0 }
 0x3f6   : > { %v3278_v26 = vld [vmem:[#allocation3 + $0x8] sm:$0x3f] }
 0x3f7   : > { %v3280_v43 = vsel %vm306_vm8, %v3278_v26, 0.0 }
 0x3f8   : > { %v3281_v33 = vadd.f32 %v3280_v43, %v3279_v14 }
 0x3fa   : > { %3282 = vadd.xlane.f32.xlu2 %v3281_v33 }
 0x40e   : > { %v3260_v62 = vpop.xlane.xlu1 %3259 }
 0x40f   : > { %v3237_v55 = vpop.xlane.xlu0 %3236  ;;  %v3261_v60 = vrot.slane %v3260_v62, 4 }
 0x410   : > { %v3238_v2 = vrot.slane %v3237_v55, 4 }
 0x411   : > { %v3262_v42 = vadd.f32 %v3261_v60, %v3260_v62 }
 0x412   : > { %v3239_v39 = vadd.f32 %v3238_v2, %v3237_v55 }
 0x413   : > { %v3263_v35 = vrot.slane %v3262_v42, 2 }
 0x414   : > { %v3240_v45 = vrot.slane %v3239_v39, 2 }
 0x415   : > { %v3264_v0 = vadd.f32 %v3263_v35, %v3262_v42 }
 0x416   : > { %v3241_v3 = vadd.f32 %v3240_v45, %v3239_v39 }
 0x417   : > { %v3265_v16 = vrot.slane %v3264_v0, 1 }
 0x418   : > { %v3242_v32 = vrot.slane %v3241_v3, 1 }
 0x419   : > { %v3266_v56 = vadd.f32 %v3265_v16, %v3264_v0 }
 0x41a   : > { %v3243_v57 = vadd.f32 %v3242_v32, %v3241_v3 }
 0x41c   : > { %3468 = vpush %v3243_v57 }
 0x41d   : > { %3470 = vpush %v3251_v13 }
 0x41e   : > { %3472 = vpush %v3266_v56 }
 0x41f   : > { %3474 = vpush %v3274_v47 }
 0x44d   : > { %s3469_s5 = spop %3468 }
 0x44e   : > { %s3471_s19 = spop %3470 }
 0x44f   : > { %s3253_s23 = smul.f32 %s3471_s19, %s3469_s5  ;;  %s3473_s6 = spop %3472 }
 0x450   : > { %s3475_s7 = spop %3474  ;;  %s3682_s19 = scalar_lea.hbm %s5697_s3, 16 }
 0x451   : > { %s3300_s10 = smul.f32 0.001, %s3253_s23  ;;  %p3684_p8 = scmp.lt.s32.totalorder %s3682_s19, %s3678_s28 }
 0x452   : > { %s3276_s1 = smul.f32 %s3475_s7, %s3473_s6 }
 0x453   : > { %p3685_p10 = por %p3684_p8, %p3683_p7 }
 0x454   : > { %s3301_s17 = sadd.f32 %s3300_s10, %s3276_s1 }
 0x455   : > { %p3686_p13 = pnand %p3685_p10, %p3681_p6 }
 0x46d   : > { %v3283_v23 = vpop.xlane.xlu2 %3282 }
 0x46e   : > { %v3284_v38 = vrot.slane %v3283_v23, 4 }
 0x470   : > { %v3285_v20 = vadd.f32 %v3284_v38, %v3283_v23 }
 0x472   : > { %v3286_v6 = vrot.slane %v3285_v20, 2 }
 0x474   : > { %v3287_v15 = vadd.f32 %v3286_v6, %v3285_v20 }
 0x476   : > { %v3288_v53 = vrot.slane %v3287_v15, 1 }
 0x478   : > { %v3289_v36 = vadd.f32 %v3288_v53, %v3287_v15 }
 0x47a   : > { %3476 = vpush %v3289_v36 }
 0x47b   : > { %3478 = vpush %v3297_v46 }
 0x4ab   : > { %s3477_s11 = spop %3476 }
 0x4ac   : > { %s3479_s26 = spop %3478 }
 0x4ad   : > { %s3299_s4 = smul.f32 %s3479_s26, %s3477_s11 }
 0x4af   : > { %s3302_s27 = smul.f32 0.1, %s3299_s4 }
 0x4b1   : > { %s3303_s15 = sadd.f32 %s3302_s27, %s3301_s17 }
 0x4b3   : > { %v3304_v59 = vstv %s3303_s15 }
 0x4b4   : > { %3305 = vst [vmem:[%s292_s12] sm:$0xff] %v3304_v59 }
 0x4b5   : > { %3689 = shalt.err (!%p3686_p13)
}
 0x4b6   : > { %3486 = dma.vmem_to_hbm [thread:$0]  (%p3835_p9), %s3320_s14, 128, %s3322_s16, %s3307_s18  }
 0x4b7 PF: > { %s5951_s20 = sld [smem:[#allocation15_spill]]  ;;  %p3499_p0 = pnand %p3449_p12, %p3842_p11 }
 0x4b8   : > { %s5953_s6 = sld [smem:[#allocation18_spill]] }
 0x4b9   : > { %p3500_p1 = pneg %p3499_p0 }
 0x4bd   : > { %s3333_s7 = sand.u32 1, %s5951_s20  }
 0x4be   : > { %s3334_s9 = scalar_lea.sflag [#allocation7], %s3333_s7 }
 0x4bf   : > { %3723 = dma.done.wait (%p3500_p1), %s3334_s9, 128  }
 0x4c0   : > { %3725 = vsyncadd (%p3500_p1), %s3334_s9, 4294967168  ;;  %s22_s17 = sadd.s32 1, %s5953_s6   ;;  %s5954_s8 = sld [smem:[#allocation16_spill]] }
 0x4c1   : > { %p19_p2 = scmp.ge.s32.totalorder %s22_s17, 4   ;;  %s5955_s14 = sld [smem:[#allocation20_spill]] }
 0x4c2   : > { %s5956_s15 = sld [smem:[#allocation17_spill]]  ;;  %s5958_s12 = smov %s3732_s13 }
 0x4c3   : > { %s5957_s16 = sld [smem:[#allocation19_spill]]  ;;  %21 = sbr.rel (!%p19_p2) target bundleno = 10 (0xa), region = 109 }
 0x4c6   : > { %s5959_s13 = smov %s5954_s8 }
 0x4c8   :  { %3340 = vsyncpa [#allocation6], 1 }
 0x4c9   :  { %3342 = vsyncpa [#allocation6 + $0x1], 1 }
 0x4ca   :  { %3343 = vsyncpa [#allocation9], 1 }
 0x4cb   :  { %3345 = vsyncpa [#allocation9 + $0x1], 1 }
 0x4cc   :  { %3346 = vsyncpa [#allocation7], 1 }
 0x4cd   :  { %3348 = vsyncpa [#allocation7 + $0x1], 1 }

</bundles_post_ra>
